<compile_context>
chip_gen: v5e
topology: v5e:2x2
jax: 0.10.0
libtpu: 0.0.40
codegen_flags: <defaults>
</compile_context>

<pallas_src>
import jax
import jax.numpy as jnp
import numpy as np
from jax.experimental import pallas as pl
from jax.experimental.pallas import tpu as pltpu

BASE_LOD = 5
FEAT_DIM = 48
TILE = 512          # points per grid step


def _make_kernel(lods, feat_dim, tile):
    """Fused multi-LOD separable bilinear lookup kernel (transposed layout)."""

    def kernel(pts_ref, *refs):
        # pts_ref : (2, tile)            row 0 = x, row 1 = y (lane-dense points)
        # refs    : cb2_ref per LOD      (feat*res, res) bf16, VMEM resident
        #           out_ref (last)       (feat, tile) f32, lane-dense stores
        cb_refs = refs[:-1]
        out_ref = refs[-1]

        x = jnp.clip(pts_ref[0:1, :], 0.0, 1.0)       # (1, tile)
        y = jnp.clip(pts_ref[1:2, :], 0.0, 1.0)       # (1, tile)

        acc = None
        for res, cb_ref in zip(lods, cb_refs):
            xs = x * (res - 1)                        # (1, tile)
            ys = y * (res - 1)
            # Grid-line coordinates: a tiny (res, 1) column (loop-invariant
            # work is negligible at this size).
            g = jax.lax.broadcasted_iota(jnp.int32, (res, 1), 0).astype(jnp.float32)
            # Separable tent (hat) weights == clamped bilinear weights,
            # exactly 2 non-zeros per point per axis.
            wx = jnp.maximum(0.0, 1.0 - jnp.abs(g - xs))      # (res, tile)
            wy = jnp.maximum(0.0, 1.0 - jnp.abs(g - ys))      # (res, tile)

            # Stage 1 (MXU, bf16 operands / f32 accumulate):
            #   (feat*res, res) @ (res, tile) -> (feat*res, tile)
            p = jnp.dot(cb_ref[...], wx.astype(jnp.bfloat16),
                        preferred_element_type=jnp.float32)
            # Stage 2 (VPU multiply + sublane reduce over gy):
            #   reshape keeps rows in place (res % 8 == 0), so it is layout-free.
            p3 = p.reshape(feat_dim, res, tile)               # (feat, res, tile)
            term = jnp.sum(p3 * wy[None, :, :], axis=1)       # (feat, tile)
            acc = term if acc is None else acc + term

        out_ref[...] = acc

    return kernel


def dense_grid_forward(pts, codebooks, lods, tile=TILE):
    """Mirrors DenseGrid.forward: per-LOD bilinear lookup, summed over LODs
    (torch.cat(feats, -1).sum(-1) == sum over LODs)."""
    lods = tuple(int(r) for r in lods)
    n = pts.shape[0]
    n_pad = pl.cdiv(n, tile) * tile
    pts_t = jnp.pad(pts.astype(jnp.float32), ((0, n_pad - n), (0, 0))).T   # (2, n_pad)
    feat_dim = codebooks[0].shape[1]

    cb2s = []
    in_specs = [pl.BlockSpec((2, tile), lambda i: (0, i))]                 # point tile
    for res, cb in zip(lods, codebooks):
        assert cb.shape == (res * res, feat_dim), (cb.shape, res, feat_dim)
        # (res*res, feat) -> (feat, res*res) -> (feat*res_y, res_x); bf16 once.
        cb2 = jnp.transpose(cb.astype(jnp.float32)).reshape(feat_dim * res, res)
        cb2s.append(cb2.astype(jnp.bfloat16))
        in_specs.append(pl.BlockSpec((feat_dim * res, res), lambda i: (0, 0)))
        # TODO(synk): for res >= 128 the (feat*res, tile) stage-1 partial grows to
        # >= 12 MiB f32; drop `tile` or raise vmem_limit_bytes on v7x there.

    kernel = _make_kernel(lods, feat_dim, tile)
    out_t = pl.pallas_call(
        kernel,
        out_shape=jax.ShapeDtypeStruct((feat_dim, n_pad), jnp.float32),
        grid_spec=pltpu.PrefetchScalarGridSpec(
            num_scalar_prefetch=0,
            grid=(n_pad // tile,),
            in_specs=in_specs,
            out_specs=pl.BlockSpec((feat_dim, tile), lambda i: (0, i)),
        ),
        compiler_params=pltpu.CompilerParams(
            dimension_semantics=("parallel",)),
    )(pts_t, *cb2s)

    # Single lane-dense -> row-major transpose for the caller; padded rows dropped.
    return out_t[:, :n].T                                                   # (n, feat)


def _reference_bilerp(pts, cb, res):
    """Pure-JAX gather reference with the same NGLOD convention."""
    x = jnp.clip(pts[:, 0], 0.0, 1.0) * (res - 1)
    y = jnp.clip(pts[:, 1], 0.0, 1.0) * (res - 1)
    x0 = jnp.clip(jnp.floor(x).astype(jnp.int32), 0, res - 2)
    y0 = jnp.clip(jnp.floor(y).astype(jnp.int32), 0, res - 2)
    wx = (x - x0)[:, None]
    wy = (y - y0)[:, None]
    c00 = cb[y0 * res + x0]
    c10 = cb[y0 * res + x0 + 1]
    c01 = cb[(y0 + 1) * res + x0]
    c11 = cb[(y0 + 1) * res + x0 + 1]
    return (c00 * (1 - wx) * (1 - wy) + c10 * wx * (1 - wy)
            + c01 * (1 - wx) * wy + c11 * wx * wy)


if __name__ == "__main__":
    key = jax.random.PRNGKey(0)
    k_cb, k_pts = jax.random.split(key)

    res = 2 ** BASE_LOD                   # 32 -> codebook (1024, 48)
    lods = [res]                          # DenseGrid has a single LOD (base_lod=5)
    codebook = 0.1 * jax.random.normal(k_cb, (res * res, FEAT_DIM), dtype=jnp.float32)
    codebooks = [codebook]

    n_pts = 2000                          # pads to 2048 -> 4 grid steps of 512
    pts = jax.random.uniform(k_pts, (n_pts, 2), dtype=jnp.float32)

    out = jax.block_until_ready(dense_grid_forward(pts, codebooks, lods))

    # Reference uses the bf16-rounded codebook (the kernel's matmul operands are
    # bf16 with f32 accumulation); tolerance loosened accordingly.
    cb_q = codebook.astype(jnp.bfloat16).astype(jnp.float32)
    ref = _reference_bilerp(pts, cb_q, res)
    np.testing.assert_allclose(np.asarray(out), np.asarray(ref), atol=5e-3, rtol=2e-2)
    assert out.shape == (n_pts, FEAT_DIM)
    print("KERNEL_OK")
</pallas_src>

<mosaic_0001>
module attributes {stable_mosaic.version = 11 : i64} {
  func.func @kernel(%arg0: i32, %arg1: memref<2x512xf32, #tpu.memory_space<vmem>>, %arg2: memref<1536x32xbf16, #tpu.memory_space<vmem>>, %arg3: memref<48x512xf32, #tpu.memory_space<vmem>>) attributes {dimension_semantics = [#tpu.dimension_semantics<parallel>], iteration_bounds = array<i64: 4>, scalar_prefetch = 0 : i64, scratch_operands = 0 : i64, tpu.core_type = #tpu.core_type<tc>, window_params = [{transform_indices = @transform_0, window_bounds = array<i64: 2, 512>}, {pipeline_mode = #tpu.pipeline_mode<synchronous>, transform_indices = @transform_1, window_bounds = array<i64: 1536, 32>}, {transform_indices = @transform_2, window_bounds = array<i64: 48, 512>}]} {
    %c0 = arith.constant 0 : index
    %c0_0 = arith.constant 0 : index
    %0 = vector.load %arg1[%c0, %c0_0] : memref<2x512xf32, #tpu.memory_space<vmem>>, vector<1x512xf32>
    %cst = arith.constant 0.000000e+00 : f32
    %cst_1 = arith.constant 1.000000e+00 : f32
    %1 = vector.broadcast %cst : f32 to vector<1x512xf32>
    %2 = arith.maximumf %1, %0 : vector<1x512xf32>
    %3 = vector.broadcast %cst_1 : f32 to vector<1x512xf32>
    %4 = arith.minimumf %3, %2 : vector<1x512xf32>
    %c1 = arith.constant 1 : index
    %c0_2 = arith.constant 0 : index
    %5 = vector.load %arg1[%c1, %c0_2] : memref<2x512xf32, #tpu.memory_space<vmem>>, vector<1x512xf32>
    %cst_3 = arith.constant 0.000000e+00 : f32
    %cst_4 = arith.constant 1.000000e+00 : f32
    %6 = vector.broadcast %cst_3 : f32 to vector<1x512xf32>
    %7 = arith.maximumf %6, %5 : vector<1x512xf32>
    %8 = vector.broadcast %cst_4 : f32 to vector<1x512xf32>
    %9 = arith.minimumf %8, %7 : vector<1x512xf32>
    %cst_5 = arith.constant 3.100000e+01 : f32
    %10 = vector.broadcast %cst_5 : f32 to vector<1x512xf32>
    %11 = arith.mulf %4, %10 : vector<1x512xf32>
    %cst_6 = arith.constant 3.100000e+01 : f32
    %12 = vector.broadcast %cst_6 : f32 to vector<1x512xf32>
    %13 = arith.mulf %9, %12 : vector<1x512xf32>
    %14 = tpu.iota {dimensions = array<i32: 0>} : vector<32x1xi32>
    %15 = arith.sitofp %14 : vector<32x1xi32> to vector<32x1xf32>
    %16 = vector.broadcast %15 : vector<32x1xf32> to vector<32x512xf32>
    %17 = vector.broadcast %11 : vector<1x512xf32> to vector<32x512xf32>
    %18 = arith.subf %16, %17 : vector<32x512xf32>
    %19 = math.absf %18 : vector<32x512xf32>
    %cst_7 = arith.constant 1.000000e+00 : f32
    %20 = vector.broadcast %cst_7 : f32 to vector<32x512xf32>
    %21 = arith.subf %20, %19 : vector<32x512xf32>
    %cst_8 = arith.constant 0.000000e+00 : f32
    %22 = vector.broadcast %cst_8 : f32 to vector<32x512xf32>
    %23 = arith.maximumf %22, %21 : vector<32x512xf32>
    %24 = vector.broadcast %15 : vector<32x1xf32> to vector<32x512xf32>
    %25 = vector.broadcast %13 : vector<1x512xf32> to vector<32x512xf32>
    %26 = arith.subf %24, %25 : vector<32x512xf32>
    %27 = math.absf %26 : vector<32x512xf32>
    %cst_9 = arith.constant 1.000000e+00 : f32
    %28 = vector.broadcast %cst_9 : f32 to vector<32x512xf32>
    %29 = arith.subf %28, %27 : vector<32x512xf32>
    %cst_10 = arith.constant 0.000000e+00 : f32
    %30 = vector.broadcast %cst_10 : f32 to vector<32x512xf32>
    %31 = arith.maximumf %30, %29 : vector<32x512xf32>
    %c0_11 = arith.constant 0 : index
    %c0_12 = arith.constant 0 : index
    %32 = vector.load %arg2[%c0_11, %c0_12] : memref<1536x32xbf16, #tpu.memory_space<vmem>>, vector<1536x32xbf16>
    %33 = arith.truncf %23 : vector<32x512xf32> to vector<32x512xbf16>
    %cst_13 = arith.constant dense<0.000000e+00> : vector<1536x512xf32>
    %34 = tpu.matmul %32, %33, %cst_13 {dimension_numbers = #tpu.dot_dimension_numbers<[1], [0], [0], [1], [0, 0, 1, 1], [], []>} : vector<1536x32xbf16>, vector<32x512xbf16>, vector<1536x512xf32> -> vector<1536x512xf32>
    %35 = vector.shape_cast %34 : vector<1536x512xf32> to vector<48x32x512xf32>
    %36 = vector.shape_cast %31 : vector<32x512xf32> to vector<1x32x512xf32>
    %37 = vector.broadcast %36 : vector<1x32x512xf32> to vector<48x32x512xf32>
    %38 = arith.mulf %35, %37 : vector<48x32x512xf32>
    %cst_14 = arith.constant dense<0.000000e+00> : vector<48x512xf32>
    %39 = vector.multi_reduction <add>, %38, %cst_14 [1] : vector<48x32x512xf32> to vector<48x512xf32>
    %c0_15 = arith.constant 0 : index
    %c0_16 = arith.constant 0 : index
    %40 = vector.load %arg3[%c0_15, %c0_16] : memref<48x512xf32, #tpu.memory_space<vmem>>, vector<48x512xf32>
    tpu.vector_store %arg3[%c0_15, %c0_16], %39 {strides = array<i32>} : memref<48x512xf32, #tpu.memory_space<vmem>>, vector<48x512xf32>,
    return
  }
  func.func @transform_0(%arg0: i32) -> (i32, i32) {
    %c0_i32 = arith.constant 0 : i32
    %c0_i32_0 = arith.constant 0 : i32
    return %c0_i32, %arg0 : i32, i32
  }
  func.func @transform_1(%arg0: i32) -> (i32, i32) {
    %c0_i32 = arith.constant 0 : i32
    %c0_i32_0 = arith.constant 0 : i32
    %c0_i32_1 = arith.constant 0 : i32
    return %c0_i32, %c0_i32_0 : i32, i32
  }
  func.func @transform_2(%arg0: i32) -> (i32, i32) {
    %c0_i32 = arith.constant 0 : i32
    %c0_i32_0 = arith.constant 0 : i32
    return %c0_i32, %arg0 : i32, i32
  }
}

</mosaic_0001>

<bundles_post_ra>
// kernel: tpu_custom_call.1
= control target key start
LH: loop header
LB: loop body
LE: loop exit
PB: predicated region body
PF: predicated region fallthrough
CT: control target
= control target key end

     0   :  { %7 = vsyncpa [#allocation3], 0  ;;  %s9572_s0 = inlined_call_operand.vmem [shape: f32[2,2048], index: 0, kind: input, shape index: {}]   ;;  %s9573_s1 = inlined_call_operand.vmem [shape: bf16[1536,32], index: 1, kind: input, shape index: {}]   ;;  %s9574_s2 = inlined_call_operand.hbm [shape: f32[48,2048], index: 2, kind: output, shape index: {}]  }
   0x1   :  { %9 = vsyncpa [#allocation3 + $0x1], 0  ;;  %s7225_s9 = smov 0   ;;  %s7227_s10 = smov 0  }
   0x2   :  { %s7229_s11 = smov 0   ;;  %s7231_s12 = smov 0  }
   0x3 LB: > { %s7246_s13 = sadd.s32 4294967295, %s7205_s12   ;;  %s6224_s14 = sadd.s32 4294967294, %s7205_s12   ;;  %s7205_s12 = sphi %s7231_s12, %s9580_s12   ;;  %s7201_s11 = sphi %s7229_s11, %s9579_s11   ;;  %s7197_s10 = sphi %s7227_s10, %s9578_s10   ;;  %s7193_s9 = sphi %s7225_s9, %s9577_s9  }
   0x4   : > { %s7250_s15 = sadd.s32 1, %s7205_s12   ;;  %s69_s16 = sadd.s32 1, %s7201_s11 }
   0x5   : > { %s66_s17 = ssub.s32 %s7205_s12, %s7250_s15  ;;  %p79_p0 = scmp.ne.s32.totalorder %s7201_s11, %s7197_s10 }
   0x6   : > { %p67_p1 = scmp.eq.s32.totalorder %s66_s17, 0  ;;  %p80_p2 = scmp.eq.s32.totalorder %s7246_s13, 3 }
   0x7   : > { %p85_p3 = scmp.ne.s32.totalorder %s7197_s10, %s7193_s9  ;;  %p86_p4 = scmp.eq.s32.totalorder %s6224_s14, 3 }
   0x8   : > { %s7261_s18 = scalar_select %p67_p1, %s7201_s11, %s69_s16  }
   0x9   : > { %p7263_p5 = por %p80_p2, %p79_p0  ;;  %p7267_p6 = por %p86_p4, %p85_p3 }
   0xa   : > { %p6227_p7 = scmp.ge.s32.totalorder %s7205_s12, 1  ;;  %p116_p8 = scmp.lt.s32.totalorder %s7205_s12, 5 }
   0xc   : > { %p117_p9 = pnand %p6227_p7, %p116_p8 }
   0xd   : > { %s6228_s21 = sshll.u32 (!%p117_p9), %s7246_s13, 2  ;;  %s135_s16 = sand.u32 (!%p117_p9), 1, %s7197_s10  }
   0xe   : > { %120 = sbr.rel (%p117_p9) target bundleno = 1743 (0x6cf), region = 28  ;;  %p139_p10 = scmp.lt.s32.totalorder (!%p117_p9), %s6228_s21, 15 }
   0xf   : > { %s7825_s17 = smul.u32 (!%p117_p9), 192, %s135_s16  ;;  %s7099_s28 = sshll.u32 (!%p117_p9), %s7246_s13, 5 }
  0x10   : > { %s6158_s3 = scalar_lea.hbm (!%p117_p9), %s9574_s2, %s7099_s28  ;;  %s6147_s5 = scalar_lea.sflag (!%p117_p9), [#allocation3], %s135_s16 }
  0x11   : > { %s6161_s4 = sshll.u32 (!%p117_p9), %s6158_s3, 4  ;;  %s6162_s4 = int_to_ptr.hbm [resolvable:$true] %s6161_s4 }
  0x12   : > { %s7157_s6 = sshra.s32 (!%p117_p9), %s6162_s4, 4  ;;  %s7158_s6 = int_to_ptr.hbm [resolvable:$true] %s7157_s6 }
  0x13   : > { %v155_v0 = vlaneseq  ;;  %s9582_s21 = smov (!%p139_p10, %s6228_s21), 15  ;;  %vm990_vm0 = vcmask 261120   ;;  %vm5923_vm1 = vcmask 1041409   ;;  %vm5925_vm2 = vcmask 1042434   ;;  %s7159_s7 = scalar_lea.hbm %s7158_s6, 192 }
  0x14   : > { %s6229_s22 = sshll.u32 %s9582_s21, 1  ;;  %vm5927_vm3 = vcmask 1043459   ;;  %vm5929_vm4 = vcmask 1044484   ;;  %vm5931_vm5 = vcmask 1045509   ;;  %vm5933_vm6 = vcmask 1046534   ;;  %s7844_s21 = scalar_lea.vmem [#allocation2], %s7825_s17 }
  0x15   : > { %v156_v1 = vshrl.u32 %v155_v0, 7  ;;  %s142_s25 = scalar_lea.vmem %s9572_s0, %s6229_s22  ;;  %vm5935_vm7 = vcmask 1047559   ;;  %s6159_s13 = sshll.u32 %s7844_s21, 4  ;;  %s9532_s13 = int_to_ptr.vmem [resolvable:$true] %s6159_s13 }
  0x16   : > { %v146_v2 = vld [vmem:[%s142_s25] ss:$2 sm:$0xf]  ;;  %v6230_v3 = vld [vmem:[%s142_s25 + $0x1] ss:$2 sm:$0xf]  ;;  %p7160_p11 = scmp.ne.s32.totalorder %s7158_s6, %s7159_s7  ;;  %p7164_p0 = scmp.lt.s32.totalorder %s7158_s6, %s9574_s2 }
  0x17   : > { %v147_v4 = vmax.f32 %v146_v2, 0.0  ;;  %v151_v5 = vmax.f32 %v6230_v3, 0.0  ;;  %v158_v6 = vadd.s32 16, %v156_v1  ;;  %v159_v7 = vadd.s32 24, %v156_v1  ;;  %s7163_s17 = scalar_lea.hbm %s9574_s2, 768 }
  0x18   : > { %v157_v34 = vadd.s32 8, %v156_v1  ;;  %v7317_v41 = vcvt.s32.f32 %v156_v1  ;;  %p7161_p12 = pnand %p7160_p11, %p7263_p5  ;;  %p7165_p1 = scmp.lt.s32.totalorder %s7163_s17, %s7159_s7 }
  0x19   : > { %v148_v8 = vmin.f32 %v147_v4, 1.0  ;;  %v152_v9 = vmin.f32 %v151_v5, 1.0  ;;  %v7277_v12 = vcvt.s32.f32 %v158_v6  ;;  %v7279_v13 = vcvt.s32.f32 %v159_v7 }
  0x1a   : > { %v7319_v42 = vcvt.s32.f32 %v157_v34  ;;  %p7162_p13 = pneg %p7161_p12  ;;  %p7166_p2 = por %p7165_p1, %p7164_p0 }
  0x1b   : > { %v153_v10 = vmul.f32 31.0, %v148_v8  ;;  %v154_v11 = vmul.f32 31.0, %v152_v9 }
  0x1c   : > { %p7167_p3 = pnand %p7166_p2, %p7162_p13 }
  0x1d   : > { %v165_v14 = vperm.slane %v153_v10, 0  ;;  %v7281_v15 = vperm.slane %v154_v11, 0  ;;  %v7283_v16 = vperm.slane %v154_v11, 1  ;;  %v7285_v17 = vperm.slane %v154_v11, 2 }
  0x1e   : > { %v7287_v18 = vperm.slane %v154_v11, 3  ;;  %v7289_v19 = vperm.slane %v153_v10, 1  ;;  %v7313_v39 = vperm.slane %v153_v10, 2  ;;  %v7315_v40 = vperm.slane %v153_v10, 3 }
  0x1f   : > { %v181_v20 = vsub.f32 %v7277_v12, %v165_v14  ;;  %v185_v21 = vsub.f32 %v7279_v13, %v165_v14  ;;  %v254_v22 = vsub.f32 %v7277_v12, %v7281_v15  ;;  %v255_v23 = vsub.f32 %v7277_v12, %v7283_v16 }
  0x20   : > { %v256_v24 = vsub.f32 %v7277_v12, %v7285_v17  ;;  %v257_v25 = vsub.f32 %v7277_v12, %v7287_v18  ;;  %v258_v26 = vsub.f32 %v7279_v13, %v7281_v15  ;;  %v259_v27 = vsub.f32 %v7279_v13, %v7283_v16 }
  0x21   : > { %v197_v28 = vand.u32 2147483647, %v181_v20  ;;  %v201_v29 = vand.u32 2147483647, %v185_v21  ;;  %v260_v30 = vsub.f32 %v7279_v13, %v7285_v17  ;;  %v261_v31 = vsub.f32 %v7279_v13, %v7287_v18 }
  0x22   : > { %v182_v37 = vsub.f32 %v7277_v12, %v7289_v19  ;;  %v186_v38 = vsub.f32 %v7279_v13, %v7289_v19  ;;  %v183_v46 = vsub.f32 %v7277_v12, %v7313_v39  ;;  %v187_v47 = vsub.f32 %v7279_v13, %v7313_v39 }
  0x23   : > { %v213_v32 = vsub.f32 1.0, %v197_v28  ;;  %v217_v33 = vsub.f32 1.0, %v201_v29  ;;  %v184_v48 = vsub.f32 %v7277_v12, %v7315_v40  ;;  %v188_v50 = vsub.f32 %v7279_v13, %v7315_v40 }
  0x24   : > { %v198_v44 = vand.u32 2147483647, %v182_v37  ;;  %v202_v45 = vand.u32 2147483647, %v186_v38  ;;  %v173_v51 = vsub.f32 %v7317_v41, %v165_v14  ;;  %v177_v52 = vsub.f32 %v7319_v42, %v165_v14  ;;  %v7003_v38 = vld [vmem:[%s9573_s1] sm:$0xff] }
  0x25   : > { %v229_v35 = vmax.f32 %v213_v32, 0.0  ;;  %v233_v36 = vmax.f32 %v217_v33, 0.0  ;;  %v199_v54 = vand.u32 2147483647, %v183_v46  ;;  %v203_v55 = vand.u32 2147483647, %v187_v47 }
  0x26   : > { %v214_v49 = vsub.f32 1.0, %v198_v44  ;;  %v218_v53 = vsub.f32 1.0, %v202_v45  ;;  %v246_v56 = vsub.f32 %v7317_v41, %v7281_v15  ;;  %v200_v58 = vand.u32 2147483647, %v184_v48 }
  0x27   : > { %v506_v43 = vpack.c.bf16 %v233_v36, %v229_v35  ;;  %v204_v59 = vand.u32 2147483647, %v188_v50  ;;  %v247_v60 = vsub.f32 %v7317_v41, %v7283_v16  ;;  %v215_v62 = vsub.f32 1.0, %v199_v54 }
  0x28   : > { %v230_v57 = vmax.f32 %v214_v49, 0.0  ;;  %v234_v61 = vmax.f32 %v218_v53, 0.0  ;;  %v219_v63 = vsub.f32 1.0, %v203_v55  ;;  %v189_v0 = vand.u32 2147483647, %v173_v51 }
  0x29   : > { %1285 = vmatpush.bf16.msra.mxu0 %v506_v43  ;;  %v216_v1 = vsub.f32 1.0, %v200_v58  ;;  %v220_v2 = vsub.f32 1.0, %v204_v59  ;;  %v193_v3 = vand.u32 2147483647, %v177_v52  ;;  %v248_v4 = vsub.f32 %v7317_v41, %v7285_v17 }
  0x2a   : > { %v507_v5 = vpack.c.bf16 %v234_v61, %v230_v57  ;;  %v231_v6 = vmax.f32 %v215_v62, 0.0  ;;  %v235_v7 = vmax.f32 %v219_v63, 0.0  ;;  %v205_v8 = vsub.f32 1.0, %v189_v0 }
  0x2b   : > { %v232_v9 = vmax.f32 %v216_v1, 0.0  ;;  %v236_v10 = vmax.f32 %v220_v2, 0.0  ;;  %v209_v11 = vsub.f32 1.0, %v193_v3  ;;  %v249_v14 = vsub.f32 %v7317_v41, %v7287_v18 }
  0x2c   : > { %1774 = vmatpush.bf16.msra.mxu1 %v507_v5  ;;  %v508_v20 = vpack.c.bf16 %v235_v7, %v231_v6  ;;  %v221_v21 = vmax.f32 %v205_v8, 0.0  ;;  %v250_v28 = vsub.f32 %v7319_v42, %v7281_v15  ;;  %v251_v29 = vsub.f32 %v7319_v42, %v7283_v16  ;;  %v7004_v5 = vld [vmem:[%s9573_s1 + $0x8] sm:$0xff]  ;;  %v7005_v6 = vld [vmem:[%s9573_s1 + $0x10] sm:$0xff]  ;;  %v7006_v7 = vld [vmem:[%s9573_s1 + $0x18] sm:$0xff] }
  0x2d   : > { %v509_v32 = vpack.c.bf16 %v236_v10, %v232_v9  ;;  %v225_v33 = vmax.f32 %v209_v11, 0.0  ;;  %v252_v34 = vsub.f32 %v7319_v42, %v7285_v17  ;;  %v253_v35 = vsub.f32 %v7319_v42, %v7287_v18  ;;  %v7007_v8 = vld [vmem:[%s9573_s1 + $0x20] sm:$0xff]  ;;  %v7008_v9 = vld [vmem:[%s9573_s1 + $0x28] sm:$0xff]  ;;  %v7009_v10 = vld [vmem:[%s9573_s1 + $0x30] sm:$0xff] }
  0x2e   : > { %2263 = vmatpush.bf16.msra.mxu2 %v508_v20  ;;  %v174_v37 = vsub.f32 %v7317_v41, %v7289_v19  ;;  %v178_v43 = vsub.f32 %v7319_v42, %v7289_v19  ;;  %v175_v45 = vsub.f32 %v7317_v41, %v7313_v39  ;;  %v179_v46 = vsub.f32 %v7319_v42, %v7313_v39  ;;  %v7010_v11 = vld [vmem:[%s9573_s1 + $0x38] sm:$0xff] }
  0x2f   : > { %2752 = vmatpush.bf16.msra.mxu3 %v509_v32  ;;  %v502_v36 = vpack.c.bf16 %v225_v33, %v221_v21  ;;  %v176_v47 = vsub.f32 %v7317_v41, %v7315_v40  ;;  %v180_v48 = vsub.f32 %v7319_v42, %v7315_v40  ;;  %v262_v20 = vand.u32 2147483647, %v246_v56  ;;  %v7011_v32 = vld [vmem:[%s9573_s1 + $0x40] sm:$0xff]  ;;  %v7012_v41 = vld [vmem:[%s9573_s1 + $0x48] sm:$0xff] }
  0x30   : > { %v190_v44 = vand.u32 2147483647, %v174_v37  ;;  %v194_v49 = vand.u32 2147483647, %v178_v43  ;;  %v191_v51 = vand.u32 2147483647, %v175_v45 }
  0x31   : > { %1286 = vmatpush.bf16.msra.mxu0 %v502_v36  ;;  %v195_v52 = vand.u32 2147483647, %v179_v46  ;;  %v192_v53 = vand.u32 2147483647, %v176_v47  ;;  %v196_v55 = vand.u32 2147483647, %v180_v48 }
  0x32   : > { %v206_v50 = vsub.f32 1.0, %v190_v44  ;;  %v210_v19 = vsub.f32 1.0, %v194_v49  ;;  %v207_v57 = vsub.f32 1.0, %v191_v51  ;;  %v266_v21 = vand.u32 2147483647, %v250_v28 }
  0x33   : > { %v211_v58 = vsub.f32 1.0, %v195_v52  ;;  %v208_v39 = vsub.f32 1.0, %v192_v53  ;;  %v212_v61 = vsub.f32 1.0, %v196_v55  ;;  %v278_v36 = vsub.f32 1.0, %v262_v20 }
  0x34   : > { %6615 = vmatmul.msk.bf16.vlgmr.msra.gmra.mxu0 %vm990_vm0, %v7003_v38  ;;  %v222_v54 = vmax.f32 %v206_v50, 0.0  ;;  %v226_v59 = vmax.f32 %v210_v19, 0.0  ;;  %v223_v62 = vmax.f32 %v207_v57, 0.0  ;;  %v282_v37 = vsub.f32 1.0, %v266_v21 }
  0x35   : > { %v227_v63 = vmax.f32 %v211_v58, 0.0  ;;  %v224_v0 = vmax.f32 %v208_v39, 0.0  ;;  %v228_v1 = vmax.f32 %v212_v61, 0.0  ;;  %v270_v56 = vand.u32 2147483647, %v254_v22 }
  0x36   : > { %v503_v40 = vpack.c.bf16 %v226_v59, %v222_v54  ;;  %v7428_v28 = vmax.f32 %v278_v36, 0.0  ;;  %v263_v43 = vand.u32 2147483647, %v247_v60  ;;  %v267_v44 = vand.u32 2147483647, %v251_v29 }
  0x37   : > { %v504_v2 = vpack.c.bf16 %v227_v63, %v223_v62  ;;  %v505_v3 = vpack.c.bf16 %v228_v1, %v224_v0  ;;  %v286_v46 = vsub.f32 1.0, %v270_v56  ;;  %v271_v52 = vand.u32 2147483647, %v255_v23 }
  0x38   : > { %1775 = vmatpush.bf16.msra.mxu1 %v503_v40  ;;  %v279_v22 = vsub.f32 1.0, %v263_v43  ;;  %v283_v50 = vsub.f32 1.0, %v267_v44  ;;  %v274_v60 = vand.u32 2147483647, %v258_v26  ;;  %v264_v29 = vand.u32 2147483647, %v248_v4 }
  0x39   : > { %2264 = vmatpush.bf16.msra.mxu2 %v504_v2  ;;  %2753 = vmatpush.bf16.msra.mxu3 %v505_v3  ;;  %v7446_v53 = vmax.f32 %v286_v46, 0.0  ;;  %v265_v19 = vand.u32 2147483647, %v249_v14  ;;  %v268_v23 = vand.u32 2147483647, %v252_v34  ;;  %v287_v57 = vsub.f32 1.0, %v271_v52 }
  0x3a   : > { %v269_v15 = vand.u32 2147483647, %v253_v35  ;;  %v7462_v26 = vmax.f32 %v279_v22, 0.0  ;;  %v7464_v54 = vmax.f32 %v283_v50, 0.0  ;;  %v290_v14 = vsub.f32 1.0, %v274_v60 }
  0x3b   : > { %6711 = vmatmul.msk.bf16.vlgmr.msra.gmra.mxu1 %vm990_vm0, %v7003_v38  ;;  %v280_v58 = vsub.f32 1.0, %v264_v29  ;;  %v281_v39 = vsub.f32 1.0, %v265_v19  ;;  %v284_v42 = vsub.f32 1.0, %v268_v23  ;;  %v272_v40 = vand.u32 2147483647, %v256_v24 }
  0x3c   : > { %6807 = vmatmul.msk.bf16.vlgmr.msra.gmra.mxu2 %vm990_vm0, %v7003_v38  ;;  %6903 = vmatmul.msk.bf16.vlgmr.msra.gmra.mxu3 %vm990_vm0, %v7003_v38  ;;  %v7430_v38 = vmax.f32 %v282_v37, 0.0  ;;  %v285_v61 = vsub.f32 1.0, %v269_v15  ;;  %v7477_v1 = vmax.f32 %v290_v14, 0.0  ;;  %v273_v3 = vand.u32 2147483647, %v257_v25 }
  0x3e   : > { %v7493_v24 = vmax.f32 %v285_v61, 0.0  ;;  %v289_v25 = vsub.f32 1.0, %v273_v3 }
  0x40   : > { %v7511_v22 = vmax.f32 %v289_v25, 0.0 }
  0x44   : > { %6616 = vmatmul.msk.bf16.gmra.mxu0 %vm990_vm0, %v7004_v5 }
  0x4b   : > { %6712 = vmatmul.msk.bf16.gmra.mxu1 %vm990_vm0, %v7004_v5 }
  0x4c   : > { %6808 = vmatmul.msk.bf16.gmra.mxu2 %vm990_vm0, %v7004_v5  ;;  %6904 = vmatmul.msk.bf16.gmra.mxu3 %vm990_vm0, %v7004_v5  ;;  %v275_v5 = vand.u32 2147483647, %v259_v27 }
  0x4e   : > { %v291_v21 = vsub.f32 1.0, %v275_v5 }
  0x50   : > { %v7513_v50 = vmax.f32 %v291_v21, 0.0 }
  0x54   : > { %6617 = vmatmul.msk.bf16.gmra.mxu0 %vm990_vm0, %v7005_v6 }
  0x5b   : > { %6713 = vmatmul.msk.bf16.gmra.mxu1 %vm990_vm0, %v7005_v6 }
  0x5c   : > { %6809 = vmatmul.msk.bf16.gmra.mxu2 %vm990_vm0, %v7005_v6  ;;  %6905 = vmatmul.msk.bf16.gmra.mxu3 %vm990_vm0, %v7005_v6  ;;  %v7485_v6 = vmax.f32 %v280_v58, 0.0 }
  0x64   : > { %6618 = vmatmul.msk.bf16.gmra.mxu0 %vm990_vm0, %v7006_v7 }
  0x6b   : > { %6714 = vmatmul.msk.bf16.gmra.mxu1 %vm990_vm0, %v7006_v7 }
  0x6c   : > { %6810 = vmatmul.msk.bf16.gmra.mxu2 %vm990_vm0, %v7006_v7  ;;  %6906 = vmatmul.msk.bf16.gmra.mxu3 %vm990_vm0, %v7006_v7  ;;  %v7487_v7 = vmax.f32 %v284_v42, 0.0 }
  0x74   : > { %6619 = vmatmul.msk.bf16.gmra.mxu0 %vm990_vm0, %v7007_v8 }
  0x7b   : > { %6715 = vmatmul.msk.bf16.gmra.mxu1 %vm990_vm0, %v7007_v8 }
  0x7c   : > { %6811 = vmatmul.msk.bf16.gmra.mxu2 %vm990_vm0, %v7007_v8  ;;  %6907 = vmatmul.msk.bf16.gmra.mxu3 %vm990_vm0, %v7007_v8  ;;  %v7489_v8 = vmax.f32 %v287_v57, 0.0 }
  0x84   : > { %6620 = vmatmul.msk.bf16.gmra.mxu0 %vm990_vm0, %v7008_v9 }
  0x8b   : > { %6716 = vmatmul.msk.bf16.gmra.mxu1 %vm990_vm0, %v7008_v9 }
  0x8c   : > { %6812 = vmatmul.msk.bf16.gmra.mxu2 %vm990_vm0, %v7008_v9  ;;  %6908 = vmatmul.msk.bf16.gmra.mxu3 %vm990_vm0, %v7008_v9  ;;  %v7491_v9 = vmax.f32 %v281_v39, 0.0 }
  0x94   : > { %6621 = vmatmul.msk.bf16.gmra.mxu0 %vm990_vm0, %v7009_v10 }
  0x9b   : > { %6717 = vmatmul.msk.bf16.gmra.mxu1 %vm990_vm0, %v7009_v10 }
  0x9c   : > { %6813 = vmatmul.msk.bf16.gmra.mxu2 %vm990_vm0, %v7009_v10  ;;  %6909 = vmatmul.msk.bf16.gmra.mxu3 %vm990_vm0, %v7009_v10 }
  0xa4   : > { %6622 = vmatmul.msk.bf16.gmra.mxu0 %vm990_vm0, %v7010_v11 }
  0xab   : > { %6718 = vmatmul.msk.bf16.gmra.mxu1 %vm990_vm0, %v7010_v11 }
  0xac   : > { %6814 = vmatmul.msk.bf16.gmra.mxu2 %vm990_vm0, %v7010_v11  ;;  %6910 = vmatmul.msk.bf16.gmra.mxu3 %vm990_vm0, %v7010_v11  ;;  %v288_v11 = vsub.f32 1.0, %v272_v40 }
  0xb1   : > { %v1288_v33 = vpop.f32.mrf.mxu0 }
  0xb2   : > { %v3235_v47 = vmul.f32 %v1288_v33, %v7428_v28 }
  0xb4   : > { %6623 = vmatmul.msk.bf16.gmra.mxu0 %vm990_vm0, %v7011_v32 }
  0xb8   : > { %v1777_v49 = vpop.f32.mrf.mxu1 }
  0xb9   : > { %v1290_v45 = vpop.f32.mrf.mxu0  ;;  %v3236_v62 = vmul.f32 %v1777_v49, %v7462_v26  ;;  %v277_v49 = vand.u32 2147483647, %v261_v31 }
  0xba   : > { %v3239_v48 = vmul.f32 %v1290_v45, %v7430_v38 }
  0xbb   : > { %6719 = vmatmul.msk.bf16.gmra.mxu1 %vm990_vm0, %v7011_v32  ;;  %v293_v23 = vsub.f32 1.0, %v277_v49 }
  0xbc   : > { %v4003_v51 = vadd.f32 %v3239_v48, %v3235_v47  ;;  %6815 = vmatmul.msk.bf16.gmra.mxu2 %vm990_vm0, %v7011_v32  ;;  %6911 = vmatmul.msk.bf16.gmra.mxu3 %vm990_vm0, %v7011_v32  ;;  %v276_v47 = vand.u32 2147483647, %v260_v30  ;;  %v7505_v48 = vmax.f32 %v288_v11, 0.0 }
  0xbd   : > { %v7525_v14 = vmax.f32 %v293_v23, 0.0  ;;  %v7015_v23 = vld [vmem:[%s9573_s1 + $0x60] sm:$0xff] }
  0xbe   : > { %v292_v52 = vsub.f32 1.0, %v276_v47 }
  0xbf   : > { %v2266_v55 = vpop.f32.mrf.mxu2  ;;  %v2755_v35 = vpop.f32.mrf.mxu3 }
  0xc0   : > { %v1779_v59 = vpop.f32.mrf.mxu1  ;;  %v3237_v16 = vmul.f32 %v2266_v55, %v7485_v6  ;;  %v3238_v36 = vmul.f32 %v2755_v35, %v7491_v9 }
  0xc1   : > { %v1293_v4 = vpop.f32.mrf.mxu0  ;;  %v3240_v63 = vmul.f32 %v1779_v59, %v7464_v54 }
  0xc2   : > { %v3243_v34 = vmul.f32 %v1293_v4, %v7446_v53  ;;  %v7523_v4 = vmax.f32 %v292_v52, 0.0 }
  0xc3   : > { %v4012_v2 = vadd.f32 %v3240_v63, %v3236_v62 }
  0xc4   : > { %v4004_v0 = vadd.f32 %v4003_v51, %v3243_v34  ;;  %6624 = vmatmul.msk.bf16.gmra.mxu0 %vm990_vm0, %v7012_v41  ;;  %v7013_v51 = vld [vmem:[%s9573_s1 + $0x50] sm:$0xff] }
  0xc7   : > { %v2268_v20 = vpop.f32.mrf.mxu2  ;;  %v2757_v32 = vpop.f32.mrf.mxu3 }
  0xc8   : > { %v3241_v27 = vmul.f32 %v2268_v20, %v7487_v7  ;;  %v1782_v33 = vpop.f32.mrf.mxu1  ;;  %v3242_v37 = vmul.f32 %v2757_v32, %v7493_v24 }
  0xc9   : > { %v1295_v10 = vpop.f32.mrf.mxu0  ;;  %v3244_v56 = vmul.f32 %v1782_v33, %v7489_v8 }
  0xca   : > { %v3247_v12 = vmul.f32 %v1295_v10, %v7477_v1  ;;  %v4021_v44 = vadd.f32 %v3241_v27, %v3237_v16  ;;  %v4030_v45 = vadd.f32 %v3242_v37, %v3238_v36 }
  0xcb   : > { %v4013_v46 = vadd.f32 %v4012_v2, %v3244_v56  ;;  %6720 = vmatmul.msk.bf16.gmra.mxu1 %vm990_vm0, %v7012_v41 }
  0xcc   : > { %v4005_v43 = vadd.f32 %v4004_v0, %v3247_v12  ;;  %6816 = vmatmul.msk.bf16.gmra.mxu2 %vm990_vm0, %v7012_v41  ;;  %6912 = vmatmul.msk.bf16.gmra.mxu3 %vm990_vm0, %v7012_v41  ;;  %v7014_v0 = vld [vmem:[%s9573_s1 + $0x58] sm:$0xff] }
  0xce   : > { %v4006_v5 = vrot.slane %v4005_v43, 4 }
  0xcf   : > { %v2271_v30 = vpop.f32.mrf.mxu2  ;;  %v2760_v29 = vpop.f32.mrf.mxu3 }
  0xd0   : > { %v3245_v60 = vmul.f32 %v2271_v30, %v7505_v48  ;;  %v1784_v19 = vpop.f32.mrf.mxu1  ;;  %v3246_v13 = vmul.f32 %v2760_v29, %v7511_v22  ;;  %v4007_v16 = vadd.f32 %v4006_v5, %v4005_v43 }
  0xd1   : > { %v1298_v17 = vpop.f32.mrf.mxu0  ;;  %v3248_v18 = vmul.f32 %v1784_v19, %v7513_v50 }
  0xd2   : > { %v4022_v31 = vadd.f32 %v4021_v44, %v3245_v60  ;;  %v4031_v15 = vadd.f32 %v4030_v45, %v3246_v13  ;;  %v3251_v57 = vmul.f32 %v1298_v17, %v7428_v28  ;;  %v4008_v36 = vrot.slane %v4007_v16, 2 }
  0xd3   : > { %v4014_v41 = vadd.f32 %v4013_v46, %v3248_v18 }
  0xd4   : > { %6625 = vmatmul.msk.bf16.gmra.mxu0 %vm990_vm0, %v7013_v51  ;;  %v4009_v29 = vadd.f32 %v4008_v36, %v4007_v16 }
  0xd5   : > { %v4015_v17 = vrot.slane %v4014_v41, 4 }
  0xd7   : > { %v2273_v34 = vpop.f32.mrf.mxu2  ;;  %v2762_v42 = vpop.f32.mrf.mxu3  ;;  %v4016_v13 = vadd.f32 %v4015_v17, %v4014_v41 }
  0xd8   : > { %v3249_v39 = vmul.f32 %v2273_v34, %v7523_v4  ;;  %v1787_v35 = vpop.f32.mrf.mxu1  ;;  %v3250_v59 = vmul.f32 %v2762_v42, %v7525_v14 }
  0xd9   : > { %v1300_v55 = vpop.f32.mrf.mxu0  ;;  %v3252_v20 = vmul.f32 %v1787_v35, %v7462_v26 }
  0xda   : > { %v3255_v58 = vmul.f32 %v1300_v55, %v7430_v38  ;;  %v7531_v62 = vadd.f32 %v4022_v31, %v3249_v39  ;;  %v7533_v63 = vadd.f32 %v4031_v15, %v3250_v59  ;;  %v4017_v59 = vrot.slane %v4016_v13, 2 }
  0xdb   : > { %6721 = vmatmul.msk.bf16.gmra.mxu1 %vm990_vm0, %v7013_v51 }
  0xdc   : > { %v4039_v61 = vadd.f32 %v3255_v58, %v3251_v57  ;;  %6817 = vmatmul.msk.bf16.gmra.mxu2 %vm990_vm0, %v7013_v51  ;;  %6913 = vmatmul.msk.bf16.gmra.mxu3 %vm990_vm0, %v7013_v51  ;;  %v4010_v58 = vrot.slane %v4009_v29, 1  ;;  %v4033_v41 = vrot.slane %v7533_v63, 4 }
  0xde   : > { %v4011_v5 = vadd.f32 %v4010_v58, %v4009_v29  ;;  %v7016_v29 = vld [vmem:[%s9573_s1 + $0x68] sm:$0xff] }
  0xdf   : > { %v2276_v2 = vpop.f32.mrf.mxu2  ;;  %v2765_v10 = vpop.f32.mrf.mxu3 }
  0xe0   : > { %v1789_v11 = vpop.f32.mrf.mxu1  ;;  %v3253_v37 = vmul.f32 %v2276_v2, %v7485_v6  ;;  %v3254_v46 = vmul.f32 %v2765_v10, %v7491_v9 }
  0xe1   : > { %v1303_v40 = vpop.f32.mrf.mxu0  ;;  %v3256_v12 = vmul.f32 %v1789_v11, %v7464_v54 }
  0xe2   : > { %v3259_v3 = vmul.f32 %v1303_v40, %v7446_v53 }
  0xe3   : > { %v4048_v21 = vadd.f32 %v3256_v12, %v3252_v20  ;;  %v4018_v20 = vadd.f32 %v4017_v59, %v4016_v13 }
  0xe4   : > { %v4040_v25 = vadd.f32 %v4039_v61, %v3259_v3  ;;  %6626 = vmatmul.msk.bf16.gmra.mxu0 %vm990_vm0, %v7014_v0  ;;  %v4024_v61 = vrot.slane %v7531_v62, 4 }
  0xe6   : > { %v4025_v12 = vadd.f32 %v4024_v61, %v7531_v62 }
  0xe7   : > { %v2278_v32 = vpop.f32.mrf.mxu2  ;;  %v2767_v44 = vpop.f32.mrf.mxu3 }
  0xe8   : > { %v3257_v56 = vmul.f32 %v2278_v32, %v7487_v7  ;;  %v1792_v45 = vpop.f32.mrf.mxu1  ;;  %v3258_v47 = vmul.f32 %v2767_v44, %v7493_v24 }
  0xe9   : > { %v1305_v27 = vpop.f32.mrf.mxu0  ;;  %v3260_v49 = vmul.f32 %v1792_v45, %v7489_v8 }
  0xea   : > { %v3263_v33 = vmul.f32 %v1305_v27, %v7477_v1  ;;  %v4057_v43 = vadd.f32 %v3257_v56, %v3253_v37  ;;  %v4066_v30 = vadd.f32 %v3258_v47, %v3254_v46  ;;  %v4019_v47 = vrot.slane %v4018_v20, 1 }
  0xeb   : > { %v4049_v52 = vadd.f32 %v4048_v21, %v3260_v49  ;;  %6722 = vmatmul.msk.bf16.gmra.mxu1 %vm990_vm0, %v7014_v0 }
  0xec   : > { %v4041_v51 = vadd.f32 %v4040_v25, %v3263_v33  ;;  %6818 = vmatmul.msk.bf16.gmra.mxu2 %vm990_vm0, %v7014_v0  ;;  %6914 = vmatmul.msk.bf16.gmra.mxu3 %vm990_vm0, %v7014_v0  ;;  %v4034_v25 = vadd.f32 %v4033_v41, %v7533_v63  ;;  %v4026_v63 = vrot.slane %v4025_v12, 2 }
  0xee   : > { %v4042_v60 = vrot.slane %v4041_v51, 4  ;;  %v4027_v13 = vadd.f32 %v4026_v63, %v4025_v12 }
  0xef   : > { %v2281_v31 = vpop.f32.mrf.mxu2  ;;  %v2770_v34 = vpop.f32.mrf.mxu3 }
  0xf0   : > { %v4043_v19 = vadd.f32 %v4042_v60, %v4041_v51  ;;  %v3261_v55 = vmul.f32 %v2281_v31, %v7505_v48  ;;  %v1794_v57 = vpop.f32.mrf.mxu1  ;;  %v3262_v39 = vmul.f32 %v2770_v34, %v7511_v22  ;;  %v4035_v51 = vrot.slane %v4034_v25, 2 }
  0xf1   : > { %v1308_v18 = vpop.f32.mrf.mxu0  ;;  %v3264_v35 = vmul.f32 %v1794_v57, %v7513_v50 }
  0xf2   : > { %v4044_v15 = vrot.slane %v4043_v19, 2  ;;  %v4058_v0 = vadd.f32 %v4057_v43, %v3261_v55  ;;  %v4067_v40 = vadd.f32 %v4066_v30, %v3262_v39  ;;  %v3267_v33 = vmul.f32 %v1308_v18, %v7428_v28 }
  0xf3   : > { %v4050_v3 = vadd.f32 %v4049_v52, %v3264_v35 }
  0xf4   : > { %v4045_v42 = vadd.f32 %v4044_v15, %v4043_v19  ;;  %6627 = vmatmul.msk.bf16.gmra.mxu0 %vm990_vm0, %v7015_v23  ;;  %v4020_v19 = vadd.f32 %v4019_v47, %v4018_v20  ;;  %v4036_v15 = vadd.f32 %v4035_v51, %v4034_v25 }
  0xf5   : > { %v4051_v11 = vrot.slane %v4050_v3, 4 }
  0xf6   : > { %v4046_v2 = vrot.slane %v4045_v42, 1 }
  0xf7   : > { %v4052_v27 = vadd.f32 %v4051_v11, %v4050_v3  ;;  %v2283_v32 = vpop.f32.mrf.mxu2  ;;  %v2772_v56 = vpop.f32.mrf.mxu3  ;;  %v4037_v3 = vrot.slane %v4036_v15, 1 }
  0xf8   : > { %v4047_v10 = vadd.f32 %v4046_v2, %v4045_v42  ;;  %v3265_v37 = vmul.f32 %v2283_v32, %v7523_v4  ;;  %v1797_v44 = vpop.f32.mrf.mxu1  ;;  %v3266_v46 = vmul.f32 %v2772_v56, %v7525_v14 }
  0xf9   : > { %v1310_v21 = vpop.f32.mrf.mxu0  ;;  %v4053_v45 = vrot.slane %v4052_v27, 2  ;;  %v3268_v61 = vmul.f32 %v1797_v44, %v7462_v26 }
  0xfa   : > { %v7566_v16 = vsel %vm5923_vm1, %v4047_v10, %v4011_v5  ;;  %v3271_v36 = vmul.f32 %v1310_v21, %v7430_v38  ;;  %v4059_v49 = vadd.f32 %v4058_v0, %v3265_v37  ;;  %v4068_v43 = vadd.f32 %v4067_v40, %v3266_v46 }
  0xfb   : > { %v4054_v17 = vadd.f32 %v4053_v45, %v4052_v27  ;;  %6723 = vmatmul.msk.bf16.gmra.mxu1 %vm990_vm0, %v7015_v23  ;;  %v4028_v0 = vrot.slane %v4027_v13, 1  ;;  %v4038_v27 = vadd.f32 %v4037_v3, %v4036_v15 }
  0xfc   : > { %v4075_v62 = vadd.f32 %v3271_v36, %v3267_v33  ;;  %v4060_v30 = vrot.slane %v4059_v49, 4  ;;  %6819 = vmatmul.msk.bf16.gmra.mxu2 %vm990_vm0, %v7015_v23  ;;  %v4069_v60 = vrot.slane %v4068_v43, 4  ;;  %6915 = vmatmul.msk.bf16.gmra.mxu3 %vm990_vm0, %v7015_v23 }
  0xfd   : > { %v4055_v52 = vrot.slane %v4054_v17, 1  ;;  %v4029_v12 = vadd.f32 %v4028_v0, %v4027_v13 }
  0xfe   : > { %v4061_v18 = vadd.f32 %v4060_v30, %v4059_v49  ;;  %v4070_v34 = vadd.f32 %v4069_v60, %v4068_v43 }
  0xff   : > { %v4056_v55 = vadd.f32 %v4055_v52, %v4054_v17  ;;  %v2286_v57 = vpop.f32.mrf.mxu2  ;;  %v2775_v42 = vpop.f32.mrf.mxu3 }
 0x100   : > { %v4062_v39 = vrot.slane %v4061_v18, 2  ;;  %v1799_v35 = vpop.f32.mrf.mxu1  ;;  %v4071_v23 = vrot.slane %v4070_v34, 2  ;;  %v3269_v56 = vmul.f32 %v2286_v57, %v7485_v6  ;;  %v3270_v44 = vmul.f32 %v2775_v42, %v7491_v9 }
 0x101   : > { %v1313_v31 = vpop.f32.mrf.mxu0  ;;  %v7580_v59 = vsel %vm5923_vm1, %v4056_v55, %v4020_v19  ;;  %v3272_v41 = vmul.f32 %v1799_v35, %v7464_v54  ;;  %v7017_v19 = vld [vmem:[%s9573_s1 + $0x70] sm:$0xff] }
 0x102   : > { %v3275_v58 = vmul.f32 %v1313_v31, %v7446_v53  ;;  %v4063_v40 = vadd.f32 %v4062_v39, %v4061_v18  ;;  %v4072_v5 = vadd.f32 %v4071_v23, %v4070_v34 }
 0x103   : > { %v4084_v10 = vadd.f32 %v3272_v41, %v3268_v61 }
 0x104   : > { %6628 = vmatmul.msk.bf16.gmra.mxu0 %vm990_vm0, %v7016_v29  ;;  %v4076_v2 = vadd.f32 %v4075_v62, %v3275_v58  ;;  %v4064_v11 = vrot.slane %v4063_v40, 1  ;;  %v4073_v20 = vrot.slane %v4072_v5, 1 }
 0x106   : > { %v4065_v25 = vadd.f32 %v4064_v11, %v4063_v40  ;;  %v4074_v32 = vadd.f32 %v4073_v20, %v4072_v5 }
 0x107   : > { %v2288_v33 = vpop.f32.mrf.mxu2  ;;  %v2777_v46 = vpop.f32.mrf.mxu3 }
 0x108   : > { %v7587_v37 = vsel %vm5923_vm1, %v4065_v25, %v4029_v12  ;;  %v3273_v45 = vmul.f32 %v2288_v33, %v7487_v7  ;;  %v1802_v62 = vpop.f32.mrf.mxu1  ;;  %v7593_v47 = vsel %vm5923_vm1, %v4074_v32, %v4038_v27  ;;  %v3274_v63 = vmul.f32 %v2777_v46, %v7493_v24 }
 0x109   : > { %v1315_v21 = vpop.f32.mrf.mxu0  ;;  %v3276_v49 = vmul.f32 %v1802_v62, %v7489_v8 }
 0x10a   : > { %v3279_v36 = vmul.f32 %v1315_v21, %v7477_v1  ;;  %v4093_v17 = vadd.f32 %v3273_v45, %v3269_v56  ;;  %v4102_v43 = vadd.f32 %v3274_v63, %v3270_v44  ;;  %v7018_v45 = vld [vmem:[%s9573_s1 + $0x78] sm:$0xff] }
 0x10b   : > { %v4085_v30 = vadd.f32 %v4084_v10, %v3276_v49  ;;  %6724 = vmatmul.msk.bf16.gmra.mxu1 %vm990_vm0, %v7016_v29 }
 0x10c   : > { %v4077_v51 = vadd.f32 %v4076_v2, %v3279_v36  ;;  %6820 = vmatmul.msk.bf16.gmra.mxu2 %vm990_vm0, %v7016_v29  ;;  %6916 = vmatmul.msk.bf16.gmra.mxu3 %vm990_vm0, %v7016_v29 }
 0x10e   : > { %v4078_v52 = vrot.slane %v4077_v51, 4 }
 0x10f   : > { %v2291_v18 = vpop.f32.mrf.mxu2  ;;  %v2780_v55 = vpop.f32.mrf.mxu3 }
 0x110   : > { %v4079_v60 = vadd.f32 %v4078_v52, %v4077_v51  ;;  %v3277_v15 = vmul.f32 %v2291_v18, %v7505_v48  ;;  %v1804_v34 = vpop.f32.mrf.mxu1  ;;  %v3278_v57 = vmul.f32 %v2780_v55, %v7511_v22 }
 0x111   : > { %v1318_v13 = vpop.f32.mrf.mxu0  ;;  %v3280_v39 = vmul.f32 %v1804_v34, %v7513_v50 }
 0x112   : > { %v4080_v31 = vrot.slane %v4079_v60, 2  ;;  %v4094_v29 = vadd.f32 %v4093_v17, %v3277_v15  ;;  %v4103_v42 = vadd.f32 %v4102_v43, %v3278_v57  ;;  %v3283_v5 = vmul.f32 %v1318_v13, %v7428_v28 }
 0x113   : > { %v4086_v23 = vadd.f32 %v4085_v30, %v3280_v39 }
 0x114   : > { %v4081_v58 = vadd.f32 %v4080_v31, %v4079_v60  ;;  %6629 = vmatmul.msk.bf16.gmra.mxu0 %vm990_vm0, %v7017_v19 }
 0x115   : > { %v4087_v41 = vrot.slane %v4086_v23, 4 }
 0x116   : > { %v4082_v35 = vrot.slane %v4081_v58, 1 }
 0x117   : > { %v4088_v2 = vadd.f32 %v4087_v41, %v4086_v23  ;;  %v2293_v3 = vpop.f32.mrf.mxu2  ;;  %v2782_v20 = vpop.f32.mrf.mxu3 }
 0x118   : > { %v4083_v61 = vadd.f32 %v4082_v35, %v4081_v58  ;;  %v3281_v11 = vmul.f32 %v2293_v3, %v7523_v4  ;;  %v1807_v12 = vpop.f32.mrf.mxu1  ;;  %v3282_v21 = vmul.f32 %v2782_v20, %v7525_v14 }
 0x119   : > { %v1320_v0 = vpop.f32.mrf.mxu0  ;;  %v4089_v25 = vrot.slane %v4088_v2, 2 }
 0x11a   : > { %v7609_v40 = vsel %vm5925_vm2, %v4083_v61, %v7566_v16  ;;  %v3287_v10 = vmul.f32 %v1320_v0, %v7430_v38  ;;  %v4095_v32 = vadd.f32 %v4094_v29, %v3281_v11  ;;  %v4104_v36 = vadd.f32 %v4103_v42, %v3282_v21 }
 0x11b   : > { %v4090_v33 = vadd.f32 %v4089_v25, %v4088_v2  ;;  %6725 = vmatmul.msk.bf16.gmra.mxu1 %vm990_vm0, %v7017_v19 }
 0x11c   : > { %v4111_v27 = vadd.f32 %v3287_v10, %v3283_v5  ;;  %v4096_v16 = vrot.slane %v4095_v32, 4  ;;  %6821 = vmatmul.msk.bf16.gmra.mxu2 %vm990_vm0, %v7017_v19  ;;  %v4105_v44 = vrot.slane %v4104_v36, 4  ;;  %6917 = vmatmul.msk.bf16.gmra.mxu3 %vm990_vm0, %v7017_v19  ;;  %v3284_v19 = vmul.f32 %v1807_v12, %v7462_v26 }
 0x11d   : > { %v4091_v56 = vrot.slane %v4090_v33, 1 }
 0x11e   : > { %v4097_v46 = vadd.f32 %v4096_v16, %v4095_v32  ;;  %v4106_v49 = vadd.f32 %v4105_v44, %v4104_v36 }
 0x11f   : > { %v4092_v63 = vadd.f32 %v4091_v56, %v4090_v33  ;;  %v2296_v51 = vpop.f32.mrf.mxu2  ;;  %v2785_v30 = vpop.f32.mrf.mxu3 }
 0x120   : > { %v4098_v43 = vrot.slane %v4097_v46, 2  ;;  %v1809_v52 = vpop.f32.mrf.mxu1  ;;  %v4107_v13 = vrot.slane %v4106_v49, 2  ;;  %v3285_v61 = vmul.f32 %v2296_v51, %v7485_v6  ;;  %v3286_v41 = vmul.f32 %v2785_v30, %v7491_v9 }
 0x121   : > { %v1323_v62 = vpop.f32.mrf.mxu0  ;;  %v7624_v60 = vsel %vm5925_vm2, %v4092_v63, %v7580_v59  ;;  %v3288_v18 = vmul.f32 %v1809_v52, %v7464_v54 }
 0x122   : > { %v3291_v17 = vmul.f32 %v1323_v62, %v7446_v53  ;;  %v4099_v31 = vadd.f32 %v4098_v43, %v4097_v46  ;;  %v4108_v55 = vadd.f32 %v4107_v13, %v4106_v49 }
 0x123   : > { %v4120_v34 = vadd.f32 %v3288_v18, %v3284_v19 }
 0x124   : > { %6630 = vmatmul.msk.bf16.gmra.mxu0 %vm990_vm0, %v7018_v45  ;;  %v4112_v15 = vadd.f32 %v4111_v27, %v3291_v17  ;;  %v4100_v57 = vrot.slane %v4099_v31, 1  ;;  %v4109_v58 = vrot.slane %v4108_v55, 1 }
 0x126   : > { %v4101_v39 = vadd.f32 %v4100_v57, %v4099_v31  ;;  %v4110_v42 = vadd.f32 %v4109_v58, %v4108_v55 }
 0x127   : > { %v2298_v35 = vpop.f32.mrf.mxu2  ;;  %v2787_v2 = vpop.f32.mrf.mxu3 }
 0x128   : > { %v7632_v23 = vsel %vm5925_vm2, %v4101_v39, %v7587_v37  ;;  %v3289_v0 = vmul.f32 %v2298_v35, %v7487_v7  ;;  %v1812_v3 = vpop.f32.mrf.mxu1  ;;  %v7639_v5 = vsel %vm5925_vm2, %v4110_v42, %v7593_v47  ;;  %v3290_v10 = vmul.f32 %v2787_v2, %v7493_v24  ;;  %v7019_v47 = vld [vmem:[%s9573_s1 + $0x80] sm:$0xff] }
 0x129   : > { %v1325_v29 = vpop.f32.mrf.mxu0  ;;  %v3292_v11 = vmul.f32 %v1812_v3, %v7489_v8 }
 0x12a   : > { %v3295_v59 = vmul.f32 %v1325_v29, %v7477_v1  ;;  %v4129_v12 = vadd.f32 %v3289_v0, %v3285_v61  ;;  %v4138_v37 = vadd.f32 %v3290_v10, %v3286_v41  ;;  %v7020_v0 = vld [vmem:[%s9573_s1 + $0x88] sm:$0xff] }
 0x12b   : > { %v4121_v25 = vadd.f32 %v4120_v34, %v3292_v11  ;;  %6726 = vmatmul.msk.bf16.gmra.mxu1 %vm990_vm0, %v7018_v45 }
 0x12c   : > { %v4113_v20 = vadd.f32 %v4112_v15, %v3295_v59  ;;  %6822 = vmatmul.msk.bf16.gmra.mxu2 %vm990_vm0, %v7018_v45  ;;  %6918 = vmatmul.msk.bf16.gmra.mxu3 %vm990_vm0, %v7018_v45 }
 0x12e   : > { %v4114_v21 = vrot.slane %v4113_v20, 4 }
 0x12f   : > { %v2301_v33 = vpop.f32.mrf.mxu2  ;;  %v2790_v56 = vpop.f32.mrf.mxu3 }
 0x130   : > { %v4115_v27 = vadd.f32 %v4114_v21, %v4113_v20  ;;  %v3293_v16 = vmul.f32 %v2301_v33, %v7505_v48  ;;  %v1814_v44 = vpop.f32.mrf.mxu1  ;;  %v3294_v46 = vmul.f32 %v2790_v56, %v7511_v22 }
 0x131   : > { %v1328_v32 = vpop.f32.mrf.mxu0  ;;  %v3296_v63 = vmul.f32 %v1814_v44, %v7513_v50 }
 0x132   : > { %v4116_v36 = vrot.slane %v4115_v27, 2  ;;  %v4130_v45 = vadd.f32 %v4129_v12, %v3293_v16  ;;  %v4139_v49 = vadd.f32 %v4138_v37, %v3294_v46  ;;  %v3299_v31 = vmul.f32 %v1328_v32, %v7428_v28 }
 0x133   : > { %v4122_v17 = vadd.f32 %v4121_v25, %v3296_v63 }
 0x134   : > { %v4117_v62 = vadd.f32 %v4116_v36, %v4115_v27  ;;  %6631 = vmatmul.msk.bf16.gmra.mxu0 %vm990_vm0, %v7019_v47 }
 0x135   : > { %v4123_v30 = vrot.slane %v4122_v17, 4 }
 0x136   : > { %v4118_v51 = vrot.slane %v4117_v62, 1 }
 0x137   : > { %v4124_v19 = vadd.f32 %v4123_v30, %v4122_v17  ;;  %v2303_v18 = vpop.f32.mrf.mxu2  ;;  %v2792_v34 = vpop.f32.mrf.mxu3 }
 0x138   : > { %v4119_v43 = vadd.f32 %v4118_v51, %v4117_v62  ;;  %v3297_v55 = vmul.f32 %v2303_v18, %v7523_v4  ;;  %v1817_v57 = vpop.f32.mrf.mxu1  ;;  %v3298_v39 = vmul.f32 %v2792_v34, %v7525_v14 }
 0x139   : > { %v1330_v52 = vpop.f32.mrf.mxu0  ;;  %v4125_v58 = vrot.slane %v4124_v19, 2 }
 0x13a   : > { %v7655_v13 = vsel %vm5927_vm3, %v4119_v43, %v7609_v40  ;;  %v3303_v15 = vmul.f32 %v1330_v52, %v7430_v38  ;;  %v4131_v42 = vadd.f32 %v4130_v45, %v3297_v55  ;;  %v4140_v59 = vadd.f32 %v4139_v49, %v3298_v39 }
 0x13b   : > { %v4126_v35 = vadd.f32 %v4125_v58, %v4124_v19  ;;  %6727 = vmatmul.msk.bf16.gmra.mxu1 %vm990_vm0, %v7019_v47 }
 0x13c   : > { %v4147_v29 = vadd.f32 %v3303_v15, %v3299_v31  ;;  %v4132_v40 = vrot.slane %v4131_v42, 4  ;;  %6823 = vmatmul.msk.bf16.gmra.mxu2 %vm990_vm0, %v7019_v47  ;;  %v4141_v41 = vrot.slane %v4140_v59, 4  ;;  %6919 = vmatmul.msk.bf16.gmra.mxu3 %vm990_vm0, %v7019_v47  ;;  %v3300_v47 = vmul.f32 %v1817_v57, %v7462_v26 }
 0x13d   : > { %v4127_v61 = vrot.slane %v4126_v35, 1 }
 0x13e   : > { %v4133_v2 = vadd.f32 %v4132_v40, %v4131_v42  ;;  %v4142_v11 = vadd.f32 %v4141_v41, %v4140_v59 }
 0x13f   : > { %v4128_v10 = vadd.f32 %v4127_v61, %v4126_v35  ;;  %v2306_v20 = vpop.f32.mrf.mxu2  ;;  %v2795_v25 = vpop.f32.mrf.mxu3 }
 0x140   : > { %v4134_v37 = vrot.slane %v4133_v2, 2  ;;  %v1819_v21 = vpop.f32.mrf.mxu1  ;;  %v4143_v32 = vrot.slane %v4142_v11, 2  ;;  %v3301_v43 = vmul.f32 %v2306_v20, %v7485_v6  ;;  %v3302_v30 = vmul.f32 %v2795_v25, %v7491_v9 }
 0x141   : > { %v1333_v3 = vpop.f32.mrf.mxu0  ;;  %v7670_v27 = vsel %vm5927_vm3, %v4128_v10, %v7624_v60  ;;  %v3304_v33 = vmul.f32 %v1819_v21, %v7464_v54 }
 0x142   : > { %v3307_v12 = vmul.f32 %v1333_v3, %v7446_v53  ;;  %v4135_v36 = vadd.f32 %v4134_v37, %v4133_v2  ;;  %v4144_v56 = vadd.f32 %v4143_v32, %v4142_v11 }
 0x143   : > { %v4156_v44 = vadd.f32 %v3304_v33, %v3300_v47 }
 0x144   : > { %6632 = vmatmul.msk.bf16.gmra.mxu0 %vm990_vm0, %v7020_v0  ;;  %v4148_v16 = vadd.f32 %v4147_v29, %v3307_v12  ;;  %v4136_v46 = vrot.slane %v4135_v36, 1  ;;  %v4145_v62 = vrot.slane %v4144_v56, 1 }
 0x146   : > { %v4137_v63 = vadd.f32 %v4136_v46, %v4135_v36  ;;  %v4146_v49 = vadd.f32 %v4145_v62, %v4144_v56 }
 0x147   : > { %v2308_v51 = vpop.f32.mrf.mxu2  ;;  %v2797_v19 = vpop.f32.mrf.mxu3 }
 0x148   : > { %v7678_v17 = vsel %vm5927_vm3, %v4137_v63, %v7632_v23  ;;  %v3305_v52 = vmul.f32 %v2308_v51, %v7487_v7  ;;  %v1822_v18 = vpop.f32.mrf.mxu1  ;;  %v7685_v31 = vsel %vm5927_vm3, %v4146_v49, %v7639_v5  ;;  %v3306_v15 = vmul.f32 %v2797_v19, %v7493_v24  ;;  %v7021_v5 = vld [vmem:[%s9573_s1 + $0x90] sm:$0xff] }
 0x149   : > { %v1335_v45 = vpop.f32.mrf.mxu0  ;;  %v3308_v55 = vmul.f32 %v1822_v18, %v7489_v8 }
 0x14a   : > { %v3311_v60 = vmul.f32 %v1335_v45, %v7477_v1  ;;  %v4165_v57 = vadd.f32 %v3305_v52, %v3301_v43  ;;  %v4174_v23 = vadd.f32 %v3306_v15, %v3302_v30  ;;  %v7022_v52 = vld [vmem:[%s9573_s1 + $0x98] sm:$0xff] }
 0x14b   : > { %v4157_v58 = vadd.f32 %v4156_v44, %v3308_v55  ;;  %6728 = vmatmul.msk.bf16.gmra.mxu1 %vm990_vm0, %v7020_v0 }
 0x14c   : > { %v4149_v34 = vadd.f32 %v4148_v16, %v3311_v60  ;;  %6824 = vmatmul.msk.bf16.gmra.mxu2 %vm990_vm0, %v7020_v0  ;;  %6920 = vmatmul.msk.bf16.gmra.mxu3 %vm990_vm0, %v7020_v0 }
 0x14e   : > { %v4150_v39 = vrot.slane %v4149_v34, 4 }
 0x14f   : > { %v2311_v35 = vpop.f32.mrf.mxu2  ;;  %v2800_v61 = vpop.f32.mrf.mxu3 }
 0x150   : > { %v4151_v29 = vadd.f32 %v4150_v39, %v4149_v34  ;;  %v3309_v40 = vmul.f32 %v2311_v35, %v7505_v48  ;;  %v1824_v41 = vpop.f32.mrf.mxu1  ;;  %v3310_v2 = vmul.f32 %v2800_v61, %v7511_v22 }
 0x151   : > { %v1338_v42 = vpop.f32.mrf.mxu0  ;;  %v3312_v10 = vmul.f32 %v1824_v41, %v7513_v50 }
 0x152   : > { %v4152_v59 = vrot.slane %v4151_v29, 2  ;;  %v4166_v0 = vadd.f32 %v4165_v57, %v3309_v40  ;;  %v4175_v11 = vadd.f32 %v4174_v23, %v3310_v2  ;;  %v3315_v36 = vmul.f32 %v1338_v42, %v7428_v28 }
 0x153   : > { %v4158_v12 = vadd.f32 %v4157_v58, %v3312_v10 }
 0x154   : > { %v4153_v3 = vadd.f32 %v4152_v59, %v4151_v29  ;;  %6633 = vmatmul.msk.bf16.gmra.mxu0 %vm990_vm0, %v7021_v5 }
 0x155   : > { %v4159_v25 = vrot.slane %v4158_v12, 4 }
 0x156   : > { %v4154_v20 = vrot.slane %v4153_v3, 1 }
 0x157   : > { %v4160_v47 = vadd.f32 %v4159_v25, %v4158_v12  ;;  %v2313_v33 = vpop.f32.mrf.mxu2  ;;  %v2802_v44 = vpop.f32.mrf.mxu3 }
 0x158   : > { %v4155_v37 = vadd.f32 %v4154_v20, %v4153_v3  ;;  %v3313_v56 = vmul.f32 %v2313_v33, %v7523_v4  ;;  %v1827_v46 = vpop.f32.mrf.mxu1  ;;  %v3314_v63 = vmul.f32 %v2802_v44, %v7525_v14 }
 0x159   : > { %v1340_v21 = vpop.f32.mrf.mxu0  ;;  %v4161_v62 = vrot.slane %v4160_v47, 2 }
 0x15a   : > { %v7701_v32 = vsel %vm5929_vm4, %v4155_v37, %v7655_v13  ;;  %v3319_v16 = vmul.f32 %v1340_v21, %v7430_v38  ;;  %v4167_v49 = vadd.f32 %v4166_v0, %v3313_v56  ;;  %v4176_v60 = vadd.f32 %v4175_v11, %v3314_v63 }
 0x15b   : > { %v4162_v51 = vadd.f32 %v4161_v62, %v4160_v47  ;;  %6729 = vmatmul.msk.bf16.gmra.mxu1 %vm990_vm0, %v7021_v5 }
 0x15c   : > { %v4183_v45 = vadd.f32 %v3319_v16, %v3315_v36  ;;  %v4168_v13 = vrot.slane %v4167_v49, 4  ;;  %6825 = vmatmul.msk.bf16.gmra.mxu2 %vm990_vm0, %v7021_v5  ;;  %v4177_v30 = vrot.slane %v4176_v60, 4  ;;  %6921 = vmatmul.msk.bf16.gmra.mxu3 %vm990_vm0, %v7021_v5  ;;  %v3316_v5 = vmul.f32 %v1827_v46, %v7462_v26 }
 0x15d   : > { %v4163_v43 = vrot.slane %v4162_v51, 1 }
 0x15e   : > { %v4169_v19 = vadd.f32 %v4168_v13, %v4167_v49  ;;  %v4178_v55 = vadd.f32 %v4177_v30, %v4176_v60 }
 0x15f   : > { %v4164_v15 = vadd.f32 %v4163_v43, %v4162_v51  ;;  %v2316_v34 = vpop.f32.mrf.mxu2  ;;  %v2805_v58 = vpop.f32.mrf.mxu3 }
 0x160   : > { %v4170_v23 = vrot.slane %v4169_v19, 2  ;;  %v1829_v39 = vpop.f32.mrf.mxu1  ;;  %v4179_v42 = vrot.slane %v4178_v55, 2  ;;  %v3317_v37 = vmul.f32 %v2316_v34, %v7485_v6  ;;  %v3318_v25 = vmul.f32 %v2805_v58, %v7491_v9 }
 0x161   : > { %v1343_v18 = vpop.f32.mrf.mxu0  ;;  %v7716_v29 = vsel %vm5929_vm4, %v4164_v15, %v7670_v27  ;;  %v3320_v35 = vmul.f32 %v1829_v39, %v7464_v54 }
 0x162   : > { %v3323_v57 = vmul.f32 %v1343_v18, %v7446_v53  ;;  %v4171_v59 = vadd.f32 %v4170_v23, %v4169_v19  ;;  %v4180_v61 = vadd.f32 %v4179_v42, %v4178_v55 }
 0x163   : > { %v4192_v41 = vadd.f32 %v3320_v35, %v3316_v5 }
 0x164   : > { %6634 = vmatmul.msk.bf16.gmra.mxu0 %vm990_vm0, %v7022_v52  ;;  %v4184_v40 = vadd.f32 %v4183_v45, %v3323_v57  ;;  %v4172_v2 = vrot.slane %v4171_v59, 1  ;;  %v4181_v3 = vrot.slane %v4180_v61, 1 }
 0x166   : > { %v4173_v10 = vadd.f32 %v4172_v2, %v4171_v59  ;;  %v4182_v11 = vadd.f32 %v4181_v3, %v4180_v61 }
 0x167   : > { %v2318_v20 = vpop.f32.mrf.mxu2  ;;  %v2807_v47 = vpop.f32.mrf.mxu3 }
 0x168   : > { %v7724_v12 = vsel %vm5929_vm4, %v4173_v10, %v7678_v17  ;;  %v3321_v21 = vmul.f32 %v2318_v20, %v7487_v7  ;;  %v1832_v33 = vpop.f32.mrf.mxu1  ;;  %v7731_v36 = vsel %vm5929_vm4, %v4182_v11, %v7685_v31  ;;  %v3322_v16 = vmul.f32 %v2807_v47, %v7493_v24  ;;  %v7023_v31 = vld [vmem:[%s9573_s1 + $0xa0] sm:$0xff] }
 0x169   : > { %v1345_v0 = vpop.f32.mrf.mxu0  ;;  %v3324_v56 = vmul.f32 %v1832_v33, %v7489_v8 }
 0x16a   : > { %v3327_v27 = vmul.f32 %v1345_v0, %v7477_v1  ;;  %v4201_v46 = vadd.f32 %v3321_v21, %v3317_v37  ;;  %v4210_v17 = vadd.f32 %v3322_v16, %v3318_v25 }
 0x16b   : > { %v4193_v62 = vadd.f32 %v4192_v41, %v3324_v56  ;;  %6730 = vmatmul.msk.bf16.gmra.mxu1 %vm990_vm0, %v7022_v52 }
 0x16c   : > { %v4185_v44 = vadd.f32 %v4184_v40, %v3327_v27  ;;  %6826 = vmatmul.msk.bf16.gmra.mxu2 %vm990_vm0, %v7022_v52  ;;  %6922 = vmatmul.msk.bf16.gmra.mxu3 %vm990_vm0, %v7022_v52  ;;  %v7024_v27 = vld [vmem:[%s9573_s1 + $0xa8] sm:$0xff] }
 0x16e   : > { %v4186_v63 = vrot.slane %v4185_v44, 4 }
 0x16f   : > { %v2321_v51 = vpop.f32.mrf.mxu2  ;;  %v2810_v43 = vpop.f32.mrf.mxu3 }
 0x170   : > { %v4187_v45 = vadd.f32 %v4186_v63, %v4185_v44  ;;  %v3325_v13 = vmul.f32 %v2321_v51, %v7505_v48  ;;  %v1834_v30 = vpop.f32.mrf.mxu1  ;;  %v3326_v19 = vmul.f32 %v2810_v43, %v7511_v22 }
 0x171   : > { %v7741_v49 = vpop.f32.mrf.mxu0  ;;  %v3328_v15 = vmul.f32 %v1834_v30, %v7513_v50 }
 0x172   : > { %v4188_v60 = vrot.slane %v4187_v45, 2  ;;  %v4202_v52 = vadd.f32 %v4201_v46, %v3325_v13  ;;  %v4211_v55 = vadd.f32 %v4210_v17, %v3326_v19 }
 0x173   : > { %v4194_v57 = vadd.f32 %v4193_v62, %v3328_v15  ;;  %v7025_v15 = vld [vmem:[%s9573_s1 + $0xb0] sm:$0xff] }
 0x174   : > { %v4189_v18 = vadd.f32 %v4188_v60, %v4187_v45  ;;  %6635 = vmatmul.msk.bf16.gmra.mxu0 %vm990_vm0, %v7023_v31 }
 0x175   : > { %v4195_v58 = vrot.slane %v4194_v57, 4 }
 0x176   : > { %v4190_v34 = vrot.slane %v4189_v18, 1 }
 0x177   : > { %v4196_v5 = vadd.f32 %v4195_v58, %v4194_v57  ;;  %v2323_v35 = vpop.f32.mrf.mxu2  ;;  %v2812_v40 = vpop.f32.mrf.mxu3 }
 0x178   : > { %v4191_v23 = vadd.f32 %v4190_v34, %v4189_v18  ;;  %v3329_v59 = vmul.f32 %v2323_v35, %v7523_v4  ;;  %v1837_v61 = vpop.f32.mrf.mxu1  ;;  %v3330_v2 = vmul.f32 %v2812_v40, %v7525_v14 }
 0x179   : > { %v1350_v39 = vpop.f32.mrf.mxu0  ;;  %v4197_v41 = vrot.slane %v4196_v5, 2 }
 0x17a   : > { %v7749_v42 = vsel %vm5931_vm5, %v4191_v23, %v7701_v32  ;;  %v4203_v3 = vadd.f32 %v4202_v52, %v3329_v59  ;;  %v4212_v0 = vadd.f32 %v4211_v55, %v3330_v2  ;;  %v3335_v57 = vmul.f32 %v1350_v39, %v7430_v38 }
 0x17b   : > { %v4198_v10 = vadd.f32 %v4197_v41, %v4196_v5  ;;  %6731 = vmatmul.msk.bf16.gmra.mxu1 %vm990_vm0, %v7023_v31 }
 0x17c   : > { %v4204_v11 = vrot.slane %v4203_v3, 4  ;;  %6827 = vmatmul.msk.bf16.gmra.mxu2 %vm990_vm0, %v7023_v31  ;;  %v4213_v32 = vrot.slane %v4212_v0, 4  ;;  %6923 = vmatmul.msk.bf16.gmra.mxu3 %vm990_vm0, %v7023_v31 }
 0x17d   : > { %v4199_v20 = vrot.slane %v4198_v10, 1 }
 0x17e   : > { %v4205_v37 = vadd.f32 %v4204_v11, %v4203_v3  ;;  %v4214_v47 = vadd.f32 %v4213_v32, %v4212_v0  ;;  %v3332_v0 = vmul.f32 %v1837_v61, %v7462_v26 }
 0x17f   : > { %v4200_v21 = vadd.f32 %v4199_v20, %v4198_v10  ;;  %v2326_v33 = vpop.f32.mrf.mxu2  ;;  %v2815_v56 = vpop.f32.mrf.mxu3 }
 0x180   : > { %v4206_v16 = vrot.slane %v4205_v37, 2  ;;  %v1839_v44 = vpop.f32.mrf.mxu1  ;;  %v4215_v17 = vrot.slane %v4214_v47, 2 }
 0x181   : > { %v1353_v25 = vpop.f32.mrf.mxu0  ;;  %v7761_v46 = vsel %vm5931_vm5, %v4200_v21, %v7716_v29  ;;  %v3336_v39 = vmul.f32 %v1839_v44, %v7464_v54 }
 0x182   : > { %v4207_v62 = vadd.f32 %v4206_v16, %v4205_v37  ;;  %v4216_v63 = vadd.f32 %v4215_v17, %v4214_v47  ;;  %v3339_v23 = vmul.f32 %v1353_v25, %v7446_v53 }
 0x184   : > { %6636 = vmatmul.msk.bf16.gmra.mxu0 %vm990_vm0, %v7024_v27  ;;  %v4208_v45 = vrot.slane %v4207_v62, 1  ;;  %v4217_v31 = vrot.slane %v4216_v63, 1 }
 0x186   : > { %v4209_v51 = vadd.f32 %v4208_v45, %v4207_v62  ;;  %v4218_v13 = vadd.f32 %v4217_v31, %v4216_v63  ;;  %v3333_v62 = vmul.f32 %v2326_v33, %v7485_v6  ;;  %v3334_v31 = vmul.f32 %v2815_v56, %v7491_v9 }
 0x187   : > { %v2328_v43 = vpop.f32.mrf.mxu2  ;;  %v2817_v19 = vpop.f32.mrf.mxu3 }
 0x188   : > { %v7766_v30 = vsel %vm5931_vm5, %v4209_v51, %v7724_v12  ;;  %v1842_v18 = vpop.f32.mrf.mxu1  ;;  %v7770_v29 = vsel %vm5931_vm5, %v4218_v13, %v7731_v36  ;;  %v3331_v36 = vmul.f32 %v7741_v49, %v7428_v28  ;;  %v7026_v49 = vld [vmem:[%s9573_s1 + $0xb8] sm:$0xff]  ;;  %v3337_v44 = vmul.f32 %v2328_v43, %v7487_v7 }
 0x189   : > { %v1355_v60 = vpop.f32.mrf.mxu0  ;;  %v3340_v11 = vmul.f32 %v1842_v18, %v7489_v8  ;;  %v3338_v61 = vmul.f32 %v2817_v19, %v7493_v24 }
 0x18a   : > { %v4219_v58 = vadd.f32 %v3335_v57, %v3331_v36  ;;  %v3343_v5 = vmul.f32 %v1355_v60, %v7477_v1 }
 0x18b   : > { %6732 = vmatmul.msk.bf16.gmra.mxu1 %vm990_vm0, %v7024_v27  ;;  %v4246_v43 = vadd.f32 %v3338_v61, %v3334_v31 }
 0x18c   : > { %6828 = vmatmul.msk.bf16.gmra.mxu2 %vm990_vm0, %v7024_v27  ;;  %6924 = vmatmul.msk.bf16.gmra.mxu3 %vm990_vm0, %v7024_v27  ;;  %v4220_v59 = vadd.f32 %v4219_v58, %v3339_v23  ;;  %v4228_v27 = vadd.f32 %v3336_v39, %v3332_v0 }
 0x18e   : > { %v4221_v3 = vadd.f32 %v4220_v59, %v3343_v5  ;;  %v4229_v17 = vadd.f32 %v4228_v27, %v3340_v11 }
 0x18f   : > { %v2331_v55 = vpop.f32.mrf.mxu2  ;;  %v2820_v12 = vpop.f32.mrf.mxu3 }
 0x190   : > { %v1844_v34 = vpop.f32.mrf.mxu1  ;;  %v4222_v10 = vrot.slane %v4221_v3, 4  ;;  %v3341_v51 = vmul.f32 %v2331_v55, %v7505_v48  ;;  %v3342_v60 = vmul.f32 %v2820_v12, %v7511_v22 }
 0x191   : > { %v1358_v52 = vpop.f32.mrf.mxu0  ;;  %v3344_v37 = vmul.f32 %v1844_v34, %v7513_v50  ;;  %v4237_v34 = vadd.f32 %v3337_v44, %v3333_v62 }
 0x192   : > { %v4223_v47 = vadd.f32 %v4222_v10, %v4221_v3  ;;  %v3347_v63 = vmul.f32 %v1358_v52, %v7428_v28  ;;  %v4247_v56 = vadd.f32 %v4246_v43, %v3342_v60 }
 0x193   : > { %v4230_v13 = vadd.f32 %v4229_v17, %v3344_v37  ;;  %v4238_v58 = vadd.f32 %v4237_v34, %v3341_v51  ;;  %v7820_v37 = vld [vmem:[%s9573_s1 + $0xc0] sm:$0xff] }
 0x194   : > { %6637 = vmatmul.msk.bf16.gmra.mxu0 %vm990_vm0, %v7025_v15  ;;  %v4224_v18 = vrot.slane %v4223_v47, 2 }
 0x195   : > { %v4231_v5 = vrot.slane %v4230_v13, 4 }
 0x196   : > { %v4225_v12 = vadd.f32 %v4224_v18, %v4223_v47 }
 0x197   : > { %v2333_v40 = vpop.f32.mrf.mxu2  ;;  %v2822_v41 = vpop.f32.mrf.mxu3 }
 0x198   : > { %v1847_v2 = vpop.f32.mrf.mxu1  ;;  %v3345_v19 = vmul.f32 %v2333_v40, %v7523_v4  ;;  %v3346_v57 = vmul.f32 %v2822_v41, %v7525_v14  ;;  %v4232_v41 = vadd.f32 %v4231_v5, %v4230_v13  ;;  %v4226_v0 = vrot.slane %v4225_v12, 1 }
 0x199   : > { %v1360_v35 = vpop.f32.mrf.mxu0  ;;  %v3348_v11 = vmul.f32 %v1847_v2, %v7462_v26 }
 0x19a   : > { %v3351_v16 = vmul.f32 %v1360_v35, %v7430_v38  ;;  %v4239_v3 = vadd.f32 %v4238_v58, %v3345_v19  ;;  %v4248_v39 = vadd.f32 %v4247_v56, %v3346_v57  ;;  %v4233_v2 = vrot.slane %v4232_v41, 2 }
 0x19b   : > { %6733 = vmatmul.msk.bf16.gmra.mxu1 %vm990_vm0, %v7025_v15 }
 0x19c   : > { %6829 = vmatmul.msk.bf16.gmra.mxu2 %vm990_vm0, %v7025_v15  ;;  %6925 = vmatmul.msk.bf16.gmra.mxu3 %vm990_vm0, %v7025_v15  ;;  %v4255_v15 = vadd.f32 %v3351_v16, %v3347_v63  ;;  %v4249_v47 = vrot.slane %v4248_v39, 4  ;;  %v4234_v19 = vadd.f32 %v4233_v2, %v4232_v41 }
 0x19e   : > { %v4250_v13 = vadd.f32 %v4249_v47, %v4248_v39 }
 0x19f   : > { %v7793_v32 = vpop.f32.mrf.mxu2  ;;  %v7796_v25 = vpop.f32.mrf.mxu3 }
 0x1a0   : > { %v1849_v21 = vpop.f32.mrf.mxu1  ;;  %v3349_v57 = vmul.f32 %v7793_v32, %v7485_v6 }
 0x1a1   : > { %v1363_v20 = vpop.f32.mrf.mxu0  ;;  %v3352_v10 = vmul.f32 %v1849_v21, %v7464_v54  ;;  %v4240_v21 = vrot.slane %v4239_v3, 4 }
 0x1a2   : > { %v3355_v45 = vmul.f32 %v1363_v20, %v7446_v53 }
 0x1a3   : > { %v4264_v44 = vadd.f32 %v3352_v10, %v3348_v11  ;;  %v4241_v60 = vadd.f32 %v4240_v21, %v4239_v3 }
 0x1a4   : > { %6638 = vmatmul.msk.bf16.gmra.mxu0 %vm990_vm0, %v7026_v49  ;;  %v4256_v52 = vadd.f32 %v4255_v15, %v3355_v45  ;;  %v4227_v45 = vadd.f32 %v4226_v0, %v4225_v12 }
 0x1a5   : > { %v4242_v5 = vrot.slane %v4241_v60, 2 }
 0x1a7   : > { %v2338_v36 = vpop.f32.mrf.mxu2  ;;  %v2827_v55 = vpop.f32.mrf.mxu3 }
 0x1a8   : > { %v1852_v35 = vpop.f32.mrf.mxu1  ;;  %v3353_v18 = vmul.f32 %v2338_v36, %v7487_v7  ;;  %v3354_v15 = vmul.f32 %v2827_v55, %v7493_v24  ;;  %v4251_v55 = vrot.slane %v4250_v13, 2 }
 0x1a9   : > { %v1365_v33 = vpop.f32.mrf.mxu0  ;;  %v3356_v20 = vmul.f32 %v1852_v35, %v7489_v8 }
 0x1aa   : > { %v3359_v23 = vmul.f32 %v1365_v33, %v7477_v1  ;;  %v3350_v33 = vmul.f32 %v7796_v25, %v7491_v9  ;;  %v4273_v35 = vadd.f32 %v3353_v18, %v3349_v57 }
 0x1ab   : > { %6734 = vmatmul.msk.bf16.gmra.mxu1 %vm990_vm0, %v7026_v49 }
 0x1ac   : > { %v4257_v59 = vadd.f32 %v4256_v52, %v3359_v23  ;;  %6830 = vmatmul.msk.bf16.gmra.mxu2 %vm990_vm0, %v7026_v49  ;;  %6926 = vmatmul.msk.bf16.gmra.mxu3 %vm990_vm0, %v7026_v49  ;;  %v4265_v49 = vadd.f32 %v4264_v44, %v3356_v20  ;;  %v5934_v23 = vsel %vm5933_vm6, %v4227_v45, %v7749_v42 }
 0x1ad   : > { %v4282_v12 = vadd.f32 %v3354_v15, %v3350_v33  ;;  %v4243_v44 = vadd.f32 %v4242_v5, %v4241_v60 }
 0x1ae   : > { %v4258_v40 = vrot.slane %v4257_v59, 4 }
 0x1af   : > { %v2341_v61 = vpop.f32.mrf.mxu2  ;;  %v2830_v62 = vpop.f32.mrf.mxu3 }
 0x1b0   : > { %v4259_v27 = vadd.f32 %v4258_v40, %v4257_v59  ;;  %v1854_v63 = vpop.f32.mrf.mxu1  ;;  %v3357_v52 = vmul.f32 %v2341_v61, %v7505_v48  ;;  %v3358_v36 = vmul.f32 %v2830_v62, %v7511_v22  ;;  %v4235_v40 = vrot.slane %v4234_v19, 1 }
 0x1b1   : > { %v1368_v16 = vpop.f32.mrf.mxu0  ;;  %v3360_v51 = vmul.f32 %v1854_v63, %v7513_v50 }
 0x1b2   : > { %v4260_v17 = vrot.slane %v4259_v27, 2  ;;  %v3363_v25 = vmul.f32 %v1368_v16, %v7428_v28  ;;  %v4274_v42 = vadd.f32 %v4273_v35, %v3357_v52  ;;  %v4283_v20 = vadd.f32 %v4282_v12, %v3358_v36 }
 0x1b3   : > { %v4266_v43 = vadd.f32 %v4265_v49, %v3360_v51  ;;  %v4252_v16 = vadd.f32 %v4251_v55, %v4250_v13  ;;  %v4236_v62 = vadd.f32 %v4235_v40, %v4234_v19  ;;  %v4244_v51 = vrot.slane %v4243_v44, 1 }
 0x1b4   : > { %v4261_v31 = vadd.f32 %v4260_v17, %v4259_v27  ;;  %6639 = vmatmul.msk.bf16.gmra.mxu0 %vm990_vm0, %v7820_v37 }
 0x1b5   : > { %v4267_v56 = vrot.slane %v4266_v43, 4  ;;  %v4253_v18 = vrot.slane %v4252_v16, 1  ;;  %v5942_v57 = vsel %vm5933_vm6, %v4236_v62, %v7761_v46  ;;  %v4245_v35 = vadd.f32 %v4244_v51, %v4243_v44 }
 0x1b6   : > { %v4262_v34 = vrot.slane %v4261_v31, 1 }
 0x1b7   : > { %v4268_v3 = vadd.f32 %v4267_v56, %v4266_v43  ;;  %v2343_v39 = vpop.f32.mrf.mxu2  ;;  %v2832_v0 = vpop.f32.mrf.mxu3  ;;  %v4254_v12 = vadd.f32 %v4253_v18, %v4252_v16 }
 0x1b8   : > { %v4263_v58 = vadd.f32 %v4262_v34, %v4261_v31  ;;  %v3361_v41 = vmul.f32 %v2343_v39, %v7523_v4  ;;  %v1857_v11 = vpop.f32.mrf.mxu1  ;;  %v3362_v21 = vmul.f32 %v2832_v0, %v7525_v14  ;;  %v7028_v31 = vld [vmem:[%s9573_s1 + $0xc8] sm:$0xff] }
 0x1b9   : > { %v1370_v59 = vpop.f32.mrf.mxu0  ;;  %v4269_v27 = vrot.slane %v4268_v3, 2  ;;  %v5956_v40 = vsel %vm5933_vm6, %v4254_v12, %v7770_v29 }
 0x1ba   : > { %v5936_v32 = vsel %vm5935_vm7, %v4263_v58, %v5934_v23  ;;  %v3367_v10 = vmul.f32 %v1370_v59, %v7430_v38  ;;  %v4275_v61 = vadd.f32 %v4274_v42, %v3361_v41  ;;  %v4284_v2 = vadd.f32 %v4283_v20, %v3362_v21 }
 0x1bb   : > { %6122 = vst [vmem:[%s7844_s21] sm:$0xff] %v5936_v32  ;;  %v4270_v17 = vadd.f32 %v4269_v27, %v4268_v3  ;;  %6735 = vmatmul.msk.bf16.gmra.mxu1 %vm990_vm0, %v7820_v37  ;;  %v3364_v58 = vmul.f32 %v1857_v11, %v7462_v26 }
 0x1bc   : > { %v4291_v47 = vadd.f32 %v3367_v10, %v3363_v25  ;;  %v4276_v63 = vrot.slane %v4275_v61, 4  ;;  %6831 = vmatmul.msk.bf16.gmra.mxu2 %vm990_vm0, %v7820_v37  ;;  %v4285_v49 = vrot.slane %v4284_v2, 4  ;;  %6927 = vmatmul.msk.bf16.gmra.mxu3 %vm990_vm0, %v7820_v37  ;;  %v5949_v10 = vsel %vm5933_vm6, %v4245_v35, %v7766_v30  ;;  %v7030_v35 = vld [vmem:[%s9573_s1 + $0xd8] sm:$0xff] }
 0x1bd   : > { %v4271_v45 = vrot.slane %v4270_v17, 1 }
 0x1be   : > { %v4277_v60 = vadd.f32 %v4276_v63, %v4275_v61  ;;  %v4286_v34 = vadd.f32 %v4285_v49, %v4284_v2  ;;  %v7029_v63 = vld [vmem:[%s9573_s1 + $0xd0] sm:$0xff] }
 0x1bf   : > { %v4272_v15 = vadd.f32 %v4271_v45, %v4270_v17  ;;  %v2346_v43 = vpop.f32.mrf.mxu2  ;;  %v2835_v52 = vpop.f32.mrf.mxu3 }
 0x1c0   : > { %v4278_v33 = vrot.slane %v4277_v60, 2  ;;  %v1859_v37 = vpop.f32.mrf.mxu1  ;;  %v4287_v36 = vrot.slane %v4286_v34, 2  ;;  %v3365_v20 = vmul.f32 %v2346_v43, %v7485_v6  ;;  %v3366_v27 = vmul.f32 %v2835_v52, %v7491_v9 }
 0x1c1   : > { %v1373_v13 = vpop.f32.mrf.mxu0  ;;  %v5943_v23 = vsel %vm5935_vm7, %v4272_v15, %v5942_v57  ;;  %v3368_v56 = vmul.f32 %v1859_v37, %v7464_v54 }
 0x1c2   : > { %v3371_v19 = vmul.f32 %v1373_v13, %v7446_v53  ;;  %6123 = vst [vmem:[%s7844_s21 + $0x8] sm:$0xff] %v5943_v23  ;;  %v4279_v5 = vadd.f32 %v4278_v33, %v4277_v60  ;;  %v4288_v59 = vadd.f32 %v4287_v36, %v4286_v34 }
 0x1c3   : > { %v4300_v32 = vadd.f32 %v3368_v56, %v3364_v58 }
 0x1c4   : > { %6640 = vmatmul.msk.bf16.gmra.mxu0 %vm990_vm0, %v7028_v31  ;;  %v4292_v55 = vadd.f32 %v4291_v47, %v3371_v19  ;;  %v4280_v46 = vrot.slane %v4279_v5, 1  ;;  %v4289_v3 = vrot.slane %v4288_v59, 1 }
 0x1c6   : > { %v4281_v39 = vadd.f32 %v4280_v46, %v4279_v5  ;;  %v4290_v42 = vadd.f32 %v4289_v3, %v4288_v59 }
 0x1c7   : > { %v2348_v41 = vpop.f32.mrf.mxu2  ;;  %v2837_v47 = vpop.f32.mrf.mxu3 }
 0x1c8   : > { %v5950_v11 = vsel %vm5935_vm7, %v4281_v39, %v5949_v10  ;;  %v3369_v21 = vmul.f32 %v2348_v41, %v7487_v7  ;;  %v1862_v44 = vpop.f32.mrf.mxu1  ;;  %v5957_v30 = vsel %vm5935_vm7, %v4290_v42, %v5956_v40  ;;  %v3370_v61 = vmul.f32 %v2837_v47, %v7493_v24 }
 0x1c9   : > { %v1375_v25 = vpop.f32.mrf.mxu0  ;;  %6124 = vst [vmem:[%s7844_s21 + $0x10] sm:$0xff] %v5950_v11  ;;  %v3372_v29 = vmul.f32 %v1862_v44, %v7489_v8 }
 0x1ca   : > { %v3375_v0 = vmul.f32 %v1375_v25, %v7477_v1  ;;  %6125 = vst [vmem:[%s7844_s21 + $0x18] sm:$0xff] %v5957_v30  ;;  %v4309_v17 = vadd.f32 %v3369_v21, %v3365_v20  ;;  %v4318_v2 = vadd.f32 %v3370_v61, %v3366_v27 }
 0x1cb   : > { %v4301_v62 = vadd.f32 %v4300_v32, %v3372_v29  ;;  %6736 = vmatmul.msk.bf16.gmra.mxu1 %vm990_vm0, %v7028_v31 }
 0x1cc   : > { %v4293_v16 = vadd.f32 %v4292_v55, %v3375_v0  ;;  %6832 = vmatmul.msk.bf16.gmra.mxu2 %vm990_vm0, %v7028_v31  ;;  %6928 = vmatmul.msk.bf16.gmra.mxu3 %vm990_vm0, %v7028_v31 }
 0x1ce   : > { %v4294_v46 = vrot.slane %v4293_v16, 4 }
 0x1cf   : > { %v2351_v49 = vpop.f32.mrf.mxu2  ;;  %v2840_v60 = vpop.f32.mrf.mxu3 }
 0x1d0   : > { %v3373_v51 = vmul.f32 %v2351_v49, %v7505_v48  ;;  %v1864_v13 = vpop.f32.mrf.mxu1  ;;  %v3374_v18 = vmul.f32 %v2840_v60, %v7511_v22  ;;  %v4295_v41 = vadd.f32 %v4294_v46, %v4293_v16 }
 0x1d1   : > { %v1378_v45 = vpop.f32.mrf.mxu0  ;;  %v3376_v15 = vmul.f32 %v1864_v13, %v7513_v50  ;;  %v7031_v13 = vld [vmem:[%s9573_s1 + $0xe0] sm:$0xff] }
 0x1d2   : > { %v4310_v34 = vadd.f32 %v4309_v17, %v3373_v51  ;;  %v4319_v43 = vadd.f32 %v4318_v2, %v3374_v18  ;;  %v3379_v33 = vmul.f32 %v1378_v45, %v7428_v28  ;;  %v4296_v27 = vrot.slane %v4295_v41, 2 }
 0x1d3   : > { %v4302_v19 = vadd.f32 %v4301_v62, %v3376_v15 }
 0x1d4   : > { %6641 = vmatmul.msk.bf16.gmra.mxu0 %vm990_vm0, %v7029_v63  ;;  %v4297_v51 = vadd.f32 %v4296_v27, %v4295_v41 }
 0x1d5   : > { %v4303_v62 = vrot.slane %v4302_v19, 4 }
 0x1d7   : > { %v2353_v57 = vpop.f32.mrf.mxu2  ;;  %v2842_v23 = vpop.f32.mrf.mxu3  ;;  %v4304_v18 = vadd.f32 %v4303_v62, %v4302_v19 }
 0x1d8   : > { %v3377_v37 = vmul.f32 %v2353_v57, %v7523_v4  ;;  %v1867_v36 = vpop.f32.mrf.mxu1  ;;  %v3378_v58 = vmul.f32 %v2842_v23, %v7525_v14 }
 0x1d9   : > { %v1380_v31 = vpop.f32.mrf.mxu0  ;;  %v3380_v25 = vmul.f32 %v1867_v36, %v7462_v26 }
 0x1da   : > { %v3383_v52 = vmul.f32 %v1380_v31, %v7430_v38  ;;  %v7894_v5 = vadd.f32 %v4310_v34, %v3377_v37  ;;  %v7896_v55 = vadd.f32 %v4319_v43, %v3378_v58  ;;  %v4305_v58 = vrot.slane %v4304_v18, 2 }
 0x1db   : > { %6737 = vmatmul.msk.bf16.gmra.mxu1 %vm990_vm0, %v7029_v63 }
 0x1dc   : > { %v4327_v56 = vadd.f32 %v3383_v52, %v3379_v33  ;;  %6833 = vmatmul.msk.bf16.gmra.mxu2 %vm990_vm0, %v7029_v63  ;;  %6929 = vmatmul.msk.bf16.gmra.mxu3 %vm990_vm0, %v7029_v63  ;;  %v4298_v52 = vrot.slane %v4297_v51, 1  ;;  %v4321_v19 = vrot.slane %v7896_v55, 4 }
 0x1de   : > { %v4299_v46 = vadd.f32 %v4298_v52, %v4297_v51  ;;  %v7032_v51 = vld [vmem:[%s9573_s1 + $0xe8] sm:$0xff] }
 0x1df   : > { %v2356_v59 = vpop.f32.mrf.mxu2  ;;  %v2845_v3 = vpop.f32.mrf.mxu3 }
 0x1e0   : > { %v1869_v39 = vpop.f32.mrf.mxu1  ;;  %v3381_v21 = vmul.f32 %v2356_v59, %v7485_v6  ;;  %v3382_v61 = vmul.f32 %v2845_v3, %v7491_v9 }
 0x1e1   : > { %v1383_v12 = vpop.f32.mrf.mxu0  ;;  %v3384_v10 = vmul.f32 %v1869_v39, %v7464_v54 }
 0x1e2   : > { %v3387_v32 = vmul.f32 %v1383_v12, %v7446_v53 }
 0x1e3   : > { %v4336_v42 = vadd.f32 %v3384_v10, %v3380_v25  ;;  %v4306_v25 = vadd.f32 %v4305_v58, %v4304_v18 }
 0x1e4   : > { %v4328_v40 = vadd.f32 %v4327_v56, %v3387_v32  ;;  %6642 = vmatmul.msk.bf16.gmra.mxu0 %vm990_vm0, %v7030_v35  ;;  %v4312_v56 = vrot.slane %v7894_v5, 4 }
 0x1e6   : > { %v4313_v10 = vadd.f32 %v4312_v56, %v7894_v5 }
 0x1e7   : > { %v2358_v11 = vpop.f32.mrf.mxu2  ;;  %v2847_v44 = vpop.f32.mrf.mxu3 }
 0x1e8   : > { %v3385_v47 = vmul.f32 %v2358_v11, %v7487_v7  ;;  %v1872_v30 = vpop.f32.mrf.mxu1  ;;  %v3386_v29 = vmul.f32 %v2847_v44, %v7493_v24 }
 0x1e9   : > { %v1385_v0 = vpop.f32.mrf.mxu0  ;;  %v3388_v17 = vmul.f32 %v1872_v30, %v7489_v8 }
 0x1ea   : > { %v3391_v20 = vmul.f32 %v1385_v0, %v7477_v1  ;;  %v4345_v16 = vadd.f32 %v3385_v47, %v3381_v21  ;;  %v4354_v63 = vadd.f32 %v3386_v29, %v3382_v61  ;;  %v4307_v29 = vrot.slane %v4306_v25, 1 }
 0x1eb   : > { %v4337_v45 = vadd.f32 %v4336_v42, %v3388_v17  ;;  %6738 = vmatmul.msk.bf16.gmra.mxu1 %vm990_vm0, %v7030_v35 }
 0x1ec   : > { %v4329_v2 = vadd.f32 %v4328_v40, %v3391_v20  ;;  %6834 = vmatmul.msk.bf16.gmra.mxu2 %vm990_vm0, %v7030_v35  ;;  %6930 = vmatmul.msk.bf16.gmra.mxu3 %vm990_vm0, %v7030_v35  ;;  %v4322_v40 = vadd.f32 %v4321_v19, %v7896_v55  ;;  %v4314_v55 = vrot.slane %v4313_v10, 2 }
 0x1ee   : > { %v4330_v49 = vrot.slane %v4329_v2, 4  ;;  %v4315_v18 = vadd.f32 %v4314_v55, %v4313_v10 }
 0x1ef   : > { %v2361_v34 = vpop.f32.mrf.mxu2  ;;  %v2850_v57 = vpop.f32.mrf.mxu3 }
 0x1f0   : > { %v4331_v60 = vadd.f32 %v4330_v49, %v4329_v2  ;;  %v3389_v31 = vmul.f32 %v2361_v34, %v7505_v48  ;;  %v1874_v33 = vpop.f32.mrf.mxu1  ;;  %v3390_v37 = vmul.f32 %v2850_v57, %v7511_v22  ;;  %v4323_v2 = vrot.slane %v4322_v40, 2 }
 0x1f1   : > { %v1388_v15 = vpop.f32.mrf.mxu0  ;;  %v3392_v36 = vmul.f32 %v1874_v33, %v7513_v50 }
 0x1f2   : > { %v4332_v43 = vrot.slane %v4331_v60, 2  ;;  %v4346_v35 = vadd.f32 %v4345_v16, %v3389_v31  ;;  %v4355_v12 = vadd.f32 %v4354_v63, %v3390_v37  ;;  %v3395_v20 = vmul.f32 %v1388_v15, %v7428_v28 }
 0x1f3   : > { %v4338_v32 = vadd.f32 %v4337_v45, %v3392_v36 }
 0x1f4   : > { %v4333_v23 = vadd.f32 %v4332_v43, %v4331_v60  ;;  %6643 = vmatmul.msk.bf16.gmra.mxu0 %vm990_vm0, %v7031_v13  ;;  %v4308_v60 = vadd.f32 %v4307_v29, %v4306_v25  ;;  %v4324_v43 = vadd.f32 %v4323_v2, %v4322_v40 }
 0x1f5   : > { %v4339_v39 = vrot.slane %v4338_v32, 4 }
 0x1f6   : > { %v4334_v59 = vrot.slane %v4333_v23, 1 }
 0x1f7   : > { %v4340_v0 = vadd.f32 %v4339_v39, %v4338_v32  ;;  %v2363_v11 = vpop.f32.mrf.mxu2  ;;  %v2852_v47 = vpop.f32.mrf.mxu3  ;;  %v4325_v32 = vrot.slane %v4324_v43, 1 }
 0x1f8   : > { %v4335_v3 = vadd.f32 %v4334_v59, %v4333_v23  ;;  %v3393_v21 = vmul.f32 %v2363_v11, %v7523_v4  ;;  %v1877_v44 = vpop.f32.mrf.mxu1  ;;  %v3394_v61 = vmul.f32 %v2852_v47, %v7525_v14 }
 0x1f9   : > { %v1390_v42 = vpop.f32.mrf.mxu0  ;;  %v4341_v30 = vrot.slane %v4340_v0, 2  ;;  %v3396_v56 = vmul.f32 %v1877_v44, %v7462_v26 }
 0x1fa   : > { %v7929_v41 = vsel %vm5923_vm1, %v4335_v3, %v4299_v46  ;;  %v3399_v27 = vmul.f32 %v1390_v42, %v7430_v38  ;;  %v4347_v17 = vadd.f32 %v4346_v35, %v3393_v21  ;;  %v4356_v16 = vadd.f32 %v4355_v12, %v3394_v61 }
 0x1fb   : > { %v4342_v62 = vadd.f32 %v4341_v30, %v4340_v0  ;;  %6739 = vmatmul.msk.bf16.gmra.mxu1 %vm990_vm0, %v7031_v13  ;;  %v4316_v35 = vrot.slane %v4315_v18, 1  ;;  %v4326_v0 = vadd.f32 %v4325_v32, %v4324_v43 }
 0x1fc   : > { %v4363_v5 = vadd.f32 %v3399_v27, %v3395_v20  ;;  %v4348_v63 = vrot.slane %v4347_v17, 4  ;;  %6835 = vmatmul.msk.bf16.gmra.mxu2 %vm990_vm0, %v7031_v13  ;;  %v4357_v49 = vrot.slane %v4356_v16, 4  ;;  %6931 = vmatmul.msk.bf16.gmra.mxu3 %vm990_vm0, %v7031_v13 }
 0x1fd   : > { %v4343_v45 = vrot.slane %v4342_v62, 1  ;;  %v4317_v10 = vadd.f32 %v4316_v35, %v4315_v18 }
 0x1fe   : > { %v4349_v15 = vadd.f32 %v4348_v63, %v4347_v17  ;;  %v4358_v57 = vadd.f32 %v4357_v49, %v4356_v16 }
 0x1ff   : > { %v4344_v31 = vadd.f32 %v4343_v45, %v4342_v62  ;;  %v2366_v33 = vpop.f32.mrf.mxu2  ;;  %v2855_v23 = vpop.f32.mrf.mxu3 }
 0x200   : > { %v4350_v37 = vrot.slane %v4349_v15, 2  ;;  %v1879_v36 = vpop.f32.mrf.mxu1  ;;  %v4359_v13 = vrot.slane %v4358_v57, 2  ;;  %v3397_v47 = vmul.f32 %v2366_v33, %v7485_v6  ;;  %v3398_v44 = vmul.f32 %v2855_v23, %v7491_v9 }
 0x201   : > { %v1393_v34 = vpop.f32.mrf.mxu0  ;;  %v7943_v58 = vsel %vm5923_vm1, %v4344_v31, %v4308_v60  ;;  %v3400_v19 = vmul.f32 %v1879_v36, %v7464_v54  ;;  %v7033_v60 = vld [vmem:[%s9573_s1 + $0xf0] sm:$0xff] }
 0x202   : > { %v3403_v52 = vmul.f32 %v1393_v34, %v7446_v53  ;;  %v4351_v12 = vadd.f32 %v4350_v37, %v4349_v15  ;;  %v4360_v46 = vadd.f32 %v4359_v13, %v4358_v57 }
 0x203   : > { %v4372_v3 = vadd.f32 %v3400_v19, %v3396_v56 }
 0x204   : > { %6644 = vmatmul.msk.bf16.gmra.mxu0 %vm990_vm0, %v7032_v51  ;;  %v4364_v59 = vadd.f32 %v4363_v5, %v3403_v52  ;;  %v4352_v39 = vrot.slane %v4351_v12, 1  ;;  %v4361_v25 = vrot.slane %v4360_v46, 1 }
 0x206   : > { %v4353_v40 = vadd.f32 %v4352_v39, %v4351_v12  ;;  %v4362_v11 = vadd.f32 %v4361_v25, %v4360_v46 }
 0x207   : > { %v2368_v20 = vpop.f32.mrf.mxu2  ;;  %v2857_v61 = vpop.f32.mrf.mxu3 }
 0x208   : > { %v7950_v21 = vsel %vm5923_vm1, %v4353_v40, %v4317_v10  ;;  %v3401_v30 = vmul.f32 %v2368_v20, %v7487_v7  ;;  %v1882_v5 = vpop.f32.mrf.mxu1  ;;  %v7956_v29 = vsel %vm5923_vm1, %v4362_v11, %v4326_v0  ;;  %v3402_v55 = vmul.f32 %v2857_v61, %v7493_v24 }
 0x209   : > { %v1395_v42 = vpop.f32.mrf.mxu0  ;;  %v3404_v17 = vmul.f32 %v1882_v5, %v7489_v8 }
 0x20a   : > { %v3407_v27 = vmul.f32 %v1395_v42, %v7477_v1  ;;  %v4381_v62 = vadd.f32 %v3401_v30, %v3397_v47  ;;  %v4390_v16 = vadd.f32 %v3402_v55, %v3398_v44  ;;  %v7034_v30 = vld [vmem:[%s9573_s1 + $0xf8] sm:$0xff] }
 0x20b   : > { %v4373_v63 = vadd.f32 %v4372_v3, %v3404_v17  ;;  %6740 = vmatmul.msk.bf16.gmra.mxu1 %vm990_vm0, %v7032_v51 }
 0x20c   : > { %v4365_v2 = vadd.f32 %v4364_v59, %v3407_v27  ;;  %6836 = vmatmul.msk.bf16.gmra.mxu2 %vm990_vm0, %v7032_v51  ;;  %6932 = vmatmul.msk.bf16.gmra.mxu3 %vm990_vm0, %v7032_v51 }
 0x20e   : > { %v4366_v45 = vrot.slane %v4365_v2, 4 }
 0x20f   : > { %v2371_v15 = vpop.f32.mrf.mxu2  ;;  %v2860_v31 = vpop.f32.mrf.mxu3 }
 0x210   : > { %v4367_v49 = vadd.f32 %v4366_v45, %v4365_v2  ;;  %v3405_v43 = vmul.f32 %v2371_v15, %v7505_v48  ;;  %v1884_v57 = vpop.f32.mrf.mxu1  ;;  %v3406_v33 = vmul.f32 %v2860_v31, %v7511_v22 }
 0x211   : > { %v1398_v18 = vpop.f32.mrf.mxu0  ;;  %v3408_v37 = vmul.f32 %v1884_v57, %v7513_v50 }
 0x212   : > { %v4368_v34 = vrot.slane %v4367_v49, 2  ;;  %v4382_v51 = vadd.f32 %v4381_v62, %v3405_v43  ;;  %v4391_v23 = vadd.f32 %v4390_v16, %v3406_v33  ;;  %v3411_v46 = vmul.f32 %v1398_v18, %v7428_v28 }
 0x213   : > { %v4374_v13 = vadd.f32 %v4373_v63, %v3408_v37 }
 0x214   : > { %v4369_v52 = vadd.f32 %v4368_v34, %v4367_v49  ;;  %6645 = vmatmul.msk.bf16.gmra.mxu0 %vm990_vm0, %v7033_v60 }
 0x215   : > { %v4375_v19 = vrot.slane %v4374_v13, 4 }
 0x216   : > { %v4370_v36 = vrot.slane %v4369_v52, 1 }
 0x217   : > { %v4376_v59 = vadd.f32 %v4375_v19, %v4374_v13  ;;  %v2373_v32 = vpop.f32.mrf.mxu2  ;;  %v2862_v25 = vpop.f32.mrf.mxu3 }
 0x218   : > { %v4371_v56 = vadd.f32 %v4370_v36, %v4369_v52  ;;  %v3409_v39 = vmul.f32 %v2373_v32, %v7523_v4  ;;  %v1887_v10 = vpop.f32.mrf.mxu1  ;;  %v3410_v42 = vmul.f32 %v2862_v25, %v7525_v14 }
 0x219   : > { %v1400_v35 = vpop.f32.mrf.mxu0  ;;  %v4377_v40 = vrot.slane %v4376_v59, 2 }
 0x21a   : > { %v7972_v12 = vsel %vm5925_vm2, %v4371_v56, %v7929_v41  ;;  %v3415_v3 = vmul.f32 %v1400_v35, %v7430_v38  ;;  %v4383_v11 = vadd.f32 %v4382_v51, %v3409_v39  ;;  %v4392_v27 = vadd.f32 %v4391_v23, %v3410_v42 }
 0x21b   : > { %v4378_v20 = vadd.f32 %v4377_v40, %v4376_v59  ;;  %6741 = vmatmul.msk.bf16.gmra.mxu1 %vm990_vm0, %v7033_v60 }
 0x21c   : > { %v4399_v0 = vadd.f32 %v3415_v3, %v3411_v46  ;;  %v4384_v41 = vrot.slane %v4383_v11, 4  ;;  %6837 = vmatmul.msk.bf16.gmra.mxu2 %vm990_vm0, %v7033_v60  ;;  %v4393_v44 = vrot.slane %v4392_v27, 4  ;;  %6933 = vmatmul.msk.bf16.gmra.mxu3 %vm990_vm0, %v7033_v60  ;;  %v3412_v60 = vmul.f32 %v1887_v10, %v7462_v26 }
 0x21d   : > { %v4379_v47 = vrot.slane %v4378_v20, 1 }
 0x21e   : > { %v4385_v61 = vadd.f32 %v4384_v41, %v4383_v11  ;;  %v4394_v17 = vadd.f32 %v4393_v44, %v4392_v27 }
 0x21f   : > { %v4380_v55 = vadd.f32 %v4379_v47, %v4378_v20  ;;  %v2376_v2 = vpop.f32.mrf.mxu2  ;;  %v2865_v63 = vpop.f32.mrf.mxu3 }
 0x220   : > { %v4386_v16 = vrot.slane %v4385_v61, 2  ;;  %v1889_v45 = vpop.f32.mrf.mxu1  ;;  %v4395_v18 = vrot.slane %v4394_v17, 2  ;;  %v3413_v56 = vmul.f32 %v2376_v2, %v7485_v6  ;;  %v3414_v19 = vmul.f32 %v2865_v63, %v7491_v9 }
 0x221   : > { %v1403_v5 = vpop.f32.mrf.mxu0  ;;  %v7987_v49 = vsel %vm5925_vm2, %v4380_v55, %v7943_v58  ;;  %v3416_v15 = vmul.f32 %v1889_v45, %v7464_v54 }
 0x222   : > { %v3419_v62 = vmul.f32 %v1403_v5, %v7446_v53  ;;  %v4387_v34 = vadd.f32 %v4386_v16, %v4385_v61  ;;  %v4396_v31 = vadd.f32 %v4395_v18, %v4394_v17 }
 0x223   : > { %v4408_v57 = vadd.f32 %v3416_v15, %v3412_v60 }
 0x224   : > { %6646 = vmatmul.msk.bf16.gmra.mxu0 %vm990_vm0, %v7034_v30  ;;  %v4400_v43 = vadd.f32 %v4399_v0, %v3419_v62  ;;  %v4388_v33 = vrot.slane %v4387_v34, 1  ;;  %v4397_v52 = vrot.slane %v4396_v31, 1 }
 0x226   : > { %v4389_v37 = vadd.f32 %v4388_v33, %v4387_v34  ;;  %v4398_v23 = vadd.f32 %v4397_v52, %v4396_v31 }
 0x227   : > { %v2378_v36 = vpop.f32.mrf.mxu2  ;;  %v2867_v59 = vpop.f32.mrf.mxu3 }
 0x228   : > { %v7995_v13 = vsel %vm5925_vm2, %v4389_v37, %v7950_v21  ;;  %v3417_v35 = vmul.f32 %v2378_v36, %v7487_v7  ;;  %v1892_v32 = vpop.f32.mrf.mxu1  ;;  %v8002_v46 = vsel %vm5925_vm2, %v4398_v23, %v7956_v29  ;;  %v3418_v3 = vmul.f32 %v2867_v59, %v7493_v24  ;;  %v7035_v29 = vld [vmem:[%s9573_s1 + $0x100] sm:$0xff] }
 0x229   : > { %v1405_v51 = vpop.f32.mrf.mxu0  ;;  %v3420_v39 = vmul.f32 %v1892_v32, %v7489_v8 }
 0x22a   : > { %v3423_v58 = vmul.f32 %v1405_v51, %v7477_v1  ;;  %v4417_v10 = vadd.f32 %v3417_v35, %v3413_v56  ;;  %v4426_v21 = vadd.f32 %v3418_v3, %v3414_v19  ;;  %v7036_v35 = vld [vmem:[%s9573_s1 + $0x108] sm:$0xff] }
 0x22b   : > { %v4409_v40 = vadd.f32 %v4408_v57, %v3420_v39  ;;  %6742 = vmatmul.msk.bf16.gmra.mxu1 %vm990_vm0, %v7034_v30 }
 0x22c   : > { %v4401_v25 = vadd.f32 %v4400_v43, %v3423_v58  ;;  %6838 = vmatmul.msk.bf16.gmra.mxu2 %vm990_vm0, %v7034_v30  ;;  %6934 = vmatmul.msk.bf16.gmra.mxu3 %vm990_vm0, %v7034_v30 }
 0x22e   : > { %v4402_v42 = vrot.slane %v4401_v25, 4 }
 0x22f   : > { %v2381_v20 = vpop.f32.mrf.mxu2  ;;  %v2870_v47 = vpop.f32.mrf.mxu3 }
 0x230   : > { %v4403_v0 = vadd.f32 %v4402_v42, %v4401_v25  ;;  %v3421_v41 = vmul.f32 %v2381_v20, %v7505_v48  ;;  %v1894_v44 = vpop.f32.mrf.mxu1  ;;  %v3422_v61 = vmul.f32 %v2870_v47, %v7511_v22 }
 0x231   : > { %v1408_v11 = vpop.f32.mrf.mxu0  ;;  %v3424_v55 = vmul.f32 %v1894_v44, %v7513_v50 }
 0x232   : > { %v4404_v27 = vrot.slane %v4403_v0, 2  ;;  %v4418_v30 = vadd.f32 %v4417_v10, %v3421_v41  ;;  %v4427_v17 = vadd.f32 %v4426_v21, %v3422_v61  ;;  %v3427_v34 = vmul.f32 %v1408_v11, %v7428_v28 }
 0x233   : > { %v4410_v62 = vadd.f32 %v4409_v40, %v3424_v55 }
 0x234   : > { %v4405_v5 = vadd.f32 %v4404_v27, %v4403_v0  ;;  %6647 = vmatmul.msk.bf16.gmra.mxu0 %vm990_vm0, %v7035_v29 }
 0x235   : > { %v4411_v63 = vrot.slane %v4410_v62, 4 }
 0x236   : > { %v4406_v2 = vrot.slane %v4405_v5, 1 }
 0x237   : > { %v4412_v60 = vadd.f32 %v4411_v63, %v4410_v62  ;;  %v2383_v15 = vpop.f32.mrf.mxu2  ;;  %v2872_v57 = vpop.f32.mrf.mxu3 }
 0x238   : > { %v4407_v16 = vadd.f32 %v4406_v2, %v4405_v5  ;;  %v3425_v31 = vmul.f32 %v2383_v15, %v7523_v4  ;;  %v1897_v33 = vpop.f32.mrf.mxu1  ;;  %v3426_v37 = vmul.f32 %v2872_v57, %v7525_v14 }
 0x239   : > { %v1410_v45 = vpop.f32.mrf.mxu0  ;;  %v4413_v52 = vrot.slane %v4412_v60, 2 }
 0x23a   : > { %v8018_v18 = vsel %vm5927_vm3, %v4407_v16, %v7972_v12  ;;  %v3431_v43 = vmul.f32 %v1410_v45, %v7430_v38  ;;  %v4419_v23 = vadd.f32 %v4418_v30, %v3425_v31  ;;  %v4428_v58 = vadd.f32 %v4427_v17, %v3426_v37 }
 0x23b   : > { %v4414_v36 = vadd.f32 %v4413_v52, %v4412_v60  ;;  %6743 = vmatmul.msk.bf16.gmra.mxu1 %vm990_vm0, %v7035_v29 }
 0x23c   : > { %v4435_v51 = vadd.f32 %v3431_v43, %v3427_v34  ;;  %v4420_v12 = vrot.slane %v4419_v23, 4  ;;  %6839 = vmatmul.msk.bf16.gmra.mxu2 %vm990_vm0, %v7035_v29  ;;  %v4429_v19 = vrot.slane %v4428_v58, 4  ;;  %6935 = vmatmul.msk.bf16.gmra.mxu3 %vm990_vm0, %v7035_v29  ;;  %v3428_v29 = vmul.f32 %v1897_v33, %v7462_v26 }
 0x23d   : > { %v4415_v56 = vrot.slane %v4414_v36, 1 }
 0x23e   : > { %v4421_v59 = vadd.f32 %v4420_v12, %v4419_v23  ;;  %v4430_v39 = vadd.f32 %v4429_v19, %v4428_v58 }
 0x23f   : > { %v4416_v3 = vadd.f32 %v4415_v56, %v4414_v36  ;;  %v2386_v25 = vpop.f32.mrf.mxu2  ;;  %v2875_v40 = vpop.f32.mrf.mxu3 }
 0x240   : > { %v4422_v21 = vrot.slane %v4421_v59, 2  ;;  %v1899_v42 = vpop.f32.mrf.mxu1  ;;  %v4431_v11 = vrot.slane %v4430_v39, 2  ;;  %v3429_v16 = vmul.f32 %v2386_v25, %v7485_v6  ;;  %v3430_v63 = vmul.f32 %v2875_v40, %v7491_v9 }
 0x241   : > { %v1413_v32 = vpop.f32.mrf.mxu0  ;;  %v8033_v0 = vsel %vm5927_vm3, %v4416_v3, %v7987_v49  ;;  %v3432_v20 = vmul.f32 %v1899_v42, %v7464_v54 }
 0x242   : > { %v3435_v10 = vmul.f32 %v1413_v32, %v7446_v53  ;;  %v4423_v27 = vadd.f32 %v4422_v21, %v4421_v59  ;;  %v4432_v47 = vadd.f32 %v4431_v11, %v4430_v39 }
 0x243   : > { %v4444_v44 = vadd.f32 %v3432_v20, %v3428_v29 }
 0x244   : > { %6648 = vmatmul.msk.bf16.gmra.mxu0 %vm990_vm0, %v7036_v35  ;;  %v4436_v41 = vadd.f32 %v4435_v51, %v3435_v10  ;;  %v4424_v61 = vrot.slane %v4423_v27, 1  ;;  %v4433_v5 = vrot.slane %v4432_v47, 1 }
 0x246   : > { %v4425_v55 = vadd.f32 %v4424_v61, %v4423_v27  ;;  %v4434_v17 = vadd.f32 %v4433_v5, %v4432_v47 }
 0x247   : > { %v2388_v2 = vpop.f32.mrf.mxu2  ;;  %v2877_v60 = vpop.f32.mrf.mxu3 }
 0x248   : > { %v8041_v62 = vsel %vm5927_vm3, %v4425_v55, %v7995_v13  ;;  %v3433_v45 = vmul.f32 %v2388_v2, %v7487_v7  ;;  %v1902_v15 = vpop.f32.mrf.mxu1  ;;  %v8048_v34 = vsel %vm5927_vm3, %v4434_v17, %v8002_v46  ;;  %v3434_v43 = vmul.f32 %v2877_v60, %v7493_v24  ;;  %v7037_v46 = vld [vmem:[%s9573_s1 + $0x110] sm:$0xff] }
 0x249   : > { %v1415_v30 = vpop.f32.mrf.mxu0  ;;  %v3436_v31 = vmul.f32 %v1902_v15, %v7489_v8 }
 0x24a   : > { %v3439_v49 = vmul.f32 %v1415_v30, %v7477_v1  ;;  %v4453_v33 = vadd.f32 %v3433_v45, %v3429_v16  ;;  %v4462_v13 = vadd.f32 %v3434_v43, %v3430_v63  ;;  %v7038_v45 = vld [vmem:[%s9573_s1 + $0x118] sm:$0xff] }
 0x24b   : > { %v4445_v52 = vadd.f32 %v4444_v44, %v3436_v31  ;;  %6744 = vmatmul.msk.bf16.gmra.mxu1 %vm990_vm0, %v7036_v35 }
 0x24c   : > { %v4437_v57 = vadd.f32 %v4436_v41, %v3439_v49  ;;  %6840 = vmatmul.msk.bf16.gmra.mxu2 %vm990_vm0, %v7036_v35  ;;  %6936 = vmatmul.msk.bf16.gmra.mxu3 %vm990_vm0, %v7036_v35 }
 0x24e   : > { %v4438_v37 = vrot.slane %v4437_v57, 4 }
 0x24f   : > { %v2391_v36 = vpop.f32.mrf.mxu2  ;;  %v2880_v56 = vpop.f32.mrf.mxu3 }
 0x250   : > { %v4439_v51 = vadd.f32 %v4438_v37, %v4437_v57  ;;  %v3437_v12 = vmul.f32 %v2391_v36, %v7505_v48  ;;  %v1904_v19 = vpop.f32.mrf.mxu1  ;;  %v3438_v59 = vmul.f32 %v2880_v56, %v7511_v22 }
 0x251   : > { %v1418_v23 = vpop.f32.mrf.mxu0  ;;  %v3440_v3 = vmul.f32 %v1904_v19, %v7513_v50 }
 0x252   : > { %v4440_v58 = vrot.slane %v4439_v51, 2  ;;  %v4454_v35 = vadd.f32 %v4453_v33, %v3437_v12  ;;  %v4463_v39 = vadd.f32 %v4462_v13, %v3438_v59  ;;  %v3443_v27 = vmul.f32 %v1418_v23, %v7428_v28 }
 0x253   : > { %v4446_v10 = vadd.f32 %v4445_v52, %v3440_v3 }
 0x254   : > { %v4441_v32 = vadd.f32 %v4440_v58, %v4439_v51  ;;  %6649 = vmatmul.msk.bf16.gmra.mxu0 %vm990_vm0, %v7037_v46 }
 0x255   : > { %v4447_v40 = vrot.slane %v4446_v10, 4 }
 0x256   : > { %v4442_v25 = vrot.slane %v4441_v32, 1 }
 0x257   : > { %v4448_v29 = vadd.f32 %v4447_v40, %v4446_v10  ;;  %v2393_v20 = vpop.f32.mrf.mxu2  ;;  %v2882_v44 = vpop.f32.mrf.mxu3 }
 0x258   : > { %v4443_v21 = vadd.f32 %v4442_v25, %v4441_v32  ;;  %v3441_v47 = vmul.f32 %v2393_v20, %v7523_v4  ;;  %v1907_v61 = vpop.f32.mrf.mxu1  ;;  %v3442_v55 = vmul.f32 %v2882_v44, %v7525_v14 }
 0x259   : > { %v1420_v42 = vpop.f32.mrf.mxu0  ;;  %v4449_v5 = vrot.slane %v4448_v29, 2 }
 0x25a   : > { %v8064_v11 = vsel %vm5929_vm4, %v4443_v21, %v8018_v18  ;;  %v3447_v41 = vmul.f32 %v1420_v42, %v7430_v38  ;;  %v4455_v17 = vadd.f32 %v4454_v35, %v3441_v47  ;;  %v4464_v49 = vadd.f32 %v4463_v39, %v3442_v55 }
 0x25b   : > { %v4450_v2 = vadd.f32 %v4449_v5, %v4448_v29  ;;  %6745 = vmatmul.msk.bf16.gmra.mxu1 %vm990_vm0, %v7037_v46 }
 0x25c   : > { %v4471_v30 = vadd.f32 %v3447_v41, %v3443_v27  ;;  %v4456_v18 = vrot.slane %v4455_v17, 4  ;;  %6841 = vmatmul.msk.bf16.gmra.mxu2 %vm990_vm0, %v7037_v46  ;;  %v4465_v63 = vrot.slane %v4464_v49, 4  ;;  %6937 = vmatmul.msk.bf16.gmra.mxu3 %vm990_vm0, %v7037_v46  ;;  %v3444_v46 = vmul.f32 %v1907_v61, %v7462_v26 }
 0x25d   : > { %v4451_v16 = vrot.slane %v4450_v2, 1 }
 0x25e   : > { %v4457_v60 = vadd.f32 %v4456_v18, %v4455_v17  ;;  %v4466_v31 = vadd.f32 %v4465_v63, %v4464_v49 }
 0x25f   : > { %v4452_v43 = vadd.f32 %v4451_v16, %v4450_v2  ;;  %v2396_v57 = vpop.f32.mrf.mxu2  ;;  %v2885_v52 = vpop.f32.mrf.mxu3 }
 0x260   : > { %v4458_v13 = vrot.slane %v4457_v60, 2  ;;  %v1909_v37 = vpop.f32.mrf.mxu1  ;;  %v4467_v23 = vrot.slane %v4466_v31, 2  ;;  %v3445_v21 = vmul.f32 %v2396_v57, %v7485_v6  ;;  %v3446_v40 = vmul.f32 %v2885_v52, %v7491_v9 }
 0x261   : > { %v1423_v15 = vpop.f32.mrf.mxu0  ;;  %v8079_v51 = vsel %vm5929_vm4, %v4452_v43, %v8033_v0  ;;  %v3448_v36 = vmul.f32 %v1909_v37, %v7464_v54 }
 0x262   : > { %v3451_v33 = vmul.f32 %v1423_v15, %v7446_v53  ;;  %v4459_v58 = vadd.f32 %v4458_v13, %v4457_v60  ;;  %v4468_v56 = vadd.f32 %v4467_v23, %v4466_v31 }
 0x263   : > { %v4480_v19 = vadd.f32 %v3448_v36, %v3444_v46 }
 0x264   : > { %6650 = vmatmul.msk.bf16.gmra.mxu0 %vm990_vm0, %v7038_v45  ;;  %v4472_v12 = vadd.f32 %v4471_v30, %v3451_v33  ;;  %v4460_v59 = vrot.slane %v4459_v58, 1  ;;  %v4469_v32 = vrot.slane %v4468_v56, 1 }
 0x266   : > { %v4461_v3 = vadd.f32 %v4460_v59, %v4459_v58  ;;  %v4470_v39 = vadd.f32 %v4469_v32, %v4468_v56 }
 0x267   : > { %v2398_v25 = vpop.f32.mrf.mxu2  ;;  %v2887_v29 = vpop.f32.mrf.mxu3 }
 0x268   : > { %v8087_v10 = vsel %vm5929_vm4, %v4461_v3, %v8041_v62  ;;  %v3449_v42 = vmul.f32 %v2398_v25, %v7487_v7  ;;  %v1912_v20 = vpop.f32.mrf.mxu1  ;;  %v8094_v27 = vsel %vm5929_vm4, %v4470_v39, %v8048_v34  ;;  %v3450_v41 = vmul.f32 %v2887_v29, %v7493_v24  ;;  %v7039_v34 = vld [vmem:[%s9573_s1 + $0x120] sm:$0xff] }
 0x269   : > { %v1425_v35 = vpop.f32.mrf.mxu0  ;;  %v3452_v47 = vmul.f32 %v1912_v20, %v7489_v8 }
 0x26a   : > { %v3455_v0 = vmul.f32 %v1425_v35, %v7477_v1  ;;  %v4489_v61 = vadd.f32 %v3449_v42, %v3445_v21  ;;  %v4498_v62 = vadd.f32 %v3450_v41, %v3446_v40 }
 0x26b   : > { %v4481_v5 = vadd.f32 %v4480_v19, %v3452_v47  ;;  %6746 = vmatmul.msk.bf16.gmra.mxu1 %vm990_vm0, %v7038_v45 }
 0x26c   : > { %v4473_v44 = vadd.f32 %v4472_v12, %v3455_v0  ;;  %6842 = vmatmul.msk.bf16.gmra.mxu2 %vm990_vm0, %v7038_v45  ;;  %6938 = vmatmul.msk.bf16.gmra.mxu3 %vm990_vm0, %v7038_v45  ;;  %v7040_v0 = vld [vmem:[%s9573_s1 + $0x128] sm:$0xff] }
 0x26e   : > { %v4474_v55 = vrot.slane %v4473_v44, 4 }
 0x26f   : > { %v2401_v2 = vpop.f32.mrf.mxu2  ;;  %v2890_v16 = vpop.f32.mrf.mxu3 }
 0x270   : > { %v4475_v30 = vadd.f32 %v4474_v55, %v4473_v44  ;;  %v3453_v18 = vmul.f32 %v2401_v2, %v7505_v48  ;;  %v1914_v63 = vpop.f32.mrf.mxu1  ;;  %v3454_v60 = vmul.f32 %v2890_v16, %v7511_v22 }
 0x271   : > { %v8104_v17 = vpop.f32.mrf.mxu0  ;;  %v3456_v43 = vmul.f32 %v1914_v63, %v7513_v50 }
 0x272   : > { %v4476_v49 = vrot.slane %v4475_v30, 2  ;;  %v4490_v45 = vadd.f32 %v4489_v61, %v3453_v18  ;;  %v4499_v31 = vadd.f32 %v4498_v62, %v3454_v60 }
 0x273   : > { %v4482_v33 = vadd.f32 %v4481_v5, %v3456_v43  ;;  %v7041_v43 = vld [vmem:[%s9573_s1 + $0x130] sm:$0xff] }
 0x274   : > { %v4477_v15 = vadd.f32 %v4476_v49, %v4475_v30  ;;  %6651 = vmatmul.msk.bf16.gmra.mxu0 %vm990_vm0, %v7039_v34 }
 0x275   : > { %v4483_v52 = vrot.slane %v4482_v33, 4 }
 0x276   : > { %v4478_v57 = vrot.slane %v4477_v15, 1 }
 0x277   : > { %v4484_v46 = vadd.f32 %v4483_v52, %v4482_v33  ;;  %v2403_v36 = vpop.f32.mrf.mxu2  ;;  %v2892_v12 = vpop.f32.mrf.mxu3 }
 0x278   : > { %v4479_v13 = vadd.f32 %v4478_v57, %v4477_v15  ;;  %v3457_v58 = vmul.f32 %v2403_v36, %v7523_v4  ;;  %v1917_v56 = vpop.f32.mrf.mxu1  ;;  %v3458_v59 = vmul.f32 %v2892_v12, %v7525_v14 }
 0x279   : > { %v1430_v37 = vpop.f32.mrf.mxu0  ;;  %v4485_v19 = vrot.slane %v4484_v46, 2 }
 0x27a   : > { %v8112_v23 = vsel %vm5931_vm5, %v4479_v13, %v8064_v11  ;;  %v4491_v32 = vadd.f32 %v4490_v45, %v3457_v58  ;;  %v4500_v35 = vadd.f32 %v4499_v31, %v3458_v59  ;;  %v3463_v33 = vmul.f32 %v1430_v37, %v7430_v38 }
 0x27b   : > { %v4486_v3 = vadd.f32 %v4485_v19, %v4484_v46  ;;  %6747 = vmatmul.msk.bf16.gmra.mxu1 %vm990_vm0, %v7039_v34 }
 0x27c   : > { %v4492_v39 = vrot.slane %v4491_v32, 4  ;;  %6843 = vmatmul.msk.bf16.gmra.mxu2 %vm990_vm0, %v7039_v34  ;;  %v4501_v11 = vrot.slane %v4500_v35, 4  ;;  %6939 = vmatmul.msk.bf16.gmra.mxu3 %vm990_vm0, %v7039_v34 }
 0x27d   : > { %v4487_v25 = vrot.slane %v4486_v3, 1 }
 0x27e   : > { %v4493_v21 = vadd.f32 %v4492_v39, %v4491_v32  ;;  %v4502_v29 = vadd.f32 %v4501_v11, %v4500_v35  ;;  %v3460_v35 = vmul.f32 %v1917_v56, %v7462_v26 }
 0x27f   : > { %v4488_v42 = vadd.f32 %v4487_v25, %v4486_v3  ;;  %v2406_v20 = vpop.f32.mrf.mxu2  ;;  %v2895_v47 = vpop.f32.mrf.mxu3 }
 0x280   : > { %v4494_v41 = vrot.slane %v4493_v21, 2  ;;  %v1919_v44 = vpop.f32.mrf.mxu1  ;;  %v4503_v62 = vrot.slane %v4502_v29, 2 }
 0x281   : > { %v1433_v40 = vpop.f32.mrf.mxu0  ;;  %v8124_v61 = vsel %vm5931_vm5, %v4488_v42, %v8079_v51  ;;  %v3464_v37 = vmul.f32 %v1919_v44, %v7464_v54 }
 0x282   : > { %v4495_v5 = vadd.f32 %v4494_v41, %v4493_v21  ;;  %v4504_v55 = vadd.f32 %v4503_v62, %v4502_v29  ;;  %v3467_v13 = vmul.f32 %v1433_v40, %v7446_v53 }
 0x284   : > { %6652 = vmatmul.msk.bf16.gmra.mxu0 %vm990_vm0, %v7040_v0  ;;  %v4496_v30 = vrot.slane %v4495_v5, 1  ;;  %v4505_v34 = vrot.slane %v4504_v55, 1 }
 0x286   : > { %v4497_v2 = vadd.f32 %v4496_v30, %v4495_v5  ;;  %v4506_v18 = vadd.f32 %v4505_v34, %v4504_v55  ;;  %v3461_v5 = vmul.f32 %v2406_v20, %v7485_v6  ;;  %v3462_v34 = vmul.f32 %v2895_v47, %v7491_v9 }
 0x287   : > { %v2408_v16 = vpop.f32.mrf.mxu2  ;;  %v2897_v60 = vpop.f32.mrf.mxu3 }
 0x288   : > { %v8129_v63 = vsel %vm5931_vm5, %v4497_v2, %v8087_v10  ;;  %v1922_v15 = vpop.f32.mrf.mxu1  ;;  %v8133_v51 = vsel %vm5931_vm5, %v4506_v18, %v8094_v27  ;;  %v3459_v27 = vmul.f32 %v8104_v17, %v7428_v28  ;;  %v7042_v17 = vld [vmem:[%s9573_s1 + $0x138] sm:$0xff]  ;;  %v3465_v44 = vmul.f32 %v2408_v16, %v7487_v7 }
 0x289   : > { %v1435_v49 = vpop.f32.mrf.mxu0  ;;  %v3468_v39 = vmul.f32 %v1922_v15, %v7489_v8  ;;  %v3466_v56 = vmul.f32 %v2897_v60, %v7493_v24 }
 0x28a   : > { %v4507_v52 = vadd.f32 %v3463_v33, %v3459_v27  ;;  %v3471_v46 = vmul.f32 %v1435_v49, %v7477_v1 }
 0x28b   : > { %6748 = vmatmul.msk.bf16.gmra.mxu1 %vm990_vm0, %v7040_v0  ;;  %v4534_v16 = vadd.f32 %v3466_v56, %v3462_v34 }
 0x28c   : > { %6844 = vmatmul.msk.bf16.gmra.mxu2 %vm990_vm0, %v7040_v0  ;;  %6940 = vmatmul.msk.bf16.gmra.mxu3 %vm990_vm0, %v7040_v0  ;;  %v4508_v58 = vadd.f32 %v4507_v52, %v3467_v13  ;;  %v4516_v0 = vadd.f32 %v3464_v37, %v3460_v35 }
 0x28e   : > { %v4509_v32 = vadd.f32 %v4508_v58, %v3471_v46  ;;  %v4517_v62 = vadd.f32 %v4516_v0, %v3468_v39 }
 0x28f   : > { %v2411_v31 = vpop.f32.mrf.mxu2  ;;  %v2900_v10 = vpop.f32.mrf.mxu3 }
 0x290   : > { %v1924_v57 = vpop.f32.mrf.mxu1  ;;  %v4510_v3 = vrot.slane %v4509_v32, 4  ;;  %v3469_v2 = vmul.f32 %v2411_v31, %v7505_v48  ;;  %v3470_v49 = vmul.f32 %v2900_v10, %v7511_v22 }
 0x291   : > { %v1438_v45 = vpop.f32.mrf.mxu0  ;;  %v3472_v21 = vmul.f32 %v1924_v57, %v7513_v50  ;;  %v4525_v57 = vadd.f32 %v3465_v44, %v3461_v5 }
 0x292   : > { %v4511_v29 = vadd.f32 %v4510_v3, %v4509_v32  ;;  %v3475_v55 = vmul.f32 %v1438_v45, %v7428_v28  ;;  %v4535_v47 = vadd.f32 %v4534_v16, %v3470_v49 }
 0x293   : > { %v4518_v18 = vadd.f32 %v4517_v62, %v3472_v21  ;;  %v4526_v52 = vadd.f32 %v4525_v57, %v3469_v2  ;;  %v7043_v21 = vld [vmem:[%s9573_s1 + $0x140] sm:$0xff] }
 0x294   : > { %6653 = vmatmul.msk.bf16.gmra.mxu0 %vm990_vm0, %v7041_v43  ;;  %v4512_v15 = vrot.slane %v4511_v29, 2 }
 0x295   : > { %v4519_v46 = vrot.slane %v4518_v18, 4 }
 0x296   : > { %v4513_v10 = vadd.f32 %v4512_v15, %v4511_v29 }
 0x297   : > { %v2413_v12 = vpop.f32.mrf.mxu2  ;;  %v2902_v19 = vpop.f32.mrf.mxu3 }
 0x298   : > { %v1927_v59 = vpop.f32.mrf.mxu1  ;;  %v3473_v60 = vmul.f32 %v2413_v12, %v7523_v4  ;;  %v3474_v33 = vmul.f32 %v2902_v19, %v7525_v14  ;;  %v4520_v19 = vadd.f32 %v4519_v46, %v4518_v18  ;;  %v4514_v35 = vrot.slane %v4513_v10, 1 }
 0x299   : > { %v1440_v36 = vpop.f32.mrf.mxu0  ;;  %v3476_v39 = vmul.f32 %v1927_v59, %v7462_v26 }
 0x29a   : > { %v3479_v41 = vmul.f32 %v1440_v36, %v7430_v38  ;;  %v4527_v32 = vadd.f32 %v4526_v52, %v3473_v60  ;;  %v4536_v37 = vadd.f32 %v4535_v47, %v3474_v33  ;;  %v4521_v5 = vrot.slane %v4520_v19, 2 }
 0x29b   : > { %6749 = vmatmul.msk.bf16.gmra.mxu1 %vm990_vm0, %v7041_v43  ;;  %v4515_v34 = vadd.f32 %v4514_v35, %v4513_v10 }
 0x29c   : > { %6845 = vmatmul.msk.bf16.gmra.mxu2 %vm990_vm0, %v7041_v43  ;;  %6941 = vmatmul.msk.bf16.gmra.mxu3 %vm990_vm0, %v7041_v43  ;;  %v4543_v43 = vadd.f32 %v3479_v41, %v3475_v55  ;;  %v4528_v29 = vrot.slane %v4527_v32, 4  ;;  %v4522_v60 = vadd.f32 %v4521_v5, %v4520_v19 }
 0x29f   : > { %v8156_v11 = vpop.f32.mrf.mxu2  ;;  %v8159_v40 = vpop.f32.mrf.mxu3 }
 0x2a0   : > { %v1929_v42 = vpop.f32.mrf.mxu1  ;;  %v3477_v33 = vmul.f32 %v8156_v11, %v7485_v6 }
 0x2a1   : > { %v1443_v25 = vpop.f32.mrf.mxu0  ;;  %v3480_v3 = vmul.f32 %v1929_v42, %v7464_v54  ;;  %v4537_v42 = vrot.slane %v4536_v37, 4 }
 0x2a2   : > { %v3483_v30 = vmul.f32 %v1443_v25, %v7446_v53 }
 0x2a3   : > { %v4552_v44 = vadd.f32 %v3480_v3, %v3476_v39  ;;  %v4538_v18 = vadd.f32 %v4537_v42, %v4536_v37 }
 0x2a4   : > { %6654 = vmatmul.msk.bf16.gmra.mxu0 %vm990_vm0, %v7042_v17  ;;  %v4544_v45 = vadd.f32 %v4543_v43, %v3483_v30 }
 0x2a7   : > { %v2418_v27 = vpop.f32.mrf.mxu2  ;;  %v2907_v31 = vpop.f32.mrf.mxu3 }
 0x2a8   : > { %v1932_v36 = vpop.f32.mrf.mxu1  ;;  %v3481_v15 = vmul.f32 %v2418_v27, %v7487_v7  ;;  %v3482_v43 = vmul.f32 %v2907_v31, %v7493_v24  ;;  %v4539_v31 = vrot.slane %v4538_v18, 2 }
 0x2a9   : > { %v1445_v20 = vpop.f32.mrf.mxu0  ;;  %v3484_v25 = vmul.f32 %v1932_v36, %v7489_v8 }
 0x2aa   : > { %v3487_v13 = vmul.f32 %v1445_v20, %v7477_v1  ;;  %v3478_v20 = vmul.f32 %v8159_v40, %v7491_v9  ;;  %v4561_v36 = vadd.f32 %v3481_v15, %v3477_v33 }
 0x2ab   : > { %6750 = vmatmul.msk.bf16.gmra.mxu1 %vm990_vm0, %v7042_v17  ;;  %v4553_v59 = vadd.f32 %v4552_v44, %v3484_v25 }
 0x2ac   : > { %v4545_v58 = vadd.f32 %v4544_v45, %v3487_v13  ;;  %6846 = vmatmul.msk.bf16.gmra.mxu2 %vm990_vm0, %v7042_v17  ;;  %6942 = vmatmul.msk.bf16.gmra.mxu3 %vm990_vm0, %v7042_v17  ;;  %v4529_v17 = vadd.f32 %v4528_v29, %v4527_v32  ;;  %v5963_v13 = vsel %vm5933_vm6, %v4515_v34, %v8112_v23 }
 0x2ad   : > { %v4570_v10 = vadd.f32 %v3482_v43, %v3478_v20 }
 0x2ae   : > { %v4546_v12 = vrot.slane %v4545_v58, 4  ;;  %v4530_v46 = vrot.slane %v4529_v17, 2 }
 0x2af   : > { %v2421_v56 = vpop.f32.mrf.mxu2  ;;  %v2910_v55 = vpop.f32.mrf.mxu3 }
 0x2b0   : > { %v4547_v0 = vadd.f32 %v4546_v12, %v4545_v58  ;;  %v1934_v30 = vpop.f32.mrf.mxu1  ;;  %v3485_v45 = vmul.f32 %v2421_v56, %v7505_v48  ;;  %v3486_v52 = vmul.f32 %v2910_v55, %v7511_v22  ;;  %v4523_v12 = vrot.slane %v4522_v60, 1 }
 0x2b1   : > { %v1448_v41 = vpop.f32.mrf.mxu0  ;;  %v3488_v49 = vmul.f32 %v1934_v30, %v7513_v50  ;;  %v4531_v44 = vadd.f32 %v4530_v46, %v4529_v17 }
 0x2b2   : > { %v4548_v62 = vrot.slane %v4547_v0, 2  ;;  %v3491_v40 = vmul.f32 %v1448_v41, %v7428_v28  ;;  %v4562_v23 = vadd.f32 %v4561_v36, %v3485_v45  ;;  %v4571_v25 = vadd.f32 %v4570_v10, %v3486_v52 }
 0x2b3   : > { %v4554_v16 = vadd.f32 %v4553_v59, %v3488_v49  ;;  %v4524_v41 = vadd.f32 %v4523_v12, %v4522_v60  ;;  %v4532_v49 = vrot.slane %v4531_v44, 1 }
 0x2b4   : > { %v4549_v2 = vadd.f32 %v4548_v62, %v4547_v0  ;;  %6655 = vmatmul.msk.bf16.gmra.mxu0 %vm990_vm0, %v7043_v21  ;;  %v4540_v62 = vadd.f32 %v4539_v31, %v4538_v18 }
 0x2b5   : > { %v4555_v47 = vrot.slane %v4554_v16, 4  ;;  %v5970_v33 = vsel %vm5933_vm6, %v4524_v41, %v8124_v61  ;;  %v4533_v36 = vadd.f32 %v4532_v49, %v4531_v44 }
 0x2b6   : > { %v4550_v57 = vrot.slane %v4549_v2, 1  ;;  %v4541_v15 = vrot.slane %v4540_v62, 1 }
 0x2b7   : > { %v4556_v32 = vadd.f32 %v4555_v47, %v4554_v16  ;;  %v2423_v37 = vpop.f32.mrf.mxu2  ;;  %v2912_v35 = vpop.f32.mrf.mxu3 }
 0x2b8   : > { %v4551_v27 = vadd.f32 %v4550_v57, %v4549_v2  ;;  %v3489_v19 = vmul.f32 %v2423_v37, %v7523_v4  ;;  %v1937_v39 = vpop.f32.mrf.mxu1  ;;  %v3490_v29 = vmul.f32 %v2912_v35, %v7525_v14  ;;  %v7044_v2 = vld [vmem:[%s9573_s1 + $0x148] sm:$0xff]  ;;  %v4542_v10 = vadd.f32 %v4541_v15, %v4540_v62 }
 0x2b9   : > { %v1450_v58 = vpop.f32.mrf.mxu0  ;;  %v4557_v0 = vrot.slane %v4556_v32, 2 }
 0x2ba   : > { %v5964_v11 = vsel %vm5935_vm7, %v4551_v27, %v5963_v13  ;;  %v3495_v3 = vmul.f32 %v1450_v58, %v7430_v38  ;;  %v4563_v56 = vadd.f32 %v4562_v23, %v3489_v19  ;;  %v4572_v55 = vadd.f32 %v4571_v25, %v3490_v29 }
 0x2bb   : > { %6126 = vst [vmem:[%s7844_s21 + $0x20] sm:$0xff] %v5964_v11  ;;  %v4558_v5 = vadd.f32 %v4557_v0, %v4556_v32  ;;  %6751 = vmatmul.msk.bf16.gmra.mxu1 %vm990_vm0, %v7043_v21  ;;  %v3492_v27 = vmul.f32 %v1937_v39, %v7462_v26  ;;  %v5984_v12 = vsel %vm5933_vm6, %v4542_v10, %v8133_v51 }
 0x2bc   : > { %v4579_v42 = vadd.f32 %v3495_v3, %v3491_v40  ;;  %v4564_v30 = vrot.slane %v4563_v56, 4  ;;  %6847 = vmatmul.msk.bf16.gmra.mxu2 %vm990_vm0, %v7043_v21  ;;  %v4573_v59 = vrot.slane %v4572_v55, 4  ;;  %6943 = vmatmul.msk.bf16.gmra.mxu3 %vm990_vm0, %v7043_v21  ;;  %v5977_v3 = vsel %vm5933_vm6, %v4533_v36, %v8129_v63  ;;  %v7046_v36 = vld [vmem:[%s9573_s1 + $0x158] sm:$0xff] }
 0x2bd   : > { %v4559_v34 = vrot.slane %v4558_v5, 1 }
 0x2be   : > { %v4565_v17 = vadd.f32 %v4564_v30, %v4563_v56  ;;  %v4574_v57 = vadd.f32 %v4573_v59, %v4572_v55  ;;  %v7045_v30 = vld [vmem:[%s9573_s1 + $0x150] sm:$0xff] }
 0x2bf   : > { %v4560_v43 = vadd.f32 %v4559_v34, %v4558_v5  ;;  %v2426_v16 = vpop.f32.mrf.mxu2  ;;  %v2915_v45 = vpop.f32.mrf.mxu3 }
 0x2c0   : > { %v4566_v20 = vrot.slane %v4565_v17, 2  ;;  %v1939_v21 = vpop.f32.mrf.mxu1  ;;  %v4575_v52 = vrot.slane %v4574_v57, 2  ;;  %v3493_v25 = vmul.f32 %v2426_v16, %v7485_v6  ;;  %v3494_v0 = vmul.f32 %v2915_v45, %v7491_v9 }
 0x2c1   : > { %v1453_v18 = vpop.f32.mrf.mxu0  ;;  %v5971_v13 = vsel %vm5935_vm7, %v4560_v43, %v5970_v33  ;;  %v3496_v47 = vmul.f32 %v1939_v21, %v7464_v54 }
 0x2c2   : > { %v3499_v60 = vmul.f32 %v1453_v18, %v7446_v53  ;;  %6127 = vst [vmem:[%s7844_s21 + $0x28] sm:$0xff] %v5971_v13  ;;  %v4567_v46 = vadd.f32 %v4566_v20, %v4565_v17  ;;  %v4576_v58 = vadd.f32 %v4575_v52, %v4574_v57 }
 0x2c3   : > { %v4588_v11 = vadd.f32 %v3496_v47, %v3492_v27 }
 0x2c4   : > { %6656 = vmatmul.msk.bf16.gmra.mxu0 %vm990_vm0, %v7044_v2  ;;  %v4580_v31 = vadd.f32 %v4579_v42, %v3499_v60  ;;  %v4568_v61 = vrot.slane %v4567_v46, 1  ;;  %v4577_v32 = vrot.slane %v4576_v58, 1 }
 0x2c6   : > { %v4569_v37 = vadd.f32 %v4568_v61, %v4567_v46  ;;  %v4578_v23 = vadd.f32 %v4577_v32, %v4576_v58 }
 0x2c7   : > { %v2428_v19 = vpop.f32.mrf.mxu2  ;;  %v2917_v42 = vpop.f32.mrf.mxu3 }
 0x2c8   : > { %v5978_v39 = vsel %vm5935_vm7, %v4569_v37, %v5977_v3  ;;  %v3497_v29 = vmul.f32 %v2428_v19, %v7487_v7  ;;  %v1942_v44 = vpop.f32.mrf.mxu1  ;;  %v5985_v63 = vsel %vm5935_vm7, %v4578_v23, %v5984_v12  ;;  %v3498_v56 = vmul.f32 %v2917_v42, %v7493_v24 }
 0x2c9   : > { %v1455_v40 = vpop.f32.mrf.mxu0  ;;  %6128 = vst [vmem:[%s7844_s21 + $0x30] sm:$0xff] %v5978_v39  ;;  %v3500_v51 = vmul.f32 %v1942_v44, %v7489_v8 }
 0x2ca   : > { %v3503_v35 = vmul.f32 %v1455_v40, %v7477_v1  ;;  %6129 = vst [vmem:[%s7844_s21 + $0x38] sm:$0xff] %v5985_v63  ;;  %v4597_v5 = vadd.f32 %v3497_v29, %v3493_v25  ;;  %v4606_v55 = vadd.f32 %v3498_v56, %v3494_v0 }
 0x2cb   : > { %v4589_v41 = vadd.f32 %v4588_v11, %v3500_v51  ;;  %6752 = vmatmul.msk.bf16.gmra.mxu1 %vm990_vm0, %v7044_v2 }
 0x2cc   : > { %v4581_v62 = vadd.f32 %v4580_v31, %v3503_v35  ;;  %6848 = vmatmul.msk.bf16.gmra.mxu2 %vm990_vm0, %v7044_v2  ;;  %6944 = vmatmul.msk.bf16.gmra.mxu3 %vm990_vm0, %v7044_v2 }
 0x2ce   : > { %v4582_v61 = vrot.slane %v4581_v62, 4 }
 0x2cf   : > { %v2431_v59 = vpop.f32.mrf.mxu2  ;;  %v2920_v17 = vpop.f32.mrf.mxu3 }
 0x2d0   : > { %v3501_v49 = vmul.f32 %v2431_v59, %v7505_v48  ;;  %v1944_v18 = vpop.f32.mrf.mxu1  ;;  %v3502_v15 = vmul.f32 %v2920_v17, %v7511_v22  ;;  %v4583_v19 = vadd.f32 %v4582_v61, %v4581_v62 }
 0x2d1   : > { %v1458_v34 = vpop.f32.mrf.mxu0  ;;  %v3504_v43 = vmul.f32 %v1944_v18, %v7513_v50  ;;  %v7047_v18 = vld [vmem:[%s9573_s1 + $0x160] sm:$0xff] }
 0x2d2   : > { %v4598_v57 = vadd.f32 %v4597_v5, %v3501_v49  ;;  %v4607_v16 = vadd.f32 %v4606_v55, %v3502_v15  ;;  %v3507_v20 = vmul.f32 %v1458_v34, %v7428_v28  ;;  %v4584_v0 = vrot.slane %v4583_v19, 2 }
 0x2d3   : > { %v4590_v60 = vadd.f32 %v4589_v41, %v3504_v43 }
 0x2d4   : > { %6657 = vmatmul.msk.bf16.gmra.mxu0 %vm990_vm0, %v7045_v30  ;;  %v4585_v49 = vadd.f32 %v4584_v0, %v4583_v19 }
 0x2d5   : > { %v4591_v41 = vrot.slane %v4590_v60, 4 }
 0x2d7   : > { %v2433_v33 = vpop.f32.mrf.mxu2  ;;  %v2922_v13 = vpop.f32.mrf.mxu3  ;;  %v4592_v15 = vadd.f32 %v4591_v41, %v4590_v60 }
 0x2d8   : > { %v3505_v21 = vmul.f32 %v2433_v33, %v7523_v4  ;;  %v1947_v52 = vpop.f32.mrf.mxu1  ;;  %v3506_v27 = vmul.f32 %v2922_v13, %v7525_v14 }
 0x2d9   : > { %v1460_v2 = vpop.f32.mrf.mxu0  ;;  %v3508_v40 = vmul.f32 %v1947_v52, %v7462_v26 }
 0x2da   : > { %v3511_v45 = vmul.f32 %v1460_v2, %v7430_v38  ;;  %v8243_v46 = vadd.f32 %v4598_v57, %v3505_v21  ;;  %v8245_v31 = vadd.f32 %v4607_v16, %v3506_v27  ;;  %v4593_v27 = vrot.slane %v4592_v15, 2 }
 0x2db   : > { %6753 = vmatmul.msk.bf16.gmra.mxu1 %vm990_vm0, %v7045_v30 }
 0x2dc   : > { %v4615_v47 = vadd.f32 %v3511_v45, %v3507_v20  ;;  %6849 = vmatmul.msk.bf16.gmra.mxu2 %vm990_vm0, %v7045_v30  ;;  %6945 = vmatmul.msk.bf16.gmra.mxu3 %vm990_vm0, %v7045_v30  ;;  %v4586_v45 = vrot.slane %v4585_v49, 1  ;;  %v4609_v60 = vrot.slane %v8245_v31, 4 }
 0x2de   : > { %v4587_v61 = vadd.f32 %v4586_v45, %v4585_v49  ;;  %v7048_v49 = vld [vmem:[%s9573_s1 + $0x168] sm:$0xff] }
 0x2df   : > { %v2436_v58 = vpop.f32.mrf.mxu2  ;;  %v2925_v32 = vpop.f32.mrf.mxu3 }
 0x2e0   : > { %v1949_v37 = vpop.f32.mrf.mxu1  ;;  %v3509_v29 = vmul.f32 %v2436_v58, %v7485_v6  ;;  %v3510_v56 = vmul.f32 %v2925_v32, %v7491_v9 }
 0x2e1   : > { %v1463_v10 = vpop.f32.mrf.mxu0  ;;  %v3512_v3 = vmul.f32 %v1949_v37, %v7464_v54 }
 0x2e2   : > { %v3515_v11 = vmul.f32 %v1463_v10, %v7446_v53 }
 0x2e3   : > { %v4624_v23 = vadd.f32 %v3512_v3, %v3508_v40  ;;  %v4594_v40 = vadd.f32 %v4593_v27, %v4592_v15 }
 0x2e4   : > { %v4616_v12 = vadd.f32 %v4615_v47, %v3515_v11  ;;  %6658 = vmatmul.msk.bf16.gmra.mxu0 %vm990_vm0, %v7046_v36  ;;  %v4600_v47 = vrot.slane %v8243_v46, 4 }
 0x2e6   : > { %v4601_v3 = vadd.f32 %v4600_v47, %v8243_v46 }
 0x2e7   : > { %v2438_v39 = vpop.f32.mrf.mxu2  ;;  %v2927_v44 = vpop.f32.mrf.mxu3 }
 0x2e8   : > { %v3513_v42 = vmul.f32 %v2438_v39, %v7487_v7  ;;  %v1952_v63 = vpop.f32.mrf.mxu1  ;;  %v3514_v51 = vmul.f32 %v2927_v44, %v7493_v24 }
 0x2e9   : > { %v1465_v35 = vpop.f32.mrf.mxu0  ;;  %v3516_v5 = vmul.f32 %v1952_v63, %v7489_v8 }
 0x2ea   : > { %v3519_v25 = vmul.f32 %v1465_v35, %v7477_v1  ;;  %v4633_v62 = vadd.f32 %v3513_v42, %v3509_v29  ;;  %v4642_v30 = vadd.f32 %v3514_v51, %v3510_v56  ;;  %v4595_v51 = vrot.slane %v4594_v40, 1 }
 0x2eb   : > { %v4625_v34 = vadd.f32 %v4624_v23, %v3516_v5  ;;  %6754 = vmatmul.msk.bf16.gmra.mxu1 %vm990_vm0, %v7046_v36 }
 0x2ec   : > { %v4617_v55 = vadd.f32 %v4616_v12, %v3519_v25  ;;  %6850 = vmatmul.msk.bf16.gmra.mxu2 %vm990_vm0, %v7046_v36  ;;  %6946 = vmatmul.msk.bf16.gmra.mxu3 %vm990_vm0, %v7046_v36  ;;  %v4610_v12 = vadd.f32 %v4609_v60, %v8245_v31  ;;  %v4602_v31 = vrot.slane %v4601_v3, 2 }
 0x2ee   : > { %v4618_v59 = vrot.slane %v4617_v55, 4  ;;  %v4603_v15 = vadd.f32 %v4602_v31, %v4601_v3 }
 0x2ef   : > { %v2441_v57 = vpop.f32.mrf.mxu2  ;;  %v2930_v33 = vpop.f32.mrf.mxu3 }
 0x2f0   : > { %v4619_v17 = vadd.f32 %v4618_v59, %v4617_v55  ;;  %v3517_v2 = vmul.f32 %v2441_v57, %v7505_v48  ;;  %v1954_v20 = vpop.f32.mrf.mxu1  ;;  %v3518_v21 = vmul.f32 %v2930_v33, %v7511_v22  ;;  %v4611_v55 = vrot.slane %v4610_v12, 2 }
 0x2f1   : > { %v1468_v43 = vpop.f32.mrf.mxu0  ;;  %v3520_v52 = vmul.f32 %v1954_v20, %v7513_v50 }
 0x2f2   : > { %v4620_v16 = vrot.slane %v4619_v17, 2  ;;  %v4634_v36 = vadd.f32 %v4633_v62, %v3517_v2  ;;  %v4643_v10 = vadd.f32 %v4642_v30, %v3518_v21  ;;  %v3523_v25 = vmul.f32 %v1468_v43, %v7428_v28 }
 0x2f3   : > { %v4626_v11 = vadd.f32 %v4625_v34, %v3520_v52 }
 0x2f4   : > { %v4621_v13 = vadd.f32 %v4620_v16, %v4619_v17  ;;  %6659 = vmatmul.msk.bf16.gmra.mxu0 %vm990_vm0, %v7047_v18  ;;  %v4596_v17 = vadd.f32 %v4595_v51, %v4594_v40  ;;  %v4612_v16 = vadd.f32 %v4611_v55, %v4610_v12 }
 0x2f5   : > { %v4627_v37 = vrot.slane %v4626_v11, 4 }
 0x2f6   : > { %v4622_v58 = vrot.slane %v4621_v13, 1 }
 0x2f7   : > { %v4628_v35 = vadd.f32 %v4627_v37, %v4626_v11  ;;  %v2443_v39 = vpop.f32.mrf.mxu2  ;;  %v2932_v42 = vpop.f32.mrf.mxu3  ;;  %v4613_v11 = vrot.slane %v4612_v16, 1 }
 0x2f8   : > { %v4623_v32 = vadd.f32 %v4622_v58, %v4621_v13  ;;  %v3521_v29 = vmul.f32 %v2443_v39, %v7523_v4  ;;  %v1957_v44 = vpop.f32.mrf.mxu1  ;;  %v3522_v56 = vmul.f32 %v2932_v42, %v7525_v14 }
 0x2f9   : > { %v1470_v23 = vpop.f32.mrf.mxu0  ;;  %v4629_v63 = vrot.slane %v4628_v35, 2  ;;  %v3524_v47 = vmul.f32 %v1957_v44, %v7462_v26 }
 0x2fa   : > { %v8278_v19 = vsel %vm5923_vm1, %v4623_v32, %v4587_v61  ;;  %v3527_v0 = vmul.f32 %v1470_v23, %v7430_v38  ;;  %v4635_v5 = vadd.f32 %v4634_v36, %v3521_v29  ;;  %v4644_v62 = vadd.f32 %v4643_v10, %v3522_v56 }
 0x2fb   : > { %v4630_v41 = vadd.f32 %v4629_v63, %v4628_v35  ;;  %6755 = vmatmul.msk.bf16.gmra.mxu1 %vm990_vm0, %v7047_v18  ;;  %v4604_v36 = vrot.slane %v4603_v15, 1  ;;  %v4614_v35 = vadd.f32 %v4613_v11, %v4612_v16 }
 0x2fc   : > { %v4651_v46 = vadd.f32 %v3527_v0, %v3523_v25  ;;  %v4636_v30 = vrot.slane %v4635_v5, 4  ;;  %6851 = vmatmul.msk.bf16.gmra.mxu2 %vm990_vm0, %v7047_v18  ;;  %v4645_v59 = vrot.slane %v4644_v62, 4  ;;  %6947 = vmatmul.msk.bf16.gmra.mxu3 %vm990_vm0, %v7047_v18 }
 0x2fd   : > { %v4631_v34 = vrot.slane %v4630_v41, 1  ;;  %v4605_v3 = vadd.f32 %v4604_v36, %v4603_v15 }
 0x2fe   : > { %v4637_v43 = vadd.f32 %v4636_v30, %v4635_v5  ;;  %v4646_v33 = vadd.f32 %v4645_v59, %v4644_v62 }
 0x2ff   : > { %v4632_v2 = vadd.f32 %v4631_v34, %v4630_v41  ;;  %v2446_v20 = vpop.f32.mrf.mxu2  ;;  %v2935_v13 = vpop.f32.mrf.mxu3 }
 0x300   : > { %v4638_v21 = vrot.slane %v4637_v43, 2  ;;  %v1959_v52 = vpop.f32.mrf.mxu1  ;;  %v4647_v18 = vrot.slane %v4646_v33, 2  ;;  %v3525_v42 = vmul.f32 %v2446_v20, %v7485_v6  ;;  %v3526_v44 = vmul.f32 %v2935_v13, %v7491_v9 }
 0x301   : > { %v1473_v57 = vpop.f32.mrf.mxu0  ;;  %v8292_v27 = vsel %vm5923_vm1, %v4632_v2, %v4596_v17  ;;  %v3528_v60 = vmul.f32 %v1959_v52, %v7464_v54  ;;  %v7049_v17 = vld [vmem:[%s9573_s1 + $0x170] sm:$0xff] }
 0x302   : > { %v3531_v45 = vmul.f32 %v1473_v57, %v7446_v53  ;;  %v4639_v10 = vadd.f32 %v4638_v21, %v4637_v43  ;;  %v4648_v61 = vadd.f32 %v4647_v18, %v4646_v33 }
 0x303   : > { %v4660_v32 = vadd.f32 %v3528_v60, %v3524_v47 }
 0x304   : > { %6660 = vmatmul.msk.bf16.gmra.mxu0 %vm990_vm0, %v7048_v49  ;;  %v4652_v58 = vadd.f32 %v4651_v46, %v3531_v45  ;;  %v4640_v37 = vrot.slane %v4639_v10, 1  ;;  %v4649_v40 = vrot.slane %v4648_v61, 1 }
 0x306   : > { %v4641_v12 = vadd.f32 %v4640_v37, %v4639_v10  ;;  %v4650_v39 = vadd.f32 %v4649_v40, %v4648_v61 }
 0x307   : > { %v2448_v25 = vpop.f32.mrf.mxu2  ;;  %v2937_v56 = vpop.f32.mrf.mxu3 }
 0x308   : > { %v8299_v29 = vsel %vm5923_vm1, %v4641_v12, %v4605_v3  ;;  %v3529_v63 = vmul.f32 %v2448_v25, %v7487_v7  ;;  %v1962_v46 = vpop.f32.mrf.mxu1  ;;  %v8305_v51 = vsel %vm5923_vm1, %v4650_v39, %v4614_v35  ;;  %v3530_v31 = vmul.f32 %v2937_v56, %v7493_v24 }
 0x309   : > { %v1475_v23 = vpop.f32.mrf.mxu0  ;;  %v3532_v5 = vmul.f32 %v1962_v46, %v7489_v8 }
 0x30a   : > { %v3535_v0 = vmul.f32 %v1475_v23, %v7477_v1  ;;  %v4669_v41 = vadd.f32 %v3529_v63, %v3525_v42  ;;  %v4678_v62 = vadd.f32 %v3530_v31, %v3526_v44  ;;  %v7050_v63 = vld [vmem:[%s9573_s1 + $0x178] sm:$0xff] }
 0x30b   : > { %v4661_v30 = vadd.f32 %v4660_v32, %v3532_v5  ;;  %6756 = vmatmul.msk.bf16.gmra.mxu1 %vm990_vm0, %v7048_v49 }
 0x30c   : > { %v4653_v55 = vadd.f32 %v4652_v58, %v3535_v0  ;;  %6852 = vmatmul.msk.bf16.gmra.mxu2 %vm990_vm0, %v7048_v49  ;;  %6948 = vmatmul.msk.bf16.gmra.mxu3 %vm990_vm0, %v7048_v49 }
 0x30e   : > { %v4654_v34 = vrot.slane %v4653_v55, 4 }
 0x30f   : > { %v2451_v43 = vpop.f32.mrf.mxu2  ;;  %v2940_v2 = vpop.f32.mrf.mxu3 }
 0x310   : > { %v4655_v59 = vadd.f32 %v4654_v34, %v4653_v55  ;;  %v3533_v16 = vmul.f32 %v2451_v43, %v7505_v48  ;;  %v1964_v33 = vpop.f32.mrf.mxu1  ;;  %v3534_v20 = vmul.f32 %v2940_v2, %v7511_v22 }
 0x311   : > { %v1478_v15 = vpop.f32.mrf.mxu0  ;;  %v3536_v21 = vmul.f32 %v1964_v33, %v7513_v50 }
 0x312   : > { %v4656_v57 = vrot.slane %v4655_v59, 2  ;;  %v4670_v49 = vadd.f32 %v4669_v41, %v3533_v16  ;;  %v4679_v13 = vadd.f32 %v4678_v62, %v3534_v20  ;;  %v3539_v61 = vmul.f32 %v1478_v15, %v7428_v28 }
 0x313   : > { %v4662_v18 = vadd.f32 %v4661_v30, %v3536_v21 }
 0x314   : > { %v4657_v45 = vadd.f32 %v4656_v57, %v4655_v59  ;;  %6661 = vmatmul.msk.bf16.gmra.mxu0 %vm990_vm0, %v7049_v17 }
 0x315   : > { %v4663_v60 = vrot.slane %v4662_v18, 4 }
 0x316   : > { %v4658_v52 = vrot.slane %v4657_v45, 1 }
 0x317   : > { %v4664_v58 = vadd.f32 %v4663_v60, %v4662_v18  ;;  %v2453_v11 = vpop.f32.mrf.mxu2  ;;  %v2942_v40 = vpop.f32.mrf.mxu3 }
 0x318   : > { %v4659_v47 = vadd.f32 %v4658_v52, %v4657_v45  ;;  %v3537_v37 = vmul.f32 %v2453_v11, %v7523_v4  ;;  %v1967_v3 = vpop.f32.mrf.mxu1  ;;  %v3538_v23 = vmul.f32 %v2942_v40, %v7525_v14 }
 0x319   : > { %v1480_v36 = vpop.f32.mrf.mxu0  ;;  %v4665_v12 = vrot.slane %v4664_v58, 2 }
 0x31a   : > { %v8321_v10 = vsel %vm5925_vm2, %v4659_v47, %v8278_v19  ;;  %v3543_v32 = vmul.f32 %v1480_v36, %v7430_v38  ;;  %v4671_v39 = vadd.f32 %v4670_v49, %v3537_v37  ;;  %v4680_v0 = vadd.f32 %v4679_v13, %v3538_v23 }
 0x31b   : > { %v4666_v25 = vadd.f32 %v4665_v12, %v4664_v58  ;;  %6757 = vmatmul.msk.bf16.gmra.mxu1 %vm990_vm0, %v7049_v17 }
 0x31c   : > { %v4687_v35 = vadd.f32 %v3543_v32, %v3539_v61  ;;  %v4672_v19 = vrot.slane %v4671_v39, 4  ;;  %6853 = vmatmul.msk.bf16.gmra.mxu2 %vm990_vm0, %v7049_v17  ;;  %v4681_v44 = vrot.slane %v4680_v0, 4  ;;  %6949 = vmatmul.msk.bf16.gmra.mxu3 %vm990_vm0, %v7049_v17  ;;  %v3540_v17 = vmul.f32 %v1967_v3, %v7462_v26 }
 0x31d   : > { %v4667_v42 = vrot.slane %v4666_v25, 1 }
 0x31e   : > { %v4673_v56 = vadd.f32 %v4672_v19, %v4671_v39  ;;  %v4682_v5 = vadd.f32 %v4681_v44, %v4680_v0 }
 0x31f   : > { %v4668_v31 = vadd.f32 %v4667_v42, %v4666_v25  ;;  %v2456_v55 = vpop.f32.mrf.mxu2  ;;  %v2945_v30 = vpop.f32.mrf.mxu3 }
 0x320   : > { %v4674_v62 = vrot.slane %v4673_v56, 2  ;;  %v1969_v34 = vpop.f32.mrf.mxu1  ;;  %v4683_v15 = vrot.slane %v4682_v5, 2  ;;  %v3541_v47 = vmul.f32 %v2456_v55, %v7485_v6  ;;  %v3542_v60 = vmul.f32 %v2945_v30, %v7491_v9 }
 0x321   : > { %v1483_v46 = vpop.f32.mrf.mxu0  ;;  %v8336_v59 = vsel %vm5925_vm2, %v4668_v31, %v8292_v27  ;;  %v3544_v43 = vmul.f32 %v1969_v34, %v7464_v54 }
 0x322   : > { %v3547_v41 = vmul.f32 %v1483_v46, %v7446_v53  ;;  %v4675_v57 = vadd.f32 %v4674_v62, %v4673_v56  ;;  %v4684_v2 = vadd.f32 %v4683_v15, %v4682_v5 }
 0x323   : > { %v4696_v33 = vadd.f32 %v3544_v43, %v3540_v17 }
 0x324   : > { %6662 = vmatmul.msk.bf16.gmra.mxu0 %vm990_vm0, %v7050_v63  ;;  %v4688_v16 = vadd.f32 %v4687_v35, %v3547_v41  ;;  %v4676_v20 = vrot.slane %v4675_v57, 1  ;;  %v4685_v45 = vrot.slane %v4684_v2, 1 }
 0x326   : > { %v4677_v21 = vadd.f32 %v4676_v20, %v4675_v57  ;;  %v4686_v13 = vadd.f32 %v4685_v45, %v4684_v2 }
 0x327   : > { %v2458_v52 = vpop.f32.mrf.mxu2  ;;  %v2947_v58 = vpop.f32.mrf.mxu3 }
 0x328   : > { %v8344_v18 = vsel %vm5925_vm2, %v4677_v21, %v8299_v29  ;;  %v3545_v36 = vmul.f32 %v2458_v52, %v7487_v7  ;;  %v1972_v11 = vpop.f32.mrf.mxu1  ;;  %v8351_v61 = vsel %vm5925_vm2, %v4686_v13, %v8305_v51  ;;  %v3546_v32 = vmul.f32 %v2947_v58, %v7493_v24  ;;  %v7051_v51 = vld [vmem:[%s9573_s1 + $0x180] sm:$0xff] }
 0x329   : > { %v1485_v49 = vpop.f32.mrf.mxu0  ;;  %v3548_v37 = vmul.f32 %v1972_v11, %v7489_v8 }
 0x32a   : > { %v3551_v27 = vmul.f32 %v1485_v49, %v7477_v1  ;;  %v4705_v3 = vadd.f32 %v3545_v36, %v3541_v47  ;;  %v4714_v29 = vadd.f32 %v3546_v32, %v3542_v60  ;;  %v7052_v36 = vld [vmem:[%s9573_s1 + $0x188] sm:$0xff] }
 0x32b   : > { %v4697_v12 = vadd.f32 %v4696_v33, %v3548_v37  ;;  %6758 = vmatmul.msk.bf16.gmra.mxu1 %vm990_vm0, %v7050_v63 }
 0x32c   : > { %v4689_v40 = vadd.f32 %v4688_v16, %v3551_v27  ;;  %6854 = vmatmul.msk.bf16.gmra.mxu2 %vm990_vm0, %v7050_v63  ;;  %6950 = vmatmul.msk.bf16.gmra.mxu3 %vm990_vm0, %v7050_v63 }
 0x32e   : > { %v4690_v23 = vrot.slane %v4689_v40, 4 }
 0x32f   : > { %v2461_v25 = vpop.f32.mrf.mxu2  ;;  %v2950_v42 = vpop.f32.mrf.mxu3 }
 0x330   : > { %v4691_v35 = vadd.f32 %v4690_v23, %v4689_v40  ;;  %v3549_v19 = vmul.f32 %v2461_v25, %v7505_v48  ;;  %v1974_v44 = vpop.f32.mrf.mxu1  ;;  %v3550_v56 = vmul.f32 %v2950_v42, %v7511_v22 }
 0x331   : > { %v1488_v39 = vpop.f32.mrf.mxu0  ;;  %v3552_v31 = vmul.f32 %v1974_v44, %v7513_v50 }
 0x332   : > { %v4692_v0 = vrot.slane %v4691_v35, 2  ;;  %v4706_v63 = vadd.f32 %v4705_v3, %v3549_v19  ;;  %v4715_v5 = vadd.f32 %v4714_v29, %v3550_v56  ;;  %v3555_v57 = vmul.f32 %v1488_v39, %v7428_v28 }
 0x333   : > { %v4698_v41 = vadd.f32 %v4697_v12, %v3552_v31 }
 0x334   : > { %v4693_v46 = vadd.f32 %v4692_v0, %v4691_v35  ;;  %6663 = vmatmul.msk.bf16.gmra.mxu0 %vm990_vm0, %v7051_v51 }
 0x335   : > { %v4699_v30 = vrot.slane %v4698_v41, 4 }
 0x336   : > { %v4694_v55 = vrot.slane %v4693_v46, 1 }
 0x337   : > { %v4700_v17 = vadd.f32 %v4699_v30, %v4698_v41  ;;  %v2463_v43 = vpop.f32.mrf.mxu2  ;;  %v2952_v33 = vpop.f32.mrf.mxu3 }
 0x338   : > { %v4695_v62 = vadd.f32 %v4694_v55, %v4693_v46  ;;  %v3553_v2 = vmul.f32 %v2463_v43, %v7523_v4  ;;  %v1977_v20 = vpop.f32.mrf.mxu1  ;;  %v3554_v21 = vmul.f32 %v2952_v33, %v7525_v14 }
 0x339   : > { %v1490_v34 = vpop.f32.mrf.mxu0  ;;  %v4701_v45 = vrot.slane %v4700_v17, 2 }
 0x33a   : > { %v8367_v15 = vsel %vm5927_vm3, %v4695_v62, %v8321_v10  ;;  %v3559_v16 = vmul.f32 %v1490_v34, %v7430_v38  ;;  %v4707_v13 = vadd.f32 %v4706_v63, %v3553_v2  ;;  %v4716_v27 = vadd.f32 %v4715_v5, %v3554_v21 }
 0x33b   : > { %v4702_v52 = vadd.f32 %v4701_v45, %v4700_v17  ;;  %6759 = vmatmul.msk.bf16.gmra.mxu1 %vm990_vm0, %v7051_v51 }
 0x33c   : > { %v4723_v49 = vadd.f32 %v3559_v16, %v3555_v57  ;;  %v4708_v10 = vrot.slane %v4707_v13, 4  ;;  %6855 = vmatmul.msk.bf16.gmra.mxu2 %vm990_vm0, %v7051_v51  ;;  %v4717_v60 = vrot.slane %v4716_v27, 4  ;;  %6951 = vmatmul.msk.bf16.gmra.mxu3 %vm990_vm0, %v7051_v51  ;;  %v3556_v51 = vmul.f32 %v1977_v20, %v7462_v26 }
 0x33d   : > { %v4703_v47 = vrot.slane %v4702_v52, 1 }
 0x33e   : > { %v4709_v58 = vadd.f32 %v4708_v10, %v4707_v13  ;;  %v4718_v37 = vadd.f32 %v4717_v60, %v4716_v27 }
 0x33f   : > { %v4704_v32 = vadd.f32 %v4703_v47, %v4702_v52  ;;  %v2466_v40 = vpop.f32.mrf.mxu2  ;;  %v2955_v12 = vpop.f32.mrf.mxu3 }
 0x340   : > { %v4710_v29 = vrot.slane %v4709_v58, 2  ;;  %v1979_v23 = vpop.f32.mrf.mxu1  ;;  %v4719_v39 = vrot.slane %v4718_v37, 2  ;;  %v3557_v62 = vmul.f32 %v2466_v40, %v7485_v6  ;;  %v3558_v30 = vmul.f32 %v2955_v12, %v7491_v9 }
 0x341   : > { %v1493_v11 = vpop.f32.mrf.mxu0  ;;  %v8382_v35 = vsel %vm5927_vm3, %v4704_v32, %v8336_v59  ;;  %v3560_v25 = vmul.f32 %v1979_v23, %v7464_v54 }
 0x342   : > { %v3563_v3 = vmul.f32 %v1493_v11, %v7446_v53  ;;  %v4711_v0 = vadd.f32 %v4710_v29, %v4709_v58  ;;  %v4720_v42 = vadd.f32 %v4719_v39, %v4718_v37 }
 0x343   : > { %v4732_v44 = vadd.f32 %v3560_v25, %v3556_v51 }
 0x344   : > { %6664 = vmatmul.msk.bf16.gmra.mxu0 %vm990_vm0, %v7052_v36  ;;  %v4724_v19 = vadd.f32 %v4723_v49, %v3563_v3  ;;  %v4712_v56 = vrot.slane %v4711_v0, 1  ;;  %v4721_v46 = vrot.slane %v4720_v42, 1 }
 0x346   : > { %v4713_v31 = vadd.f32 %v4712_v56, %v4711_v0  ;;  %v4722_v5 = vadd.f32 %v4721_v46, %v4720_v42 }
 0x347   : > { %v2468_v55 = vpop.f32.mrf.mxu2  ;;  %v2957_v17 = vpop.f32.mrf.mxu3 }
 0x348   : > { %v8390_v41 = vsel %vm5927_vm3, %v4713_v31, %v8344_v18  ;;  %v3561_v34 = vmul.f32 %v2468_v55, %v7487_v7  ;;  %v1982_v43 = vpop.f32.mrf.mxu1  ;;  %v8397_v57 = vsel %vm5927_vm3, %v4722_v5, %v8351_v61  ;;  %v3562_v16 = vmul.f32 %v2957_v17, %v7493_v24  ;;  %v7053_v61 = vld [vmem:[%s9573_s1 + $0x190] sm:$0xff] }
 0x349   : > { %v1495_v63 = vpop.f32.mrf.mxu0  ;;  %v3564_v2 = vmul.f32 %v1982_v43, %v7489_v8 }
 0x34a   : > { %v3567_v59 = vmul.f32 %v1495_v63, %v7477_v1  ;;  %v4741_v20 = vadd.f32 %v3561_v34, %v3557_v62  ;;  %v4750_v18 = vadd.f32 %v3562_v16, %v3558_v30  ;;  %v7054_v34 = vld [vmem:[%s9573_s1 + $0x198] sm:$0xff] }
 0x34b   : > { %v4733_v45 = vadd.f32 %v4732_v44, %v3564_v2  ;;  %6760 = vmatmul.msk.bf16.gmra.mxu1 %vm990_vm0, %v7052_v36 }
 0x34c   : > { %v4725_v33 = vadd.f32 %v4724_v19, %v3567_v59  ;;  %6856 = vmatmul.msk.bf16.gmra.mxu2 %vm990_vm0, %v7052_v36  ;;  %6952 = vmatmul.msk.bf16.gmra.mxu3 %vm990_vm0, %v7052_v36 }
 0x34e   : > { %v4726_v21 = vrot.slane %v4725_v33, 4 }
 0x34f   : > { %v2471_v52 = vpop.f32.mrf.mxu2  ;;  %v2960_v47 = vpop.f32.mrf.mxu3 }
 0x350   : > { %v4727_v49 = vadd.f32 %v4726_v21, %v4725_v33  ;;  %v3565_v10 = vmul.f32 %v2471_v52, %v7505_v48  ;;  %v1984_v60 = vpop.f32.mrf.mxu1  ;;  %v3566_v58 = vmul.f32 %v2960_v47, %v7511_v22 }
 0x351   : > { %v1498_v13 = vpop.f32.mrf.mxu0  ;;  %v3568_v32 = vmul.f32 %v1984_v60, %v7513_v50 }
 0x352   : > { %v4728_v27 = vrot.slane %v4727_v49, 2  ;;  %v4742_v36 = vadd.f32 %v4741_v20, %v3565_v10  ;;  %v4751_v37 = vadd.f32 %v4750_v18, %v3566_v58  ;;  %v3571_v0 = vmul.f32 %v1498_v13, %v7428_v28 }
 0x353   : > { %v4734_v3 = vadd.f32 %v4733_v45, %v3568_v32 }
 0x354   : > { %v4729_v11 = vadd.f32 %v4728_v27, %v4727_v49  ;;  %6665 = vmatmul.msk.bf16.gmra.mxu0 %vm990_vm0, %v7053_v61 }
 0x355   : > { %v4735_v12 = vrot.slane %v4734_v3, 4 }
 0x356   : > { %v4730_v40 = vrot.slane %v4729_v11, 1 }
 0x357   : > { %v4736_v51 = vadd.f32 %v4735_v12, %v4734_v3  ;;  %v2473_v25 = vpop.f32.mrf.mxu2  ;;  %v2962_v44 = vpop.f32.mrf.mxu3 }
 0x358   : > { %v4731_v29 = vadd.f32 %v4730_v40, %v4729_v11  ;;  %v3569_v42 = vmul.f32 %v2473_v25, %v7523_v4  ;;  %v1987_v56 = vpop.f32.mrf.mxu1  ;;  %v3570_v31 = vmul.f32 %v2962_v44, %v7525_v14 }
 0x359   : > { %v1500_v23 = vpop.f32.mrf.mxu0  ;;  %v4737_v46 = vrot.slane %v4736_v51, 2 }
 0x35a   : > { %v8413_v39 = vsel %vm5929_vm4, %v4731_v29, %v8367_v15  ;;  %v3575_v19 = vmul.f32 %v1500_v23, %v7430_v38  ;;  %v4743_v5 = vadd.f32 %v4742_v36, %v3569_v42  ;;  %v4752_v59 = vadd.f32 %v4751_v37, %v3570_v31 }
 0x35b   : > { %v4738_v55 = vadd.f32 %v4737_v46, %v4736_v51  ;;  %6761 = vmatmul.msk.bf16.gmra.mxu1 %vm990_vm0, %v7053_v61 }
 0x35c   : > { %v4759_v63 = vadd.f32 %v3575_v19, %v3571_v0  ;;  %v4744_v15 = vrot.slane %v4743_v5, 4  ;;  %6857 = vmatmul.msk.bf16.gmra.mxu2 %vm990_vm0, %v7053_v61  ;;  %v4753_v30 = vrot.slane %v4752_v59, 4  ;;  %6953 = vmatmul.msk.bf16.gmra.mxu3 %vm990_vm0, %v7053_v61  ;;  %v3572_v61 = vmul.f32 %v1987_v56, %v7462_v26 }
 0x35d   : > { %v4739_v62 = vrot.slane %v4738_v55, 1 }
 0x35e   : > { %v4745_v17 = vadd.f32 %v4744_v15, %v4743_v5  ;;  %v4754_v2 = vadd.f32 %v4753_v30, %v4752_v59 }
 0x35f   : > { %v4740_v16 = vadd.f32 %v4739_v62, %v4738_v55  ;;  %v2476_v33 = vpop.f32.mrf.mxu2  ;;  %v2965_v45 = vpop.f32.mrf.mxu3 }
 0x360   : > { %v4746_v18 = vrot.slane %v4745_v17, 2  ;;  %v1989_v21 = vpop.f32.mrf.mxu1  ;;  %v4755_v13 = vrot.slane %v4754_v2, 2  ;;  %v3573_v29 = vmul.f32 %v2476_v33, %v7485_v6  ;;  %v3574_v12 = vmul.f32 %v2965_v45, %v7491_v9 }
 0x361   : > { %v1503_v43 = vpop.f32.mrf.mxu0  ;;  %v8428_v49 = vsel %vm5929_vm4, %v4740_v16, %v8382_v35  ;;  %v3576_v52 = vmul.f32 %v1989_v21, %v7464_v54 }
 0x362   : > { %v3579_v20 = vmul.f32 %v1503_v43, %v7446_v53  ;;  %v4747_v27 = vadd.f32 %v4746_v18, %v4745_v17  ;;  %v4756_v47 = vadd.f32 %v4755_v13, %v4754_v2 }
 0x363   : > { %v4768_v60 = vadd.f32 %v3576_v52, %v3572_v61 }
 0x364   : > { %6666 = vmatmul.msk.bf16.gmra.mxu0 %vm990_vm0, %v7054_v34  ;;  %v4760_v10 = vadd.f32 %v4759_v63, %v3579_v20  ;;  %v4748_v58 = vrot.slane %v4747_v27, 1  ;;  %v4757_v11 = vrot.slane %v4756_v47, 1 }
 0x366   : > { %v4749_v32 = vadd.f32 %v4748_v58, %v4747_v27  ;;  %v4758_v37 = vadd.f32 %v4757_v11, %v4756_v47 }
 0x367   : > { %v2478_v40 = vpop.f32.mrf.mxu2  ;;  %v2967_v51 = vpop.f32.mrf.mxu3 }
 0x368   : > { %v8436_v3 = vsel %vm5929_vm4, %v4749_v32, %v8390_v41  ;;  %v3577_v23 = vmul.f32 %v2478_v40, %v7487_v7  ;;  %v1992_v25 = vpop.f32.mrf.mxu1  ;;  %v8443_v0 = vsel %vm5929_vm4, %v4758_v37, %v8397_v57  ;;  %v3578_v19 = vmul.f32 %v2967_v51, %v7493_v24  ;;  %v7055_v57 = vld [vmem:[%s9573_s1 + $0x1a0] sm:$0xff] }
 0x369   : > { %v1505_v36 = vpop.f32.mrf.mxu0  ;;  %v3580_v42 = vmul.f32 %v1992_v25, %v7489_v8 }
 0x36a   : > { %v3583_v35 = vmul.f32 %v1505_v36, %v7477_v1  ;;  %v4777_v56 = vadd.f32 %v3577_v23, %v3573_v29  ;;  %v4786_v41 = vadd.f32 %v3578_v19, %v3574_v12 }
 0x36b   : > { %v4769_v46 = vadd.f32 %v4768_v60, %v3580_v42  ;;  %6762 = vmatmul.msk.bf16.gmra.mxu1 %vm990_vm0, %v7054_v34 }
 0x36c   : > { %v4761_v44 = vadd.f32 %v4760_v10, %v3583_v35  ;;  %6858 = vmatmul.msk.bf16.gmra.mxu2 %vm990_vm0, %v7054_v34  ;;  %6954 = vmatmul.msk.bf16.gmra.mxu3 %vm990_vm0, %v7054_v34  ;;  %v7056_v35 = vld [vmem:[%s9573_s1 + $0x1a8] sm:$0xff] }
 0x36e   : > { %v4762_v31 = vrot.slane %v4761_v44, 4 }
 0x36f   : > { %v2481_v55 = vpop.f32.mrf.mxu2  ;;  %v2970_v62 = vpop.f32.mrf.mxu3 }
 0x370   : > { %v4763_v63 = vadd.f32 %v4762_v31, %v4761_v44  ;;  %v3581_v15 = vmul.f32 %v2481_v55, %v7505_v48  ;;  %v1994_v30 = vpop.f32.mrf.mxu1  ;;  %v3582_v17 = vmul.f32 %v2970_v62, %v7511_v22 }
 0x371   : > { %v8453_v5 = vpop.f32.mrf.mxu0  ;;  %v3584_v16 = vmul.f32 %v1994_v30, %v7513_v50 }
 0x372   : > { %v4764_v59 = vrot.slane %v4763_v63, 2  ;;  %v4778_v34 = vadd.f32 %v4777_v56, %v3581_v15  ;;  %v4787_v2 = vadd.f32 %v4786_v41, %v3582_v17 }
 0x373   : > { %v4770_v20 = vadd.f32 %v4769_v46, %v3584_v16  ;;  %v7057_v16 = vld [vmem:[%s9573_s1 + $0x1b0] sm:$0xff] }
 0x374   : > { %v4765_v43 = vadd.f32 %v4764_v59, %v4763_v63  ;;  %6667 = vmatmul.msk.bf16.gmra.mxu0 %vm990_vm0, %v7055_v57 }
 0x375   : > { %v4771_v45 = vrot.slane %v4770_v20, 4 }
 0x376   : > { %v4766_v33 = vrot.slane %v4765_v43, 1 }
 0x377   : > { %v4772_v61 = vadd.f32 %v4771_v45, %v4770_v20  ;;  %v2483_v52 = vpop.f32.mrf.mxu2  ;;  %v2972_v10 = vpop.f32.mrf.mxu3 }
 0x378   : > { %v4767_v18 = vadd.f32 %v4766_v33, %v4765_v43  ;;  %v3585_v27 = vmul.f32 %v2483_v52, %v7523_v4  ;;  %v1997_v47 = vpop.f32.mrf.mxu1  ;;  %v3586_v58 = vmul.f32 %v2972_v10, %v7525_v14 }
 0x379   : > { %v1510_v21 = vpop.f32.mrf.mxu0  ;;  %v4773_v60 = vrot.slane %v4772_v61, 2 }
 0x37a   : > { %v8461_v13 = vsel %vm5931_vm5, %v4767_v18, %v8413_v39  ;;  %v4779_v11 = vadd.f32 %v4778_v34, %v3585_v27  ;;  %v4788_v36 = vadd.f32 %v4787_v2, %v3586_v58  ;;  %v3591_v20 = vmul.f32 %v1510_v21, %v7430_v38 }
 0x37b   : > { %v4774_v32 = vadd.f32 %v4773_v60, %v4772_v61  ;;  %6763 = vmatmul.msk.bf16.gmra.mxu1 %vm990_vm0, %v7055_v57 }
 0x37c   : > { %v4780_v37 = vrot.slane %v4779_v11, 4  ;;  %6859 = vmatmul.msk.bf16.gmra.mxu2 %vm990_vm0, %v7055_v57  ;;  %v4789_v39 = vrot.slane %v4788_v36, 4  ;;  %6955 = vmatmul.msk.bf16.gmra.mxu3 %vm990_vm0, %v7055_v57 }
 0x37d   : > { %v4775_v40 = vrot.slane %v4774_v32, 1 }
 0x37e   : > { %v4781_v29 = vadd.f32 %v4780_v37, %v4779_v11  ;;  %v4790_v51 = vadd.f32 %v4789_v39, %v4788_v36  ;;  %v3588_v36 = vmul.f32 %v1997_v47, %v7462_v26 }
 0x37f   : > { %v4776_v23 = vadd.f32 %v4775_v40, %v4774_v32  ;;  %v2486_v25 = vpop.f32.mrf.mxu2  ;;  %v2975_v42 = vpop.f32.mrf.mxu3 }
 0x380   : > { %v4782_v19 = vrot.slane %v4781_v29, 2  ;;  %v1999_v44 = vpop.f32.mrf.mxu1  ;;  %v4791_v41 = vrot.slane %v4790_v51, 2 }
 0x381   : > { %v1513_v12 = vpop.f32.mrf.mxu0  ;;  %v8473_v56 = vsel %vm5931_vm5, %v4776_v23, %v8428_v49  ;;  %v3592_v21 = vmul.f32 %v1999_v44, %v7464_v54 }
 0x382   : > { %v4783_v46 = vadd.f32 %v4782_v19, %v4781_v29  ;;  %v4792_v31 = vadd.f32 %v4791_v41, %v4790_v51  ;;  %v3595_v18 = vmul.f32 %v1513_v12, %v7446_v53 }
 0x384   : > { %6668 = vmatmul.msk.bf16.gmra.mxu0 %vm990_vm0, %v7056_v35  ;;  %v4784_v63 = vrot.slane %v4783_v46, 1  ;;  %v4793_v57 = vrot.slane %v4792_v31, 1 }
 0x386   : > { %v4785_v55 = vadd.f32 %v4784_v63, %v4783_v46  ;;  %v4794_v15 = vadd.f32 %v4793_v57, %v4792_v31  ;;  %v3589_v46 = vmul.f32 %v2486_v25, %v7485_v6  ;;  %v3590_v57 = vmul.f32 %v2975_v42, %v7491_v9 }
 0x387   : > { %v2488_v62 = vpop.f32.mrf.mxu2  ;;  %v2977_v17 = vpop.f32.mrf.mxu3 }
 0x388   : > { %v8478_v30 = vsel %vm5931_vm5, %v4785_v55, %v8436_v3  ;;  %v2002_v43 = vpop.f32.mrf.mxu1  ;;  %v8482_v49 = vsel %vm5931_vm5, %v4794_v15, %v8443_v0  ;;  %v3587_v0 = vmul.f32 %v8453_v5, %v7428_v28  ;;  %v7058_v5 = vld [vmem:[%s9573_s1 + $0x1b8] sm:$0xff]  ;;  %v3593_v44 = vmul.f32 %v2488_v62, %v7487_v7 }
 0x389   : > { %v1515_v59 = vpop.f32.mrf.mxu0  ;;  %v3596_v37 = vmul.f32 %v2002_v43, %v7489_v8  ;;  %v3594_v47 = vmul.f32 %v2977_v17, %v7493_v24 }
 0x38a   : > { %v4795_v45 = vadd.f32 %v3591_v20, %v3587_v0  ;;  %v3599_v61 = vmul.f32 %v1515_v59, %v7477_v1 }
 0x38b   : > { %6764 = vmatmul.msk.bf16.gmra.mxu1 %vm990_vm0, %v7056_v35  ;;  %v4822_v62 = vadd.f32 %v3594_v47, %v3590_v57 }
 0x38c   : > { %6860 = vmatmul.msk.bf16.gmra.mxu2 %vm990_vm0, %v7056_v35  ;;  %6956 = vmatmul.msk.bf16.gmra.mxu3 %vm990_vm0, %v7056_v35  ;;  %v4796_v27 = vadd.f32 %v4795_v45, %v3595_v18  ;;  %v4804_v35 = vadd.f32 %v3592_v21, %v3588_v36 }
 0x38e   : > { %v4797_v11 = vadd.f32 %v4796_v27, %v3599_v61  ;;  %v4805_v41 = vadd.f32 %v4804_v35, %v3596_v37 }
 0x38f   : > { %v2491_v2 = vpop.f32.mrf.mxu2  ;;  %v2980_v3 = vpop.f32.mrf.mxu3 }
 0x390   : > { %v2004_v33 = vpop.f32.mrf.mxu1  ;;  %v4798_v32 = vrot.slane %v4797_v11, 4  ;;  %v3597_v55 = vmul.f32 %v2491_v2, %v7505_v48  ;;  %v3598_v59 = vmul.f32 %v2980_v3, %v7511_v22 }
 0x391   : > { %v1518_v34 = vpop.f32.mrf.mxu0  ;;  %v3600_v29 = vmul.f32 %v2004_v33, %v7513_v50  ;;  %v4813_v33 = vadd.f32 %v3593_v44, %v3589_v46 }
 0x392   : > { %v4799_v51 = vadd.f32 %v4798_v32, %v4797_v11  ;;  %v3603_v31 = vmul.f32 %v1518_v34, %v7428_v28  ;;  %v4823_v42 = vadd.f32 %v4822_v62, %v3598_v59 }
 0x393   : > { %v4806_v15 = vadd.f32 %v4805_v41, %v3600_v29  ;;  %v4814_v45 = vadd.f32 %v4813_v33, %v3597_v55  ;;  %v7059_v29 = vld [vmem:[%s9573_s1 + $0x1c0] sm:$0xff] }
 0x394   : > { %6669 = vmatmul.msk.bf16.gmra.mxu0 %vm990_vm0, %v7057_v16  ;;  %v4800_v43 = vrot.slane %v4799_v51, 2 }
 0x395   : > { %v4807_v61 = vrot.slane %v4806_v15, 4 }
 0x396   : > { %v4801_v3 = vadd.f32 %v4800_v43, %v4799_v51 }
 0x397   : > { %v2493_v10 = vpop.f32.mrf.mxu2  ;;  %v2982_v60 = vpop.f32.mrf.mxu3 }
 0x398   : > { %v2007_v58 = vpop.f32.mrf.mxu1  ;;  %v3601_v17 = vmul.f32 %v2493_v10, %v7523_v4  ;;  %v3602_v20 = vmul.f32 %v2982_v60, %v7525_v14  ;;  %v4808_v60 = vadd.f32 %v4807_v61, %v4806_v15  ;;  %v4802_v36 = vrot.slane %v4801_v3, 1 }
 0x399   : > { %v1520_v52 = vpop.f32.mrf.mxu0  ;;  %v3604_v37 = vmul.f32 %v2007_v58, %v7462_v26 }
 0x39a   : > { %v3607_v19 = vmul.f32 %v1520_v52, %v7430_v38  ;;  %v4815_v11 = vadd.f32 %v4814_v45, %v3601_v17  ;;  %v4824_v21 = vadd.f32 %v4823_v42, %v3602_v20  ;;  %v4809_v46 = vrot.slane %v4808_v60, 2 }
 0x39b   : > { %6765 = vmatmul.msk.bf16.gmra.mxu1 %vm990_vm0, %v7057_v16  ;;  %v4803_v57 = vadd.f32 %v4802_v36, %v4801_v3 }
 0x39c   : > { %6861 = vmatmul.msk.bf16.gmra.mxu2 %vm990_vm0, %v7057_v16  ;;  %6957 = vmatmul.msk.bf16.gmra.mxu3 %vm990_vm0, %v7057_v16  ;;  %v4831_v16 = vadd.f32 %v3607_v19, %v3603_v31  ;;  %v4816_v51 = vrot.slane %v4815_v11, 4  ;;  %v4810_v17 = vadd.f32 %v4809_v46, %v4808_v60 }
 0x39f   : > { %v8505_v39 = vpop.f32.mrf.mxu2  ;;  %v8508_v12 = vpop.f32.mrf.mxu3 }
 0x3a0   : > { %v2009_v23 = vpop.f32.mrf.mxu1  ;;  %v3605_v20 = vmul.f32 %v8505_v39, %v7485_v6 }
 0x3a1   : > { %v1523_v40 = vpop.f32.mrf.mxu0  ;;  %v3608_v32 = vmul.f32 %v2009_v23, %v7464_v54  ;;  %v4825_v23 = vrot.slane %v4824_v21, 4 }
 0x3a2   : > { %v3611_v63 = vmul.f32 %v1523_v40, %v7446_v53 }
 0x3a3   : > { %v4840_v44 = vadd.f32 %v3608_v32, %v3604_v37  ;;  %v4826_v15 = vadd.f32 %v4825_v23, %v4824_v21 }
 0x3a4   : > { %6670 = vmatmul.msk.bf16.gmra.mxu0 %vm990_vm0, %v7058_v5  ;;  %v4832_v34 = vadd.f32 %v4831_v16, %v3611_v63 }
 0x3a7   : > { %v2498_v0 = vpop.f32.mrf.mxu2  ;;  %v2987_v2 = vpop.f32.mrf.mxu3 }
 0x3a8   : > { %v2012_v52 = vpop.f32.mrf.mxu1  ;;  %v3609_v43 = vmul.f32 %v2498_v0, %v7487_v7  ;;  %v3610_v16 = vmul.f32 %v2987_v2, %v7493_v24  ;;  %v4827_v2 = vrot.slane %v4826_v15, 2 }
 0x3a9   : > { %v1525_v25 = vpop.f32.mrf.mxu0  ;;  %v3612_v40 = vmul.f32 %v2012_v52, %v7489_v8 }
 0x3aa   : > { %v3615_v18 = vmul.f32 %v1525_v25, %v7477_v1  ;;  %v3606_v25 = vmul.f32 %v8508_v12, %v7491_v9  ;;  %v4849_v52 = vadd.f32 %v3609_v43, %v3605_v20 }
 0x3ab   : > { %6766 = vmatmul.msk.bf16.gmra.mxu1 %vm990_vm0, %v7058_v5  ;;  %v4841_v58 = vadd.f32 %v4840_v44, %v3612_v40 }
 0x3ac   : > { %v4833_v27 = vadd.f32 %v4832_v34, %v3615_v18  ;;  %6862 = vmatmul.msk.bf16.gmra.mxu2 %vm990_vm0, %v7058_v5  ;;  %6958 = vmatmul.msk.bf16.gmra.mxu3 %vm990_vm0, %v7058_v5  ;;  %v4817_v5 = vadd.f32 %v4816_v51, %v4815_v11  ;;  %v5991_v18 = vsel %vm5933_vm6, %v4803_v57, %v8461_v13 }
 0x3ad   : > { %v4858_v3 = vadd.f32 %v3610_v16, %v3606_v25 }
 0x3ae   : > { %v4834_v10 = vrot.slane %v4833_v27, 4  ;;  %v4818_v61 = vrot.slane %v4817_v5, 2 }
 0x3af   : > { %v2501_v47 = vpop.f32.mrf.mxu2  ;;  %v2990_v31 = vpop.f32.mrf.mxu3 }
 0x3b0   : > { %v4835_v35 = vadd.f32 %v4834_v10, %v4833_v27  ;;  %v2014_v63 = vpop.f32.mrf.mxu1  ;;  %v3613_v34 = vmul.f32 %v2501_v47, %v7505_v48  ;;  %v3614_v45 = vmul.f32 %v2990_v31, %v7511_v22  ;;  %v4811_v10 = vrot.slane %v4810_v17, 1 }
 0x3b1   : > { %v1528_v19 = vpop.f32.mrf.mxu0  ;;  %v3616_v59 = vmul.f32 %v2014_v63, %v7513_v50  ;;  %v4819_v44 = vadd.f32 %v4818_v61, %v4817_v5 }
 0x3b2   : > { %v4836_v41 = vrot.slane %v4835_v35, 2  ;;  %v3619_v12 = vmul.f32 %v1528_v19, %v7428_v28  ;;  %v4850_v13 = vadd.f32 %v4849_v52, %v3613_v34  ;;  %v4859_v40 = vadd.f32 %v4858_v3, %v3614_v45 }
 0x3b3   : > { %v4842_v62 = vadd.f32 %v4841_v58, %v3616_v59  ;;  %v4812_v19 = vadd.f32 %v4811_v10, %v4810_v17  ;;  %v4820_v59 = vrot.slane %v4819_v44, 1 }
 0x3b4   : > { %v4837_v55 = vadd.f32 %v4836_v41, %v4835_v35  ;;  %6671 = vmatmul.msk.bf16.gmra.mxu0 %vm990_vm0, %v7059_v29  ;;  %v4828_v41 = vadd.f32 %v4827_v2, %v4826_v15 }
 0x3b5   : > { %v4843_v42 = vrot.slane %v4842_v62, 4  ;;  %v5998_v20 = vsel %vm5933_vm6, %v4812_v19, %v8473_v56  ;;  %v4821_v52 = vadd.f32 %v4820_v59, %v4819_v44 }
 0x3b6   : > { %v4838_v33 = vrot.slane %v4837_v55, 1  ;;  %v4829_v43 = vrot.slane %v4828_v41, 1 }
 0x3b7   : > { %v4844_v11 = vadd.f32 %v4843_v42, %v4842_v62  ;;  %v2503_v21 = vpop.f32.mrf.mxu2  ;;  %v2992_v36 = vpop.f32.mrf.mxu3 }
 0x3b8   : > { %v4839_v0 = vadd.f32 %v4838_v33, %v4837_v55  ;;  %v3617_v60 = vmul.f32 %v2503_v21, %v7523_v4  ;;  %v2017_v37 = vpop.f32.mrf.mxu1  ;;  %v3618_v51 = vmul.f32 %v2992_v36, %v7525_v14  ;;  %v7060_v55 = vld [vmem:[%s9573_s1 + $0x1c8] sm:$0xff]  ;;  %v4830_v3 = vadd.f32 %v4829_v43, %v4828_v41 }
 0x3b9   : > { %v1530_v27 = vpop.f32.mrf.mxu0  ;;  %v4845_v35 = vrot.slane %v4844_v11, 2 }
 0x3ba   : > { %v5992_v39 = vsel %vm5935_vm7, %v4839_v0, %v5991_v18  ;;  %v3623_v32 = vmul.f32 %v1530_v27, %v7430_v38  ;;  %v4851_v47 = vadd.f32 %v4850_v13, %v3617_v60  ;;  %v4860_v31 = vadd.f32 %v4859_v40, %v3618_v51 }
 0x3bb   : > { %6130 = vst [vmem:[%s7844_s21 + $0x40] sm:$0xff] %v5992_v39  ;;  %v4846_v46 = vadd.f32 %v4845_v35, %v4844_v11  ;;  %6767 = vmatmul.msk.bf16.gmra.mxu1 %vm990_vm0, %v7059_v29  ;;  %v3620_v0 = vmul.f32 %v2017_v37, %v7462_v26  ;;  %v6012_v10 = vsel %vm5933_vm6, %v4830_v3, %v8482_v49 }
 0x3bc   : > { %v4867_v23 = vadd.f32 %v3623_v32, %v3619_v12  ;;  %v4852_v63 = vrot.slane %v4851_v47, 4  ;;  %6863 = vmatmul.msk.bf16.gmra.mxu2 %vm990_vm0, %v7059_v29  ;;  %v4861_v58 = vrot.slane %v4860_v31, 4  ;;  %6959 = vmatmul.msk.bf16.gmra.mxu3 %vm990_vm0, %v7059_v29  ;;  %v6005_v32 = vsel %vm5933_vm6, %v4821_v52, %v8478_v30  ;;  %v7062_v52 = vld [vmem:[%s9573_s1 + $0x1d8] sm:$0xff] }
 0x3bd   : > { %v4847_v57 = vrot.slane %v4846_v46, 1 }
 0x3be   : > { %v4853_v5 = vadd.f32 %v4852_v63, %v4851_v47  ;;  %v4862_v33 = vadd.f32 %v4861_v58, %v4860_v31  ;;  %v7061_v63 = vld [vmem:[%s9573_s1 + $0x1d0] sm:$0xff] }
 0x3bf   : > { %v4848_v16 = vadd.f32 %v4847_v57, %v4846_v46  ;;  %v2506_v62 = vpop.f32.mrf.mxu2  ;;  %v2995_v34 = vpop.f32.mrf.mxu3 }
 0x3c0   : > { %v4854_v25 = vrot.slane %v4853_v5, 2  ;;  %v2019_v29 = vpop.f32.mrf.mxu1  ;;  %v4863_v45 = vrot.slane %v4862_v33, 2  ;;  %v3621_v40 = vmul.f32 %v2506_v62, %v7485_v6  ;;  %v3622_v35 = vmul.f32 %v2995_v34, %v7491_v9 }
 0x3c1   : > { %v1533_v15 = vpop.f32.mrf.mxu0  ;;  %v5999_v18 = vsel %vm5935_vm7, %v4848_v16, %v5998_v20  ;;  %v3624_v42 = vmul.f32 %v2019_v29, %v7464_v54 }
 0x3c2   : > { %v3627_v17 = vmul.f32 %v1533_v15, %v7446_v53  ;;  %6131 = vst [vmem:[%s7844_s21 + $0x48] sm:$0xff] %v5999_v18  ;;  %v4855_v61 = vadd.f32 %v4854_v25, %v4853_v5  ;;  %v4864_v27 = vadd.f32 %v4863_v45, %v4862_v33 }
 0x3c3   : > { %v4876_v39 = vadd.f32 %v3624_v42, %v3620_v0 }
 0x3c4   : > { %6672 = vmatmul.msk.bf16.gmra.mxu0 %vm990_vm0, %v7060_v55  ;;  %v4868_v2 = vadd.f32 %v4867_v23, %v3627_v17  ;;  %v4856_v56 = vrot.slane %v4855_v61, 1  ;;  %v4865_v11 = vrot.slane %v4864_v27, 1 }
 0x3c6   : > { %v4857_v21 = vadd.f32 %v4856_v56, %v4855_v61  ;;  %v4866_v13 = vadd.f32 %v4865_v11, %v4864_v27 }
 0x3c7   : > { %v2508_v60 = vpop.f32.mrf.mxu2  ;;  %v2997_v23 = vpop.f32.mrf.mxu3 }
 0x3c8   : > { %v6006_v37 = vsel %vm5935_vm7, %v4857_v21, %v6005_v32  ;;  %v3625_v51 = vmul.f32 %v2508_v60, %v7487_v7  ;;  %v2022_v44 = vpop.f32.mrf.mxu1  ;;  %v6013_v30 = vsel %vm5935_vm7, %v4866_v13, %v6012_v10  ;;  %v3626_v47 = vmul.f32 %v2997_v23, %v7493_v24 }
 0x3c9   : > { %v1535_v12 = vpop.f32.mrf.mxu0  ;;  %6132 = vst [vmem:[%s7844_s21 + $0x50] sm:$0xff] %v6006_v37  ;;  %v3628_v49 = vmul.f32 %v2022_v44, %v7489_v8 }
 0x3ca   : > { %v3631_v36 = vmul.f32 %v1535_v12, %v7477_v1  ;;  %6133 = vst [vmem:[%s7844_s21 + $0x58] sm:$0xff] %v6013_v30  ;;  %v4885_v46 = vadd.f32 %v3625_v51, %v3621_v40  ;;  %v4894_v31 = vadd.f32 %v3626_v47, %v3622_v35 }
 0x3cb   : > { %v4877_v19 = vadd.f32 %v4876_v39, %v3628_v49  ;;  %6768 = vmatmul.msk.bf16.gmra.mxu1 %vm990_vm0, %v7060_v55 }
 0x3cc   : > { %v4869_v41 = vadd.f32 %v4868_v2, %v3631_v36  ;;  %6864 = vmatmul.msk.bf16.gmra.mxu2 %vm990_vm0, %v7060_v55  ;;  %6960 = vmatmul.msk.bf16.gmra.mxu3 %vm990_vm0, %v7060_v55 }
 0x3ce   : > { %v4870_v56 = vrot.slane %v4869_v41, 4 }
 0x3cf   : > { %v2511_v58 = vpop.f32.mrf.mxu2  ;;  %v3000_v5 = vpop.f32.mrf.mxu3 }
 0x3d0   : > { %v3629_v59 = vmul.f32 %v2511_v58, %v7505_v48  ;;  %v2024_v15 = vpop.f32.mrf.mxu1  ;;  %v3630_v43 = vmul.f32 %v3000_v5, %v7511_v22  ;;  %v4871_v60 = vadd.f32 %v4870_v56, %v4869_v41 }
 0x3d1   : > { %v1538_v57 = vpop.f32.mrf.mxu0  ;;  %v3632_v16 = vmul.f32 %v2024_v15, %v7513_v50  ;;  %v7063_v15 = vld [vmem:[%s9573_s1 + $0x1e0] sm:$0xff] }
 0x3d2   : > { %v4886_v33 = vadd.f32 %v4885_v46, %v3629_v59  ;;  %v4895_v62 = vadd.f32 %v4894_v31, %v3630_v43  ;;  %v3635_v25 = vmul.f32 %v1538_v57, %v7428_v28  ;;  %v4872_v35 = vrot.slane %v4871_v60, 2 }
 0x3d3   : > { %v4878_v17 = vadd.f32 %v4877_v19, %v3632_v16 }
 0x3d4   : > { %6673 = vmatmul.msk.bf16.gmra.mxu0 %vm990_vm0, %v7061_v63  ;;  %v4873_v59 = vadd.f32 %v4872_v35, %v4871_v60 }
 0x3d5   : > { %v4879_v19 = vrot.slane %v4878_v17, 4 }
 0x3d7   : > { %v2513_v20 = vpop.f32.mrf.mxu2  ;;  %v3002_v18 = vpop.f32.mrf.mxu3  ;;  %v4880_v43 = vadd.f32 %v4879_v19, %v4878_v17 }
 0x3d8   : > { %v3633_v29 = vmul.f32 %v2513_v20, %v7523_v4  ;;  %v2027_v45 = vpop.f32.mrf.mxu1  ;;  %v3634_v0 = vmul.f32 %v3002_v18, %v7525_v14 }
 0x3d9   : > { %v1540_v55 = vpop.f32.mrf.mxu0  ;;  %v3636_v12 = vmul.f32 %v2027_v45, %v7462_v26 }
 0x3da   : > { %v3639_v34 = vmul.f32 %v1540_v55, %v7430_v38  ;;  %v8592_v61 = vadd.f32 %v4886_v33, %v3633_v29  ;;  %v8594_v2 = vadd.f32 %v4895_v62, %v3634_v0  ;;  %v4881_v0 = vrot.slane %v4880_v43, 2 }
 0x3db   : > { %6769 = vmatmul.msk.bf16.gmra.mxu1 %vm990_vm0, %v7061_v63 }
 0x3dc   : > { %v4903_v42 = vadd.f32 %v3639_v34, %v3635_v25  ;;  %6865 = vmatmul.msk.bf16.gmra.mxu2 %vm990_vm0, %v7061_v63  ;;  %6961 = vmatmul.msk.bf16.gmra.mxu3 %vm990_vm0, %v7061_v63  ;;  %v4874_v34 = vrot.slane %v4873_v59, 1  ;;  %v4897_v17 = vrot.slane %v8594_v2, 4 }
 0x3de   : > { %v4875_v56 = vadd.f32 %v4874_v34, %v4873_v59  ;;  %v7064_v59 = vld [vmem:[%s9573_s1 + $0x1e8] sm:$0xff] }
 0x3df   : > { %v2516_v27 = vpop.f32.mrf.mxu2  ;;  %v3005_v11 = vpop.f32.mrf.mxu3 }
 0x3e0   : > { %v2029_v21 = vpop.f32.mrf.mxu1  ;;  %v3637_v51 = vmul.f32 %v2516_v27, %v7485_v6  ;;  %v3638_v47 = vmul.f32 %v3005_v11, %v7491_v9 }
 0x3e1   : > { %v1543_v3 = vpop.f32.mrf.mxu0  ;;  %v3640_v32 = vmul.f32 %v2029_v21, %v7464_v54 }
 0x3e2   : > { %v3643_v39 = vmul.f32 %v1543_v3, %v7446_v53 }
 0x3e3   : > { %v4912_v13 = vadd.f32 %v3640_v32, %v3636_v12  ;;  %v4882_v12 = vadd.f32 %v4881_v0, %v4880_v43 }
 0x3e4   : > { %v4904_v10 = vadd.f32 %v4903_v42, %v3643_v39  ;;  %6674 = vmatmul.msk.bf16.gmra.mxu0 %vm990_vm0, %v7062_v52  ;;  %v4888_v42 = vrot.slane %v8592_v61, 4 }
 0x3e6   : > { %v4889_v32 = vadd.f32 %v4888_v42, %v8592_v61 }
 0x3e7   : > { %v2518_v37 = vpop.f32.mrf.mxu2  ;;  %v3007_v44 = vpop.f32.mrf.mxu3 }
 0x3e8   : > { %v3641_v23 = vmul.f32 %v2518_v37, %v7487_v7  ;;  %v2032_v30 = vpop.f32.mrf.mxu1  ;;  %v3642_v49 = vmul.f32 %v3007_v44, %v7493_v24 }
 0x3e9   : > { %v1545_v36 = vpop.f32.mrf.mxu0  ;;  %v3644_v46 = vmul.f32 %v2032_v30, %v7489_v8 }
 0x3ea   : > { %v3647_v40 = vmul.f32 %v1545_v36, %v7477_v1  ;;  %v4921_v41 = vadd.f32 %v3641_v23, %v3637_v51  ;;  %v4930_v63 = vadd.f32 %v3642_v49, %v3638_v47  ;;  %v4883_v49 = vrot.slane %v4882_v12, 1 }
 0x3eb   : > { %v4913_v57 = vadd.f32 %v4912_v13, %v3644_v46  ;;  %6770 = vmatmul.msk.bf16.gmra.mxu1 %vm990_vm0, %v7062_v52 }
 0x3ec   : > { %v4905_v31 = vadd.f32 %v4904_v10, %v3647_v40  ;;  %6866 = vmatmul.msk.bf16.gmra.mxu2 %vm990_vm0, %v7062_v52  ;;  %6962 = vmatmul.msk.bf16.gmra.mxu3 %vm990_vm0, %v7062_v52  ;;  %v4898_v10 = vadd.f32 %v4897_v17, %v8594_v2  ;;  %v4890_v2 = vrot.slane %v4889_v32, 2 }
 0x3ee   : > { %v4906_v58 = vrot.slane %v4905_v31, 4  ;;  %v4891_v43 = vadd.f32 %v4890_v2, %v4889_v32 }
 0x3ef   : > { %v2521_v33 = vpop.f32.mrf.mxu2  ;;  %v3010_v20 = vpop.f32.mrf.mxu3 }
 0x3f0   : > { %v4907_v5 = vadd.f32 %v4906_v58, %v4905_v31  ;;  %v3645_v55 = vmul.f32 %v2521_v33, %v7505_v48  ;;  %v2034_v25 = vpop.f32.mrf.mxu1  ;;  %v3646_v29 = vmul.f32 %v3010_v20, %v7511_v22  ;;  %v4899_v31 = vrot.slane %v4898_v10, 2 }
 0x3f1   : > { %v1548_v16 = vpop.f32.mrf.mxu0  ;;  %v3648_v45 = vmul.f32 %v2034_v25, %v7513_v50 }
 0x3f2   : > { %v4908_v62 = vrot.slane %v4907_v5, 2  ;;  %v4922_v52 = vadd.f32 %v4921_v41, %v3645_v55  ;;  %v4931_v3 = vadd.f32 %v4930_v63, %v3646_v29  ;;  %v3651_v40 = vmul.f32 %v1548_v16, %v7428_v28 }
 0x3f3   : > { %v4914_v39 = vadd.f32 %v4913_v57, %v3648_v45 }
 0x3f4   : > { %v4909_v18 = vadd.f32 %v4908_v62, %v4907_v5  ;;  %6675 = vmatmul.msk.bf16.gmra.mxu0 %vm990_vm0, %v7063_v15  ;;  %v4884_v5 = vadd.f32 %v4883_v49, %v4882_v12  ;;  %v4900_v62 = vadd.f32 %v4899_v31, %v4898_v10 }
 0x3f5   : > { %v4915_v21 = vrot.slane %v4914_v39, 4 }
 0x3f6   : > { %v4910_v27 = vrot.slane %v4909_v18, 1 }
 0x3f7   : > { %v4916_v36 = vadd.f32 %v4915_v21, %v4914_v39  ;;  %v2523_v37 = vpop.f32.mrf.mxu2  ;;  %v3012_v23 = vpop.f32.mrf.mxu3  ;;  %v4901_v39 = vrot.slane %v4900_v62, 1 }
 0x3f8   : > { %v4911_v11 = vadd.f32 %v4910_v27, %v4909_v18  ;;  %v3649_v51 = vmul.f32 %v2523_v37, %v7523_v4  ;;  %v2037_v44 = vpop.f32.mrf.mxu1  ;;  %v3650_v47 = vmul.f32 %v3012_v23, %v7525_v14 }
 0x3f9   : > { %v1550_v13 = vpop.f32.mrf.mxu0  ;;  %v4917_v30 = vrot.slane %v4916_v36, 2  ;;  %v3652_v42 = vmul.f32 %v2037_v44, %v7462_v26 }
 0x3fa   : > { %v8627_v60 = vsel %vm5923_vm1, %v4911_v11, %v4875_v56  ;;  %v3655_v35 = vmul.f32 %v1550_v13, %v7430_v38  ;;  %v4923_v46 = vadd.f32 %v4922_v52, %v3649_v51  ;;  %v4932_v41 = vadd.f32 %v4931_v3, %v3650_v47 }
 0x3fb   : > { %v4918_v19 = vadd.f32 %v4917_v30, %v4916_v36  ;;  %6771 = vmatmul.msk.bf16.gmra.mxu1 %vm990_vm0, %v7063_v15  ;;  %v4892_v52 = vrot.slane %v4891_v43, 1  ;;  %v4902_v36 = vadd.f32 %v4901_v39, %v4900_v62 }
 0x3fc   : > { %v4939_v61 = vadd.f32 %v3655_v35, %v3651_v40  ;;  %v4924_v63 = vrot.slane %v4923_v46, 4  ;;  %6867 = vmatmul.msk.bf16.gmra.mxu2 %vm990_vm0, %v7063_v15  ;;  %v4933_v58 = vrot.slane %v4932_v41, 4  ;;  %6963 = vmatmul.msk.bf16.gmra.mxu3 %vm990_vm0, %v7063_v15 }
 0x3fd   : > { %v4919_v57 = vrot.slane %v4918_v19, 1  ;;  %v4893_v32 = vadd.f32 %v4892_v52, %v4891_v43 }
 0x3fe   : > { %v4925_v16 = vadd.f32 %v4924_v63, %v4923_v46  ;;  %v4934_v20 = vadd.f32 %v4933_v58, %v4932_v41 }
 0x3ff   : > { %v4920_v55 = vadd.f32 %v4919_v57, %v4918_v19  ;;  %v2526_v25 = vpop.f32.mrf.mxu2  ;;  %v3015_v18 = vpop.f32.mrf.mxu3 }
 0x400   : > { %v4926_v29 = vrot.slane %v4925_v16, 2  ;;  %v2039_v45 = vpop.f32.mrf.mxu1  ;;  %v4935_v15 = vrot.slane %v4934_v20, 2  ;;  %v3653_v23 = vmul.f32 %v2526_v25, %v7485_v6  ;;  %v3654_v44 = vmul.f32 %v3015_v18, %v7491_v9 }
 0x401   : > { %v1553_v33 = vpop.f32.mrf.mxu0  ;;  %v8641_v0 = vsel %vm5923_vm1, %v4920_v55, %v4884_v5  ;;  %v3656_v17 = vmul.f32 %v2039_v45, %v7464_v54  ;;  %v7065_v5 = vld [vmem:[%s9573_s1 + $0x1f0] sm:$0xff] }
 0x402   : > { %v3659_v34 = vmul.f32 %v1553_v33, %v7446_v53  ;;  %v4927_v3 = vadd.f32 %v4926_v29, %v4925_v16  ;;  %v4936_v56 = vadd.f32 %v4935_v15, %v4934_v20 }
 0x403   : > { %v4948_v11 = vadd.f32 %v3656_v17, %v3652_v42 }
 0x404   : > { %6676 = vmatmul.msk.bf16.gmra.mxu0 %vm990_vm0, %v7064_v59  ;;  %v4940_v27 = vadd.f32 %v4939_v61, %v3659_v34  ;;  %v4928_v21 = vrot.slane %v4927_v3, 1  ;;  %v4937_v12 = vrot.slane %v4936_v56, 1 }
 0x406   : > { %v4929_v10 = vadd.f32 %v4928_v21, %v4927_v3  ;;  %v4938_v37 = vadd.f32 %v4937_v12, %v4936_v56 }
 0x407   : > { %v2528_v40 = vpop.f32.mrf.mxu2  ;;  %v3017_v47 = vpop.f32.mrf.mxu3 }
 0x408   : > { %v8648_v51 = vsel %vm5923_vm1, %v4929_v10, %v4893_v32  ;;  %v3657_v30 = vmul.f32 %v2528_v40, %v7487_v7  ;;  %v2042_v61 = vpop.f32.mrf.mxu1  ;;  %v8654_v49 = vsel %vm5923_vm1, %v4938_v37, %v4902_v36  ;;  %v3658_v2 = vmul.f32 %v3017_v47, %v7493_v24 }
 0x409   : > { %v1555_v13 = vpop.f32.mrf.mxu0  ;;  %v3660_v46 = vmul.f32 %v2042_v61, %v7489_v8 }
 0x40a   : > { %v3663_v35 = vmul.f32 %v1555_v13, %v7477_v1  ;;  %v4957_v19 = vadd.f32 %v3657_v30, %v3653_v23  ;;  %v4966_v41 = vadd.f32 %v3658_v2, %v3654_v44  ;;  %v7066_v30 = vld [vmem:[%s9573_s1 + $0x1f8] sm:$0xff] }
 0x40b   : > { %v4949_v63 = vadd.f32 %v4948_v11, %v3660_v46  ;;  %6772 = vmatmul.msk.bf16.gmra.mxu1 %vm990_vm0, %v7064_v59 }
 0x40c   : > { %v4941_v31 = vadd.f32 %v4940_v27, %v3663_v35  ;;  %6868 = vmatmul.msk.bf16.gmra.mxu2 %vm990_vm0, %v7064_v59  ;;  %6964 = vmatmul.msk.bf16.gmra.mxu3 %vm990_vm0, %v7064_v59 }
 0x40e   : > { %v4942_v57 = vrot.slane %v4941_v31, 4 }
 0x40f   : > { %v2531_v16 = vpop.f32.mrf.mxu2  ;;  %v3020_v55 = vpop.f32.mrf.mxu3 }
 0x410   : > { %v4943_v58 = vadd.f32 %v4942_v57, %v4941_v31  ;;  %v3661_v62 = vmul.f32 %v2531_v16, %v7505_v48  ;;  %v2044_v20 = vpop.f32.mrf.mxu1  ;;  %v3662_v25 = vmul.f32 %v3020_v55, %v7511_v22 }
 0x411   : > { %v1558_v43 = vpop.f32.mrf.mxu0  ;;  %v3664_v29 = vmul.f32 %v2044_v20, %v7513_v50 }
 0x412   : > { %v4944_v33 = vrot.slane %v4943_v58, 2  ;;  %v4958_v59 = vadd.f32 %v4957_v19, %v3661_v62  ;;  %v4967_v18 = vadd.f32 %v4966_v41, %v3662_v25  ;;  %v3667_v56 = vmul.f32 %v1558_v43, %v7428_v28 }
 0x413   : > { %v4950_v15 = vadd.f32 %v4949_v63, %v3664_v29 }
 0x414   : > { %v4945_v34 = vadd.f32 %v4944_v33, %v4943_v58  ;;  %6677 = vmatmul.msk.bf16.gmra.mxu0 %vm990_vm0, %v7065_v5 }
 0x415   : > { %v4951_v17 = vrot.slane %v4950_v15, 4 }
 0x416   : > { %v4946_v45 = vrot.slane %v4945_v34, 1 }
 0x417   : > { %v4952_v27 = vadd.f32 %v4951_v17, %v4950_v15  ;;  %v2533_v39 = vpop.f32.mrf.mxu2  ;;  %v3022_v12 = vpop.f32.mrf.mxu3 }
 0x418   : > { %v4947_v42 = vadd.f32 %v4946_v45, %v4945_v34  ;;  %v3665_v21 = vmul.f32 %v2533_v39, %v7523_v4  ;;  %v2047_v32 = vpop.f32.mrf.mxu1  ;;  %v3666_v13 = vmul.f32 %v3022_v12, %v7525_v14 }
 0x419   : > { %v1560_v52 = vpop.f32.mrf.mxu0  ;;  %v4953_v10 = vrot.slane %v4952_v27, 2 }
 0x41a   : > { %v8670_v3 = vsel %vm5925_vm2, %v4947_v42, %v8627_v60  ;;  %v3671_v11 = vmul.f32 %v1560_v52, %v7430_v38  ;;  %v4959_v37 = vadd.f32 %v4958_v59, %v3665_v21  ;;  %v4968_v35 = vadd.f32 %v4967_v18, %v3666_v13 }
 0x41b   : > { %v4954_v40 = vadd.f32 %v4953_v10, %v4952_v27  ;;  %6773 = vmatmul.msk.bf16.gmra.mxu1 %vm990_vm0, %v7065_v5 }
 0x41c   : > { %v4975_v36 = vadd.f32 %v3671_v11, %v3667_v56  ;;  %v4960_v60 = vrot.slane %v4959_v37, 4  ;;  %6869 = vmatmul.msk.bf16.gmra.mxu2 %vm990_vm0, %v7065_v5  ;;  %v4969_v44 = vrot.slane %v4968_v35, 4  ;;  %6965 = vmatmul.msk.bf16.gmra.mxu3 %vm990_vm0, %v7065_v5  ;;  %v3668_v5 = vmul.f32 %v2047_v32, %v7462_v26 }
 0x41d   : > { %v4955_v23 = vrot.slane %v4954_v40, 1 }
 0x41e   : > { %v4961_v47 = vadd.f32 %v4960_v60, %v4959_v37  ;;  %v4970_v46 = vadd.f32 %v4969_v44, %v4968_v35 }
 0x41f   : > { %v4956_v2 = vadd.f32 %v4955_v23, %v4954_v40  ;;  %v2536_v31 = vpop.f32.mrf.mxu2  ;;  %v3025_v63 = vpop.f32.mrf.mxu3 }
 0x420   : > { %v4962_v41 = vrot.slane %v4961_v47, 2  ;;  %v2049_v57 = vpop.f32.mrf.mxu1  ;;  %v4971_v43 = vrot.slane %v4970_v46, 2  ;;  %v3669_v42 = vmul.f32 %v2536_v31, %v7485_v6  ;;  %v3670_v17 = vmul.f32 %v3025_v63, %v7491_v9 }
 0x421   : > { %v1563_v61 = vpop.f32.mrf.mxu0  ;;  %v8685_v58 = vsel %vm5925_vm2, %v4956_v2, %v8641_v0  ;;  %v3672_v16 = vmul.f32 %v2049_v57, %v7464_v54 }
 0x422   : > { %v3675_v19 = vmul.f32 %v1563_v61, %v7446_v53  ;;  %v4963_v33 = vadd.f32 %v4962_v41, %v4961_v47  ;;  %v4972_v55 = vadd.f32 %v4971_v43, %v4970_v46 }
 0x423   : > { %v4984_v20 = vadd.f32 %v3672_v16, %v3668_v5 }
 0x424   : > { %6678 = vmatmul.msk.bf16.gmra.mxu0 %vm990_vm0, %v7066_v30  ;;  %v4976_v62 = vadd.f32 %v4975_v36, %v3675_v19  ;;  %v4964_v25 = vrot.slane %v4963_v33, 1  ;;  %v4973_v34 = vrot.slane %v4972_v55, 1 }
 0x426   : > { %v4965_v29 = vadd.f32 %v4964_v25, %v4963_v33  ;;  %v4974_v18 = vadd.f32 %v4973_v34, %v4972_v55 }
 0x427   : > { %v2538_v45 = vpop.f32.mrf.mxu2  ;;  %v3027_v27 = vpop.f32.mrf.mxu3 }
 0x428   : > { %v8693_v15 = vsel %vm5925_vm2, %v4965_v29, %v8648_v51  ;;  %v3673_v52 = vmul.f32 %v2538_v45, %v7487_v7  ;;  %v2052_v39 = vpop.f32.mrf.mxu1  ;;  %v8700_v56 = vsel %vm5925_vm2, %v4974_v18, %v8654_v49  ;;  %v3674_v11 = vmul.f32 %v3027_v27, %v7493_v24  ;;  %v7067_v49 = vld [vmem:[%s9573_s1 + $0x200] sm:$0xff] }
 0x429   : > { %v1565_v59 = vpop.f32.mrf.mxu0  ;;  %v3676_v21 = vmul.f32 %v2052_v39, %v7489_v8 }
 0x42a   : > { %v3679_v0 = vmul.f32 %v1565_v59, %v7477_v1  ;;  %v4993_v32 = vadd.f32 %v3673_v52, %v3669_v42  ;;  %v5002_v51 = vadd.f32 %v3674_v11, %v3670_v17  ;;  %v7068_v52 = vld [vmem:[%s9573_s1 + $0x208] sm:$0xff] }
 0x42b   : > { %v4985_v10 = vadd.f32 %v4984_v20, %v3676_v21  ;;  %6774 = vmatmul.msk.bf16.gmra.mxu1 %vm990_vm0, %v7066_v30 }
 0x42c   : > { %v4977_v12 = vadd.f32 %v4976_v62, %v3679_v0  ;;  %6870 = vmatmul.msk.bf16.gmra.mxu2 %vm990_vm0, %v7066_v30  ;;  %6966 = vmatmul.msk.bf16.gmra.mxu3 %vm990_vm0, %v7066_v30 }
 0x42e   : > { %v4978_v13 = vrot.slane %v4977_v12, 4 }
 0x42f   : > { %v2541_v40 = vpop.f32.mrf.mxu2  ;;  %v3030_v23 = vpop.f32.mrf.mxu3 }
 0x430   : > { %v4979_v36 = vadd.f32 %v4978_v13, %v4977_v12  ;;  %v3677_v60 = vmul.f32 %v2541_v40, %v7505_v48  ;;  %v2054_v44 = vpop.f32.mrf.mxu1  ;;  %v3678_v47 = vmul.f32 %v3030_v23, %v7511_v22 }
 0x431   : > { %v1568_v37 = vpop.f32.mrf.mxu0  ;;  %v3680_v2 = vmul.f32 %v2054_v44, %v7513_v50 }
 0x432   : > { %v4980_v35 = vrot.slane %v4979_v36, 2  ;;  %v4994_v30 = vadd.f32 %v4993_v32, %v3677_v60  ;;  %v5003_v46 = vadd.f32 %v5002_v51, %v3678_v47  ;;  %v3683_v33 = vmul.f32 %v1568_v37, %v7428_v28 }
 0x433   : > { %v4986_v19 = vadd.f32 %v4985_v10, %v3680_v2 }
 0x434   : > { %v4981_v61 = vadd.f32 %v4980_v35, %v4979_v36  ;;  %6679 = vmatmul.msk.bf16.gmra.mxu0 %vm990_vm0, %v7067_v49 }
 0x435   : > { %v4987_v63 = vrot.slane %v4986_v19, 4 }
 0x436   : > { %v4982_v31 = vrot.slane %v4981_v61, 1 }
 0x437   : > { %v4988_v5 = vadd.f32 %v4987_v63, %v4986_v19  ;;  %v2543_v16 = vpop.f32.mrf.mxu2  ;;  %v3032_v20 = vpop.f32.mrf.mxu3 }
 0x438   : > { %v4983_v41 = vadd.f32 %v4982_v31, %v4981_v61  ;;  %v3681_v55 = vmul.f32 %v2543_v16, %v7523_v4  ;;  %v2057_v25 = vpop.f32.mrf.mxu1  ;;  %v3682_v29 = vmul.f32 %v3032_v20, %v7525_v14 }
 0x439   : > { %v1570_v57 = vpop.f32.mrf.mxu0  ;;  %v4989_v34 = vrot.slane %v4988_v5, 2 }
 0x43a   : > { %v8716_v43 = vsel %vm5927_vm3, %v4983_v41, %v8670_v3  ;;  %v3687_v62 = vmul.f32 %v1570_v57, %v7430_v38  ;;  %v4995_v18 = vadd.f32 %v4994_v30, %v3681_v55  ;;  %v5004_v0 = vadd.f32 %v5003_v46, %v3682_v29 }
 0x43b   : > { %v4990_v45 = vadd.f32 %v4989_v34, %v4988_v5  ;;  %6775 = vmatmul.msk.bf16.gmra.mxu1 %vm990_vm0, %v7067_v49 }
 0x43c   : > { %v5011_v59 = vadd.f32 %v3687_v62, %v3683_v33  ;;  %v4996_v3 = vrot.slane %v4995_v18, 4  ;;  %6871 = vmatmul.msk.bf16.gmra.mxu2 %vm990_vm0, %v7067_v49  ;;  %v5005_v17 = vrot.slane %v5004_v0, 4  ;;  %6967 = vmatmul.msk.bf16.gmra.mxu3 %vm990_vm0, %v7067_v49  ;;  %v3684_v49 = vmul.f32 %v2057_v25, %v7462_v26 }
 0x43d   : > { %v4991_v42 = vrot.slane %v4990_v45, 1 }
 0x43e   : > { %v4997_v27 = vadd.f32 %v4996_v3, %v4995_v18  ;;  %v5006_v21 = vadd.f32 %v5005_v17, %v5004_v0 }
 0x43f   : > { %v4992_v11 = vadd.f32 %v4991_v42, %v4990_v45  ;;  %v2546_v12 = vpop.f32.mrf.mxu2  ;;  %v3035_v10 = vpop.f32.mrf.mxu3 }
 0x440   : > { %v4998_v51 = vrot.slane %v4997_v27, 2  ;;  %v2059_v13 = vpop.f32.mrf.mxu1  ;;  %v5007_v37 = vrot.slane %v5006_v21, 2  ;;  %v3685_v41 = vmul.f32 %v2546_v12, %v7485_v6  ;;  %v3686_v63 = vmul.f32 %v3035_v10, %v7491_v9 }
 0x441   : > { %v1573_v39 = vpop.f32.mrf.mxu0  ;;  %v8731_v36 = vsel %vm5927_vm3, %v4992_v11, %v8685_v58  ;;  %v3688_v40 = vmul.f32 %v2059_v13, %v7464_v54 }
 0x442   : > { %v3691_v32 = vmul.f32 %v1573_v39, %v7446_v53  ;;  %v4999_v35 = vadd.f32 %v4998_v51, %v4997_v27  ;;  %v5008_v23 = vadd.f32 %v5007_v37, %v5006_v21 }
 0x443   : > { %v5020_v44 = vadd.f32 %v3688_v40, %v3684_v49 }
 0x444   : > { %6680 = vmatmul.msk.bf16.gmra.mxu0 %vm990_vm0, %v7068_v52  ;;  %v5012_v60 = vadd.f32 %v5011_v59, %v3691_v32  ;;  %v5000_v47 = vrot.slane %v4999_v35, 1  ;;  %v5009_v61 = vrot.slane %v5008_v23, 1 }
 0x446   : > { %v5001_v2 = vadd.f32 %v5000_v47, %v4999_v35  ;;  %v5010_v46 = vadd.f32 %v5009_v61, %v5008_v23 }
 0x447   : > { %v2548_v31 = vpop.f32.mrf.mxu2  ;;  %v3037_v5 = vpop.f32.mrf.mxu3 }
 0x448   : > { %v8739_v19 = vsel %vm5927_vm3, %v5001_v2, %v8693_v15  ;;  %v3689_v57 = vmul.f32 %v2548_v31, %v7487_v7  ;;  %v2062_v16 = vpop.f32.mrf.mxu1  ;;  %v8746_v33 = vsel %vm5927_vm3, %v5010_v46, %v8700_v56  ;;  %v3690_v62 = vmul.f32 %v3037_v5, %v7493_v24  ;;  %v7069_v56 = vld [vmem:[%s9573_s1 + $0x210] sm:$0xff] }
 0x449   : > { %v1575_v30 = vpop.f32.mrf.mxu0  ;;  %v3692_v55 = vmul.f32 %v2062_v16, %v7489_v8 }
 0x44a   : > { %v3695_v58 = vmul.f32 %v1575_v30, %v7477_v1  ;;  %v5029_v25 = vadd.f32 %v3689_v57, %v3685_v41  ;;  %v5038_v15 = vadd.f32 %v3690_v62, %v3686_v63  ;;  %v7070_v57 = vld [vmem:[%s9573_s1 + $0x218] sm:$0xff] }
 0x44b   : > { %v5021_v34 = vadd.f32 %v5020_v44, %v3692_v55  ;;  %6776 = vmatmul.msk.bf16.gmra.mxu1 %vm990_vm0, %v7068_v52 }
 0x44c   : > { %v5013_v20 = vadd.f32 %v5012_v60, %v3695_v58  ;;  %6872 = vmatmul.msk.bf16.gmra.mxu2 %vm990_vm0, %v7068_v52  ;;  %6968 = vmatmul.msk.bf16.gmra.mxu3 %vm990_vm0, %v7068_v52 }
 0x44e   : > { %v5014_v29 = vrot.slane %v5013_v20, 4 }
 0x44f   : > { %v2551_v45 = vpop.f32.mrf.mxu2  ;;  %v3040_v42 = vpop.f32.mrf.mxu3 }
 0x450   : > { %v5015_v59 = vadd.f32 %v5014_v29, %v5013_v20  ;;  %v3693_v3 = vmul.f32 %v2551_v45, %v7505_v48  ;;  %v2064_v17 = vpop.f32.mrf.mxu1  ;;  %v3694_v27 = vmul.f32 %v3040_v42, %v7511_v22 }
 0x451   : > { %v1578_v18 = vpop.f32.mrf.mxu0  ;;  %v3696_v11 = vmul.f32 %v2064_v17, %v7513_v50 }
 0x452   : > { %v5016_v0 = vrot.slane %v5015_v59, 2  ;;  %v5030_v52 = vadd.f32 %v5029_v25, %v3693_v3  ;;  %v5039_v21 = vadd.f32 %v5038_v15, %v3694_v27  ;;  %v3699_v35 = vmul.f32 %v1578_v18, %v7428_v28 }
 0x453   : > { %v5022_v32 = vadd.f32 %v5021_v34, %v3696_v11 }
 0x454   : > { %v5017_v39 = vadd.f32 %v5016_v0, %v5015_v59  ;;  %6681 = vmatmul.msk.bf16.gmra.mxu0 %vm990_vm0, %v7069_v56 }
 0x455   : > { %v5023_v10 = vrot.slane %v5022_v32, 4 }
 0x456   : > { %v5018_v12 = vrot.slane %v5017_v39, 1 }
 0x457   : > { %v5024_v49 = vadd.f32 %v5023_v10, %v5022_v32  ;;  %v2553_v40 = vpop.f32.mrf.mxu2  ;;  %v3042_v44 = vpop.f32.mrf.mxu3 }
 0x458   : > { %v5019_v51 = vadd.f32 %v5018_v12, %v5017_v39  ;;  %v3697_v23 = vmul.f32 %v2553_v40, %v7523_v4  ;;  %v2067_v47 = vpop.f32.mrf.mxu1  ;;  %v3698_v2 = vmul.f32 %v3042_v44, %v7525_v14 }
 0x459   : > { %v1580_v13 = vpop.f32.mrf.mxu0  ;;  %v5025_v61 = vrot.slane %v5024_v49, 2 }
 0x45a   : > { %v8762_v37 = vsel %vm5929_vm4, %v5019_v51, %v8716_v43  ;;  %v3703_v60 = vmul.f32 %v1580_v13, %v7430_v38  ;;  %v5031_v46 = vadd.f32 %v5030_v52, %v3697_v23  ;;  %v5040_v58 = vadd.f32 %v5039_v21, %v3698_v2 }
 0x45b   : > { %v5026_v31 = vadd.f32 %v5025_v61, %v5024_v49  ;;  %6777 = vmatmul.msk.bf16.gmra.mxu1 %vm990_vm0, %v7069_v56 }
 0x45c   : > { %v5047_v30 = vadd.f32 %v3703_v60, %v3699_v35  ;;  %v5032_v43 = vrot.slane %v5031_v46, 4  ;;  %6873 = vmatmul.msk.bf16.gmra.mxu2 %vm990_vm0, %v7069_v56  ;;  %v5041_v63 = vrot.slane %v5040_v58, 4  ;;  %6969 = vmatmul.msk.bf16.gmra.mxu3 %vm990_vm0, %v7069_v56  ;;  %v3700_v56 = vmul.f32 %v2067_v47, %v7462_v26 }
 0x45d   : > { %v5027_v41 = vrot.slane %v5026_v31, 1 }
 0x45e   : > { %v5033_v5 = vadd.f32 %v5032_v43, %v5031_v46  ;;  %v5042_v55 = vadd.f32 %v5041_v63, %v5040_v58 }
 0x45f   : > { %v5028_v62 = vadd.f32 %v5027_v41, %v5026_v31  ;;  %v2556_v20 = vpop.f32.mrf.mxu2  ;;  %v3045_v34 = vpop.f32.mrf.mxu3 }
 0x460   : > { %v5034_v15 = vrot.slane %v5033_v5, 2  ;;  %v2069_v29 = vpop.f32.mrf.mxu1  ;;  %v5043_v18 = vrot.slane %v5042_v55, 2  ;;  %v3701_v51 = vmul.f32 %v2556_v20, %v7485_v6  ;;  %v3702_v10 = vmul.f32 %v3045_v34, %v7491_v9 }
 0x461   : > { %v1583_v16 = vpop.f32.mrf.mxu0  ;;  %v8777_v59 = vsel %vm5929_vm4, %v5028_v62, %v8731_v36  ;;  %v3704_v45 = vmul.f32 %v2069_v29, %v7464_v54 }
 0x462   : > { %v3707_v25 = vmul.f32 %v1583_v16, %v7446_v53  ;;  %v5035_v0 = vadd.f32 %v5034_v15, %v5033_v5  ;;  %v5044_v42 = vadd.f32 %v5043_v18, %v5042_v55 }
 0x463   : > { %v5056_v17 = vadd.f32 %v3704_v45, %v3700_v56 }
 0x464   : > { %6682 = vmatmul.msk.bf16.gmra.mxu0 %vm990_vm0, %v7070_v57  ;;  %v5048_v3 = vadd.f32 %v5047_v30, %v3707_v25  ;;  %v5036_v27 = vrot.slane %v5035_v0, 1  ;;  %v5045_v39 = vrot.slane %v5044_v42, 1 }
 0x466   : > { %v5037_v11 = vadd.f32 %v5036_v27, %v5035_v0  ;;  %v5046_v21 = vadd.f32 %v5045_v39, %v5044_v42 }
 0x467   : > { %v2558_v12 = vpop.f32.mrf.mxu2  ;;  %v3047_v49 = vpop.f32.mrf.mxu3 }
 0x468   : > { %v8785_v32 = vsel %vm5929_vm4, %v5037_v11, %v8739_v19  ;;  %v3705_v13 = vmul.f32 %v2558_v12, %v7487_v7  ;;  %v2072_v40 = vpop.f32.mrf.mxu1  ;;  %v8792_v35 = vsel %vm5929_vm4, %v5046_v21, %v8746_v33  ;;  %v3706_v60 = vmul.f32 %v3047_v49, %v7493_v24  ;;  %v7071_v33 = vld [vmem:[%s9573_s1 + $0x220] sm:$0xff] }
 0x469   : > { %v1585_v52 = vpop.f32.mrf.mxu0  ;;  %v3708_v23 = vmul.f32 %v2072_v40, %v7489_v8 }
 0x46a   : > { %v3711_v36 = vmul.f32 %v1585_v52, %v7477_v1  ;;  %v5065_v47 = vadd.f32 %v3705_v13, %v3701_v51  ;;  %v5074_v19 = vadd.f32 %v3706_v60, %v3702_v10 }
 0x46b   : > { %v5057_v61 = vadd.f32 %v5056_v17, %v3708_v23  ;;  %6778 = vmatmul.msk.bf16.gmra.mxu1 %vm990_vm0, %v7070_v57 }
 0x46c   : > { %v5049_v44 = vadd.f32 %v5048_v3, %v3711_v36  ;;  %6874 = vmatmul.msk.bf16.gmra.mxu2 %vm990_vm0, %v7070_v57  ;;  %6970 = vmatmul.msk.bf16.gmra.mxu3 %vm990_vm0, %v7070_v57  ;;  %v7072_v36 = vld [vmem:[%s9573_s1 + $0x228] sm:$0xff] }
 0x46e   : > { %v5050_v2 = vrot.slane %v5049_v44, 4 }
 0x46f   : > { %v2561_v31 = vpop.f32.mrf.mxu2  ;;  %v3050_v41 = vpop.f32.mrf.mxu3 }
 0x470   : > { %v5051_v30 = vadd.f32 %v5050_v2, %v5049_v44  ;;  %v3709_v43 = vmul.f32 %v2561_v31, %v7505_v48  ;;  %v2074_v63 = vpop.f32.mrf.mxu1  ;;  %v3710_v5 = vmul.f32 %v3050_v41, %v7511_v22 }
 0x471   : > { %v8802_v46 = vpop.f32.mrf.mxu0  ;;  %v3712_v62 = vmul.f32 %v2074_v63, %v7513_v50 }
 0x472   : > { %v5052_v58 = vrot.slane %v5051_v30, 2  ;;  %v5066_v57 = vadd.f32 %v5065_v47, %v3709_v43  ;;  %v5075_v55 = vadd.f32 %v5074_v19, %v3710_v5 }
 0x473   : > { %v5058_v25 = vadd.f32 %v5057_v61, %v3712_v62  ;;  %v7073_v62 = vld [vmem:[%s9573_s1 + $0x230] sm:$0xff] }
 0x474   : > { %v5053_v16 = vadd.f32 %v5052_v58, %v5051_v30  ;;  %6683 = vmatmul.msk.bf16.gmra.mxu0 %vm990_vm0, %v7071_v33 }
 0x475   : > { %v5059_v34 = vrot.slane %v5058_v25, 4 }
 0x476   : > { %v5054_v20 = vrot.slane %v5053_v16, 1 }
 0x477   : > { %v5060_v56 = vadd.f32 %v5059_v34, %v5058_v25  ;;  %v2563_v45 = vpop.f32.mrf.mxu2  ;;  %v3052_v3 = vpop.f32.mrf.mxu3 }
 0x478   : > { %v5055_v15 = vadd.f32 %v5054_v20, %v5053_v16  ;;  %v3713_v0 = vmul.f32 %v2563_v45, %v7523_v4  ;;  %v2077_v42 = vpop.f32.mrf.mxu1  ;;  %v3714_v27 = vmul.f32 %v3052_v3, %v7525_v14 }
 0x479   : > { %v1590_v29 = vpop.f32.mrf.mxu0  ;;  %v5061_v17 = vrot.slane %v5060_v56, 2 }
 0x47a   : > { %v8810_v18 = vsel %vm5931_vm5, %v5055_v15, %v8762_v37  ;;  %v5067_v39 = vadd.f32 %v5066_v57, %v3713_v0  ;;  %v5076_v52 = vadd.f32 %v5075_v55, %v3714_v27  ;;  %v3719_v25 = vmul.f32 %v1590_v29, %v7430_v38 }
 0x47b   : > { %v5062_v11 = vadd.f32 %v5061_v17, %v5060_v56  ;;  %6779 = vmatmul.msk.bf16.gmra.mxu1 %vm990_vm0, %v7071_v33 }
 0x47c   : > { %v5068_v21 = vrot.slane %v5067_v39, 4  ;;  %6875 = vmatmul.msk.bf16.gmra.mxu2 %vm990_vm0, %v7071_v33  ;;  %v5077_v37 = vrot.slane %v5076_v52, 4  ;;  %6971 = vmatmul.msk.bf16.gmra.mxu3 %vm990_vm0, %v7071_v33 }
 0x47d   : > { %v5063_v12 = vrot.slane %v5062_v11, 1 }
 0x47e   : > { %v5069_v51 = vadd.f32 %v5068_v21, %v5067_v39  ;;  %v5078_v49 = vadd.f32 %v5077_v37, %v5076_v52  ;;  %v3716_v52 = vmul.f32 %v2077_v42, %v7462_v26 }
 0x47f   : > { %v5064_v13 = vadd.f32 %v5063_v12, %v5062_v11  ;;  %v2566_v40 = vpop.f32.mrf.mxu2  ;;  %v3055_v23 = vpop.f32.mrf.mxu3 }
 0x480   : > { %v5070_v60 = vrot.slane %v5069_v51, 2  ;;  %v2079_v44 = vpop.f32.mrf.mxu1  ;;  %v5079_v19 = vrot.slane %v5078_v49, 2 }
 0x481   : > { %v1593_v10 = vpop.f32.mrf.mxu0  ;;  %v8822_v47 = vsel %vm5931_vm5, %v5064_v13, %v8777_v59  ;;  %v3720_v29 = vmul.f32 %v2079_v44, %v7464_v54 }
 0x482   : > { %v5071_v61 = vadd.f32 %v5070_v60, %v5069_v51  ;;  %v5080_v2 = vadd.f32 %v5079_v19, %v5078_v49  ;;  %v3723_v15 = vmul.f32 %v1593_v10, %v7446_v53 }
 0x484   : > { %6684 = vmatmul.msk.bf16.gmra.mxu0 %vm990_vm0, %v7072_v36  ;;  %v5072_v30 = vrot.slane %v5071_v61, 1  ;;  %v5081_v33 = vrot.slane %v5080_v2, 1 }
 0x486   : > { %v5073_v31 = vadd.f32 %v5072_v30, %v5071_v61  ;;  %v5082_v43 = vadd.f32 %v5081_v33, %v5080_v2  ;;  %v3717_v61 = vmul.f32 %v2566_v40, %v7485_v6  ;;  %v3718_v33 = vmul.f32 %v3055_v23, %v7491_v9 }
 0x487   : > { %v2568_v41 = vpop.f32.mrf.mxu2  ;;  %v3057_v5 = vpop.f32.mrf.mxu3 }
 0x488   : > { %v8827_v63 = vsel %vm5931_vm5, %v5073_v31, %v8785_v32  ;;  %v2082_v16 = vpop.f32.mrf.mxu1  ;;  %v8831_v59 = vsel %vm5931_vm5, %v5082_v43, %v8792_v35  ;;  %v3715_v35 = vmul.f32 %v8802_v46, %v7428_v28  ;;  %v7074_v46 = vld [vmem:[%s9573_s1 + $0x238] sm:$0xff]  ;;  %v3721_v44 = vmul.f32 %v2568_v41, %v7487_v7 }
 0x489   : > { %v1595_v58 = vpop.f32.mrf.mxu0  ;;  %v3724_v21 = vmul.f32 %v2082_v16, %v7489_v8  ;;  %v3722_v42 = vmul.f32 %v3057_v5, %v7493_v24 }
 0x48a   : > { %v5083_v34 = vadd.f32 %v3719_v25, %v3715_v35  ;;  %v3727_v56 = vmul.f32 %v1595_v58, %v7477_v1 }
 0x48b   : > { %6780 = vmatmul.msk.bf16.gmra.mxu1 %vm990_vm0, %v7072_v36  ;;  %v5110_v41 = vadd.f32 %v3722_v42, %v3718_v33 }
 0x48c   : > { %6876 = vmatmul.msk.bf16.gmra.mxu2 %vm990_vm0, %v7072_v36  ;;  %6972 = vmatmul.msk.bf16.gmra.mxu3 %vm990_vm0, %v7072_v36  ;;  %v5084_v0 = vadd.f32 %v5083_v34, %v3723_v15  ;;  %v5092_v36 = vadd.f32 %v3720_v29, %v3716_v52 }
 0x48e   : > { %v5085_v39 = vadd.f32 %v5084_v0, %v3727_v56  ;;  %v5093_v19 = vadd.f32 %v5092_v36, %v3724_v21 }
 0x48f   : > { %v2571_v55 = vpop.f32.mrf.mxu2  ;;  %v3060_v32 = vpop.f32.mrf.mxu3 }
 0x490   : > { %v2084_v20 = vpop.f32.mrf.mxu1  ;;  %v5086_v11 = vrot.slane %v5085_v39, 4  ;;  %v3725_v31 = vmul.f32 %v2571_v55, %v7505_v48  ;;  %v3726_v58 = vmul.f32 %v3060_v32, %v7511_v22 }
 0x491   : > { %v1598_v57 = vpop.f32.mrf.mxu0  ;;  %v3728_v51 = vmul.f32 %v2084_v20, %v7513_v50  ;;  %v5101_v20 = vadd.f32 %v3721_v44, %v3717_v61 }
 0x492   : > { %v5087_v49 = vadd.f32 %v5086_v11, %v5085_v39  ;;  %v3731_v2 = vmul.f32 %v1598_v57, %v7428_v28  ;;  %v5111_v23 = vadd.f32 %v5110_v41, %v3726_v58 }
 0x493   : > { %v5094_v43 = vadd.f32 %v5093_v19, %v3728_v51  ;;  %v5102_v34 = vadd.f32 %v5101_v20, %v3725_v31  ;;  %v7075_v51 = vld [vmem:[%s9573_s1 + $0x240] sm:$0xff] }
 0x494   : > { %6685 = vmatmul.msk.bf16.gmra.mxu0 %vm990_vm0, %v7073_v62  ;;  %v5088_v16 = vrot.slane %v5087_v49, 2 }
 0x495   : > { %v5095_v56 = vrot.slane %v5094_v43, 4 }
 0x496   : > { %v5089_v32 = vadd.f32 %v5088_v16, %v5087_v49 }
 0x497   : > { %v2573_v3 = vpop.f32.mrf.mxu2  ;;  %v3062_v17 = vpop.f32.mrf.mxu3 }
 0x498   : > { %v2087_v27 = vpop.f32.mrf.mxu1  ;;  %v3729_v5 = vmul.f32 %v2573_v3, %v7523_v4  ;;  %v3730_v25 = vmul.f32 %v3062_v17, %v7525_v14  ;;  %v5096_v17 = vadd.f32 %v5095_v56, %v5094_v43  ;;  %v5090_v52 = vrot.slane %v5089_v32, 1 }
 0x499   : > { %v1600_v45 = vpop.f32.mrf.mxu0  ;;  %v3732_v21 = vmul.f32 %v2087_v27, %v7462_v26 }
 0x49a   : > { %v3735_v60 = vmul.f32 %v1600_v45, %v7430_v38  ;;  %v5103_v39 = vadd.f32 %v5102_v34, %v3729_v5  ;;  %v5112_v29 = vadd.f32 %v5111_v23, %v3730_v25  ;;  %v5097_v61 = vrot.slane %v5096_v17, 2 }
 0x49b   : > { %6781 = vmatmul.msk.bf16.gmra.mxu1 %vm990_vm0, %v7073_v62  ;;  %v5091_v33 = vadd.f32 %v5090_v52, %v5089_v32 }
 0x49c   : > { %6877 = vmatmul.msk.bf16.gmra.mxu2 %vm990_vm0, %v7073_v62  ;;  %6973 = vmatmul.msk.bf16.gmra.mxu3 %vm990_vm0, %v7073_v62  ;;  %v5119_v62 = vadd.f32 %v3735_v60, %v3731_v2  ;;  %v5104_v49 = vrot.slane %v5103_v39, 4  ;;  %v5098_v5 = vadd.f32 %v5097_v61, %v5096_v17 }
 0x49f   : > { %v8854_v37 = vpop.f32.mrf.mxu2  ;;  %v8857_v10 = vpop.f32.mrf.mxu3 }
 0x4a0   : > { %v2089_v13 = vpop.f32.mrf.mxu1  ;;  %v3733_v25 = vmul.f32 %v8854_v37, %v7485_v6 }
 0x4a1   : > { %v1603_v12 = vpop.f32.mrf.mxu0  ;;  %v3736_v11 = vmul.f32 %v2089_v13, %v7464_v54  ;;  %v5113_v13 = vrot.slane %v5112_v29, 4 }
 0x4a2   : > { %v3739_v30 = vmul.f32 %v1603_v12, %v7446_v53 }
 0x4a3   : > { %v5128_v44 = vadd.f32 %v3736_v11, %v3732_v21  ;;  %v5114_v43 = vadd.f32 %v5113_v13, %v5112_v29 }
 0x4a4   : > { %6686 = vmatmul.msk.bf16.gmra.mxu0 %vm990_vm0, %v7074_v46  ;;  %v5120_v57 = vadd.f32 %v5119_v62, %v3739_v30 }
 0x4a7   : > { %v2578_v35 = vpop.f32.mrf.mxu2  ;;  %v3067_v55 = vpop.f32.mrf.mxu3 }
 0x4a8   : > { %v2092_v45 = vpop.f32.mrf.mxu1  ;;  %v3737_v16 = vmul.f32 %v2578_v35, %v7487_v7  ;;  %v3738_v62 = vmul.f32 %v3067_v55, %v7493_v24  ;;  %v5115_v55 = vrot.slane %v5114_v43, 2 }
 0x4a9   : > { %v1605_v40 = vpop.f32.mrf.mxu0  ;;  %v3740_v12 = vmul.f32 %v2092_v45, %v7489_v8 }
 0x4aa   : > { %v3743_v15 = vmul.f32 %v1605_v40, %v7477_v1  ;;  %v3734_v40 = vmul.f32 %v8857_v10, %v7491_v9  ;;  %v5137_v45 = vadd.f32 %v3737_v16, %v3733_v25 }
 0x4ab   : > { %6782 = vmatmul.msk.bf16.gmra.mxu1 %vm990_vm0, %v7074_v46  ;;  %v5129_v27 = vadd.f32 %v5128_v44, %v3740_v12 }
 0x4ac   : > { %v5121_v0 = vadd.f32 %v5120_v57, %v3743_v15  ;;  %6878 = vmatmul.msk.bf16.gmra.mxu2 %vm990_vm0, %v7074_v46  ;;  %6974 = vmatmul.msk.bf16.gmra.mxu3 %vm990_vm0, %v7074_v46  ;;  %v5105_v46 = vadd.f32 %v5104_v49, %v5103_v39  ;;  %v6019_v15 = vsel %vm5933_vm6, %v5091_v33, %v8810_v18 }
 0x4ad   : > { %v5146_v32 = vadd.f32 %v3738_v62, %v3734_v40 }
 0x4ae   : > { %v5122_v3 = vrot.slane %v5121_v0, 4  ;;  %v5106_v56 = vrot.slane %v5105_v46, 2 }
 0x4af   : > { %v2581_v42 = vpop.f32.mrf.mxu2  ;;  %v3070_v2 = vpop.f32.mrf.mxu3 }
 0x4b0   : > { %v5123_v36 = vadd.f32 %v5122_v3, %v5121_v0  ;;  %v2094_v30 = vpop.f32.mrf.mxu1  ;;  %v3741_v57 = vmul.f32 %v2581_v42, %v7505_v48  ;;  %v3742_v34 = vmul.f32 %v3070_v2, %v7511_v22  ;;  %v5099_v3 = vrot.slane %v5098_v5, 1 }
 0x4b1   : > { %v1608_v60 = vpop.f32.mrf.mxu0  ;;  %v3744_v58 = vmul.f32 %v2094_v30, %v7513_v50  ;;  %v5107_v44 = vadd.f32 %v5106_v56, %v5105_v46 }
 0x4b2   : > { %v5124_v19 = vrot.slane %v5123_v36, 2  ;;  %v3747_v10 = vmul.f32 %v1608_v60, %v7428_v28  ;;  %v5138_v18 = vadd.f32 %v5137_v45, %v3741_v57  ;;  %v5147_v12 = vadd.f32 %v5146_v32, %v3742_v34 }
 0x4b3   : > { %v5130_v41 = vadd.f32 %v5129_v27, %v3744_v58  ;;  %v5100_v60 = vadd.f32 %v5099_v3, %v5098_v5  ;;  %v5108_v58 = vrot.slane %v5107_v44, 1 }
 0x4b4   : > { %v5125_v31 = vadd.f32 %v5124_v19, %v5123_v36  ;;  %6687 = vmatmul.msk.bf16.gmra.mxu0 %vm990_vm0, %v7075_v51  ;;  %v5116_v19 = vadd.f32 %v5115_v55, %v5114_v43 }
 0x4b5   : > { %v5131_v23 = vrot.slane %v5130_v41, 4  ;;  %v6026_v25 = vsel %vm5933_vm6, %v5100_v60, %v8822_v47  ;;  %v5109_v45 = vadd.f32 %v5108_v58, %v5107_v44 }
 0x4b6   : > { %v5126_v20 = vrot.slane %v5125_v31, 1  ;;  %v5117_v16 = vrot.slane %v5116_v19, 1 }
 0x4b7   : > { %v5132_v39 = vadd.f32 %v5131_v23, %v5130_v41  ;;  %v2583_v29 = vpop.f32.mrf.mxu2  ;;  %v3072_v52 = vpop.f32.mrf.mxu3 }
 0x4b8   : > { %v5127_v35 = vadd.f32 %v5126_v20, %v5125_v31  ;;  %v3745_v17 = vmul.f32 %v2583_v29, %v7523_v4  ;;  %v2097_v21 = vpop.f32.mrf.mxu1  ;;  %v3746_v49 = vmul.f32 %v3072_v52, %v7525_v14  ;;  %v7076_v31 = vld [vmem:[%s9573_s1 + $0x248] sm:$0xff]  ;;  %v5118_v32 = vadd.f32 %v5117_v16, %v5116_v19 }
 0x4b9   : > { %v1610_v0 = vpop.f32.mrf.mxu0  ;;  %v5133_v36 = vrot.slane %v5132_v39, 2 }
 0x4ba   : > { %v6020_v37 = vsel %vm5935_vm7, %v5127_v35, %v6019_v15  ;;  %v3751_v11 = vmul.f32 %v1610_v0, %v7430_v38  ;;  %v5139_v42 = vadd.f32 %v5138_v18, %v3745_v17  ;;  %v5148_v2 = vadd.f32 %v5147_v12, %v3746_v49 }
 0x4bb   : > { %6134 = vst [vmem:[%s7844_s21 + $0x60] sm:$0xff] %v6020_v37  ;;  %v5134_v61 = vadd.f32 %v5133_v36, %v5132_v39  ;;  %6783 = vmatmul.msk.bf16.gmra.mxu1 %vm990_vm0, %v7075_v51  ;;  %v3748_v35 = vmul.f32 %v2097_v21, %v7462_v26  ;;  %v6040_v3 = vsel %vm5933_vm6, %v5118_v32, %v8831_v59 }
 0x4bc   : > { %v5155_v13 = vadd.f32 %v3751_v11, %v3747_v10  ;;  %v5140_v30 = vrot.slane %v5139_v42, 4  ;;  %6879 = vmatmul.msk.bf16.gmra.mxu2 %vm990_vm0, %v7075_v51  ;;  %v5149_v27 = vrot.slane %v5148_v2, 4  ;;  %6975 = vmatmul.msk.bf16.gmra.mxu3 %vm990_vm0, %v7075_v51  ;;  %v6033_v11 = vsel %vm5933_vm6, %v5109_v45, %v8827_v63  ;;  %v7078_v45 = vld [vmem:[%s9573_s1 + $0x258] sm:$0xff] }
 0x4bd   : > { %v5135_v33 = vrot.slane %v5134_v61, 1 }
 0x4be   : > { %v5141_v46 = vadd.f32 %v5140_v30, %v5139_v42  ;;  %v5150_v20 = vadd.f32 %v5149_v27, %v5148_v2  ;;  %v7077_v30 = vld [vmem:[%s9573_s1 + $0x250] sm:$0xff] }
 0x4bf   : > { %v5136_v62 = vadd.f32 %v5135_v33, %v5134_v61  ;;  %v2586_v41 = vpop.f32.mrf.mxu2  ;;  %v3075_v57 = vpop.f32.mrf.mxu3 }
 0x4c0   : > { %v5142_v40 = vrot.slane %v5141_v46, 2  ;;  %v2099_v51 = vpop.f32.mrf.mxu1  ;;  %v5151_v34 = vrot.slane %v5150_v20, 2  ;;  %v3749_v12 = vmul.f32 %v2586_v41, %v7485_v6  ;;  %v3750_v36 = vmul.f32 %v3075_v57, %v7491_v9 }
 0x4c1   : > { %v1613_v43 = vpop.f32.mrf.mxu0  ;;  %v6027_v15 = vsel %vm5935_vm7, %v5136_v62, %v6026_v25  ;;  %v3752_v23 = vmul.f32 %v2099_v51, %v7464_v54 }
 0x4c2   : > { %v3755_v5 = vmul.f32 %v1613_v43, %v7446_v53  ;;  %6135 = vst [vmem:[%s7844_s21 + $0x68] sm:$0xff] %v6027_v15  ;;  %v5143_v56 = vadd.f32 %v5142_v40, %v5141_v46  ;;  %v5152_v0 = vadd.f32 %v5151_v34, %v5150_v20 }
 0x4c3   : > { %v5164_v37 = vadd.f32 %v3752_v23, %v3748_v35 }
 0x4c4   : > { %6688 = vmatmul.msk.bf16.gmra.mxu0 %vm990_vm0, %v7076_v31  ;;  %v5156_v55 = vadd.f32 %v5155_v13, %v3755_v5  ;;  %v5144_v47 = vrot.slane %v5143_v56, 1  ;;  %v5153_v39 = vrot.slane %v5152_v0, 1 }
 0x4c6   : > { %v5145_v29 = vadd.f32 %v5144_v47, %v5143_v56  ;;  %v5154_v18 = vadd.f32 %v5153_v39, %v5152_v0 }
 0x4c7   : > { %v2588_v17 = vpop.f32.mrf.mxu2  ;;  %v3077_v13 = vpop.f32.mrf.mxu3 }
 0x4c8   : > { %v6034_v21 = vsel %vm5935_vm7, %v5145_v29, %v6033_v11  ;;  %v3753_v49 = vmul.f32 %v2588_v17, %v7487_v7  ;;  %v2102_v44 = vpop.f32.mrf.mxu1  ;;  %v6041_v63 = vsel %vm5935_vm7, %v5154_v18, %v6040_v3  ;;  %v3754_v42 = vmul.f32 %v3077_v13, %v7493_v24 }
 0x4c9   : > { %v1615_v10 = vpop.f32.mrf.mxu0  ;;  %6136 = vst [vmem:[%s7844_s21 + $0x70] sm:$0xff] %v6034_v21  ;;  %v3756_v59 = vmul.f32 %v2102_v44, %v7489_v8 }
 0x4ca   : > { %v3759_v52 = vmul.f32 %v1615_v10, %v7477_v1  ;;  %6137 = vst [vmem:[%s7844_s21 + $0x78] sm:$0xff] %v6041_v63  ;;  %v5173_v61 = vadd.f32 %v3753_v49, %v3749_v12  ;;  %v5182_v2 = vadd.f32 %v3754_v42, %v3750_v36 }
 0x4cb   : > { %v5165_v60 = vadd.f32 %v5164_v37, %v3756_v59  ;;  %6784 = vmatmul.msk.bf16.gmra.mxu1 %vm990_vm0, %v7076_v31 }
 0x4cc   : > { %v5157_v19 = vadd.f32 %v5156_v55, %v3759_v52  ;;  %6880 = vmatmul.msk.bf16.gmra.mxu2 %vm990_vm0, %v7076_v31  ;;  %6976 = vmatmul.msk.bf16.gmra.mxu3 %vm990_vm0, %v7076_v31 }
 0x4ce   : > { %v5158_v47 = vrot.slane %v5157_v19, 4 }
 0x4cf   : > { %v2591_v27 = vpop.f32.mrf.mxu2  ;;  %v3080_v46 = vpop.f32.mrf.mxu3 }
 0x4d0   : > { %v3757_v58 = vmul.f32 %v2591_v27, %v7505_v48  ;;  %v2104_v43 = vpop.f32.mrf.mxu1  ;;  %v3758_v16 = vmul.f32 %v3080_v46, %v7511_v22  ;;  %v5159_v17 = vadd.f32 %v5158_v47, %v5157_v19 }
 0x4d1   : > { %v1618_v33 = vpop.f32.mrf.mxu0  ;;  %v3760_v62 = vmul.f32 %v2104_v43, %v7513_v50  ;;  %v7079_v43 = vld [vmem:[%s9573_s1 + $0x260] sm:$0xff] }
 0x4d2   : > { %v5174_v20 = vadd.f32 %v5173_v61, %v3757_v58  ;;  %v5183_v41 = vadd.f32 %v5182_v2, %v3758_v16  ;;  %v3763_v40 = vmul.f32 %v1618_v33, %v7428_v28  ;;  %v5160_v36 = vrot.slane %v5159_v17, 2 }
 0x4d3   : > { %v5166_v5 = vadd.f32 %v5165_v60, %v3760_v62 }
 0x4d4   : > { %6689 = vmatmul.msk.bf16.gmra.mxu0 %vm990_vm0, %v7077_v30  ;;  %v5161_v58 = vadd.f32 %v5160_v36, %v5159_v17 }
 0x4d5   : > { %v5167_v60 = vrot.slane %v5166_v5, 4 }
 0x4d7   : > { %v2593_v25 = vpop.f32.mrf.mxu2  ;;  %v3082_v15 = vpop.f32.mrf.mxu3  ;;  %v5168_v16 = vadd.f32 %v5167_v60, %v5166_v5 }
 0x4d8   : > { %v3761_v51 = vmul.f32 %v2593_v25, %v7523_v4  ;;  %v2107_v34 = vpop.f32.mrf.mxu1  ;;  %v3762_v35 = vmul.f32 %v3082_v15, %v7525_v14 }
 0x4d9   : > { %v1620_v31 = vpop.f32.mrf.mxu0  ;;  %v3764_v10 = vmul.f32 %v2107_v34, %v7462_v26 }
 0x4da   : > { %v3767_v57 = vmul.f32 %v1620_v31, %v7430_v38  ;;  %v8941_v56 = vadd.f32 %v5174_v20, %v3761_v51  ;;  %v8943_v55 = vadd.f32 %v5183_v41, %v3762_v35  ;;  %v5169_v35 = vrot.slane %v5168_v16, 2 }
 0x4db   : > { %6785 = vmatmul.msk.bf16.gmra.mxu1 %vm990_vm0, %v7077_v30 }
 0x4dc   : > { %v5191_v23 = vadd.f32 %v3767_v57, %v3763_v40  ;;  %6881 = vmatmul.msk.bf16.gmra.mxu2 %vm990_vm0, %v7077_v30  ;;  %6977 = vmatmul.msk.bf16.gmra.mxu3 %vm990_vm0, %v7077_v30  ;;  %v5162_v57 = vrot.slane %v5161_v58, 1  ;;  %v5185_v5 = vrot.slane %v8943_v55, 4 }
 0x4de   : > { %v5163_v47 = vadd.f32 %v5162_v57, %v5161_v58  ;;  %v7080_v58 = vld [vmem:[%s9573_s1 + $0x268] sm:$0xff] }
 0x4df   : > { %v2596_v0 = vpop.f32.mrf.mxu2  ;;  %v3085_v39 = vpop.f32.mrf.mxu3 }
 0x4e0   : > { %v2109_v29 = vpop.f32.mrf.mxu1  ;;  %v3765_v49 = vmul.f32 %v2596_v0, %v7485_v6  ;;  %v3766_v42 = vmul.f32 %v3085_v39, %v7491_v9 }
 0x4e1   : > { %v1623_v32 = vpop.f32.mrf.mxu0  ;;  %v3768_v11 = vmul.f32 %v2109_v29, %v7464_v54 }
 0x4e2   : > { %v3771_v37 = vmul.f32 %v1623_v32, %v7446_v53 }
 0x4e3   : > { %v5200_v18 = vadd.f32 %v3768_v11, %v3764_v10  ;;  %v5170_v10 = vadd.f32 %v5169_v35, %v5168_v16 }
 0x4e4   : > { %v5192_v3 = vadd.f32 %v5191_v23, %v3771_v37  ;;  %6690 = vmatmul.msk.bf16.gmra.mxu0 %vm990_vm0, %v7078_v45  ;;  %v5176_v23 = vrot.slane %v8941_v56, 4 }
 0x4e6   : > { %v5177_v11 = vadd.f32 %v5176_v23, %v8941_v56 }
 0x4e7   : > { %v2598_v21 = vpop.f32.mrf.mxu2  ;;  %v3087_v44 = vpop.f32.mrf.mxu3 }
 0x4e8   : > { %v3769_v13 = vmul.f32 %v2598_v21, %v7487_v7  ;;  %v2112_v63 = vpop.f32.mrf.mxu1  ;;  %v3770_v59 = vmul.f32 %v3087_v44, %v7493_v24 }
 0x4e9   : > { %v1625_v52 = vpop.f32.mrf.mxu0  ;;  %v3772_v61 = vmul.f32 %v2112_v63, %v7489_v8 }
 0x4ea   : > { %v3775_v12 = vmul.f32 %v1625_v52, %v7477_v1  ;;  %v5209_v19 = vadd.f32 %v3769_v13, %v3765_v49  ;;  %v5218_v30 = vadd.f32 %v3770_v59, %v3766_v42  ;;  %v5171_v59 = vrot.slane %v5170_v10, 1 }
 0x4eb   : > { %v5201_v33 = vadd.f32 %v5200_v18, %v3772_v61  ;;  %6786 = vmatmul.msk.bf16.gmra.mxu1 %vm990_vm0, %v7078_v45 }
 0x4ec   : > { %v5193_v2 = vadd.f32 %v5192_v3, %v3775_v12  ;;  %6882 = vmatmul.msk.bf16.gmra.mxu2 %vm990_vm0, %v7078_v45  ;;  %6978 = vmatmul.msk.bf16.gmra.mxu3 %vm990_vm0, %v7078_v45  ;;  %v5186_v3 = vadd.f32 %v5185_v5, %v8943_v55  ;;  %v5178_v55 = vrot.slane %v5177_v11, 2 }
 0x4ee   : > { %v5194_v27 = vrot.slane %v5193_v2, 4  ;;  %v5179_v16 = vadd.f32 %v5178_v55, %v5177_v11 }
 0x4ef   : > { %v2601_v20 = vpop.f32.mrf.mxu2  ;;  %v3090_v25 = vpop.f32.mrf.mxu3 }
 0x4f0   : > { %v5195_v46 = vadd.f32 %v5194_v27, %v5193_v2  ;;  %v3773_v31 = vmul.f32 %v2601_v20, %v7505_v48  ;;  %v2114_v40 = vpop.f32.mrf.mxu1  ;;  %v3774_v51 = vmul.f32 %v3090_v25, %v7511_v22  ;;  %v5187_v2 = vrot.slane %v5186_v3, 2 }
 0x4f1   : > { %v1628_v62 = vpop.f32.mrf.mxu0  ;;  %v3776_v34 = vmul.f32 %v2114_v40, %v7513_v50 }
 0x4f2   : > { %v5196_v41 = vrot.slane %v5195_v46, 2  ;;  %v5210_v45 = vadd.f32 %v5209_v19, %v3773_v31  ;;  %v5219_v32 = vadd.f32 %v5218_v30, %v3774_v51  ;;  %v3779_v12 = vmul.f32 %v1628_v62, %v7428_v28 }
 0x4f3   : > { %v5202_v37 = vadd.f32 %v5201_v33, %v3776_v34 }
 0x4f4   : > { %v5197_v15 = vadd.f32 %v5196_v41, %v5195_v46  ;;  %6691 = vmatmul.msk.bf16.gmra.mxu0 %vm990_vm0, %v7079_v43  ;;  %v5172_v46 = vadd.f32 %v5171_v59, %v5170_v10  ;;  %v5188_v41 = vadd.f32 %v5187_v2, %v5186_v3 }
 0x4f5   : > { %v5203_v29 = vrot.slane %v5202_v37, 4 }
 0x4f6   : > { %v5198_v0 = vrot.slane %v5197_v15, 1 }
 0x4f7   : > { %v5204_v52 = vadd.f32 %v5203_v29, %v5202_v37  ;;  %v2603_v21 = vpop.f32.mrf.mxu2  ;;  %v3092_v13 = vpop.f32.mrf.mxu3  ;;  %v5189_v37 = vrot.slane %v5188_v41, 1 }
 0x4f8   : > { %v5199_v39 = vadd.f32 %v5198_v0, %v5197_v15  ;;  %v3777_v49 = vmul.f32 %v2603_v21, %v7523_v4  ;;  %v2117_v44 = vpop.f32.mrf.mxu1  ;;  %v3778_v42 = vmul.f32 %v3092_v13, %v7525_v14 }
 0x4f9   : > { %v1630_v18 = vpop.f32.mrf.mxu0  ;;  %v5205_v63 = vrot.slane %v5204_v52, 2  ;;  %v3780_v23 = vmul.f32 %v2117_v44, %v7462_v26 }
 0x4fa   : > { %v8976_v17 = vsel %vm5923_vm1, %v5199_v39, %v5163_v47  ;;  %v3783_v36 = vmul.f32 %v1630_v18, %v7430_v38  ;;  %v5211_v61 = vadd.f32 %v5210_v45, %v3777_v49  ;;  %v5220_v19 = vadd.f32 %v5219_v32, %v3778_v42 }
 0x4fb   : > { %v5206_v60 = vadd.f32 %v5205_v63, %v5204_v52  ;;  %6787 = vmatmul.msk.bf16.gmra.mxu1 %vm990_vm0, %v7079_v43  ;;  %v5180_v45 = vrot.slane %v5179_v16, 1  ;;  %v5190_v52 = vadd.f32 %v5189_v37, %v5188_v41 }
 0x4fc   : > { %v5227_v56 = vadd.f32 %v3783_v36, %v3779_v12  ;;  %v5212_v30 = vrot.slane %v5211_v61, 4  ;;  %6883 = vmatmul.msk.bf16.gmra.mxu2 %vm990_vm0, %v7079_v43  ;;  %v5221_v27 = vrot.slane %v5220_v19, 4  ;;  %6979 = vmatmul.msk.bf16.gmra.mxu3 %vm990_vm0, %v7079_v43 }
 0x4fd   : > { %v5207_v33 = vrot.slane %v5206_v60, 1  ;;  %v5181_v11 = vadd.f32 %v5180_v45, %v5179_v16 }
 0x4fe   : > { %v5213_v62 = vadd.f32 %v5212_v30, %v5211_v61  ;;  %v5222_v25 = vadd.f32 %v5221_v27, %v5220_v19 }
 0x4ff   : > { %v5208_v31 = vadd.f32 %v5207_v33, %v5206_v60  ;;  %v2606_v40 = vpop.f32.mrf.mxu2  ;;  %v3095_v15 = vpop.f32.mrf.mxu3 }
 0x500   : > { %v5214_v51 = vrot.slane %v5213_v62, 2  ;;  %v2119_v34 = vpop.f32.mrf.mxu1  ;;  %v5223_v43 = vrot.slane %v5222_v25, 2  ;;  %v3781_v13 = vmul.f32 %v2606_v40, %v7485_v6  ;;  %v3782_v44 = vmul.f32 %v3095_v15, %v7491_v9 }
 0x501   : > { %v1633_v20 = vpop.f32.mrf.mxu0  ;;  %v8990_v35 = vsel %vm5923_vm1, %v5208_v31, %v5172_v46  ;;  %v3784_v5 = vmul.f32 %v2119_v34, %v7464_v54  ;;  %v7081_v46 = vld [vmem:[%s9573_s1 + $0x270] sm:$0xff] }
 0x502   : > { %v3787_v57 = vmul.f32 %v1633_v20, %v7446_v53  ;;  %v5215_v32 = vadd.f32 %v5214_v51, %v5213_v62  ;;  %v5224_v47 = vadd.f32 %v5223_v43, %v5222_v25 }
 0x503   : > { %v5236_v39 = vadd.f32 %v3784_v5, %v3780_v23 }
 0x504   : > { %6692 = vmatmul.msk.bf16.gmra.mxu0 %vm990_vm0, %v7080_v58  ;;  %v5228_v0 = vadd.f32 %v5227_v56, %v3787_v57  ;;  %v5216_v29 = vrot.slane %v5215_v32, 1  ;;  %v5225_v10 = vrot.slane %v5224_v47, 1 }
 0x506   : > { %v5217_v3 = vadd.f32 %v5216_v29, %v5215_v32  ;;  %v5226_v21 = vadd.f32 %v5225_v10, %v5224_v47 }
 0x507   : > { %v2608_v12 = vpop.f32.mrf.mxu2  ;;  %v3097_v42 = vpop.f32.mrf.mxu3 }
 0x508   : > { %v8997_v49 = vsel %vm5923_vm1, %v5217_v3, %v5181_v11  ;;  %v3785_v63 = vmul.f32 %v2608_v12, %v7487_v7  ;;  %v2122_v56 = vpop.f32.mrf.mxu1  ;;  %v9003_v59 = vsel %vm5923_vm1, %v5226_v21, %v5190_v52  ;;  %v3786_v55 = vmul.f32 %v3097_v42, %v7493_v24 }
 0x509   : > { %v1635_v18 = vpop.f32.mrf.mxu0  ;;  %v3788_v61 = vmul.f32 %v2122_v56, %v7489_v8 }
 0x50a   : > { %v3791_v36 = vmul.f32 %v1635_v18, %v7477_v1  ;;  %v5245_v60 = vadd.f32 %v3785_v63, %v3781_v13  ;;  %v5254_v19 = vadd.f32 %v3786_v55, %v3782_v44  ;;  %v7082_v63 = vld [vmem:[%s9573_s1 + $0x278] sm:$0xff] }
 0x50b   : > { %v5237_v30 = vadd.f32 %v5236_v39, %v3788_v61  ;;  %6788 = vmatmul.msk.bf16.gmra.mxu1 %vm990_vm0, %v7080_v58 }
 0x50c   : > { %v5229_v2 = vadd.f32 %v5228_v0, %v3791_v36  ;;  %6884 = vmatmul.msk.bf16.gmra.mxu2 %vm990_vm0, %v7080_v58  ;;  %6980 = vmatmul.msk.bf16.gmra.mxu3 %vm990_vm0, %v7080_v58 }
 0x50e   : > { %v5230_v33 = vrot.slane %v5229_v2, 4 }
 0x50f   : > { %v2611_v62 = vpop.f32.mrf.mxu2  ;;  %v3100_v31 = vpop.f32.mrf.mxu3 }
 0x510   : > { %v5231_v27 = vadd.f32 %v5230_v33, %v5229_v2  ;;  %v3789_v41 = vmul.f32 %v2611_v62, %v7505_v48  ;;  %v2124_v25 = vpop.f32.mrf.mxu1  ;;  %v3790_v40 = vmul.f32 %v3100_v31, %v7511_v22 }
 0x511   : > { %v1638_v16 = vpop.f32.mrf.mxu0  ;;  %v3792_v51 = vmul.f32 %v2124_v25, %v7513_v50 }
 0x512   : > { %v5232_v20 = vrot.slane %v5231_v27, 2  ;;  %v5246_v58 = vadd.f32 %v5245_v60, %v3789_v41  ;;  %v5255_v15 = vadd.f32 %v5254_v19, %v3790_v40  ;;  %v3795_v47 = vmul.f32 %v1638_v16, %v7428_v28 }
 0x513   : > { %v5238_v43 = vadd.f32 %v5237_v30, %v3792_v51 }
 0x514   : > { %v5233_v57 = vadd.f32 %v5232_v20, %v5231_v27  ;;  %6693 = vmatmul.msk.bf16.gmra.mxu0 %vm990_vm0, %v7081_v46 }
 0x515   : > { %v5239_v5 = vrot.slane %v5238_v43, 4 }
 0x516   : > { %v5234_v34 = vrot.slane %v5233_v57, 1 }
 0x517   : > { %v5240_v0 = vadd.f32 %v5239_v5, %v5238_v43  ;;  %v2613_v37 = vpop.f32.mrf.mxu2  ;;  %v3102_v10 = vpop.f32.mrf.mxu3 }
 0x518   : > { %v5235_v23 = vadd.f32 %v5234_v34, %v5233_v57  ;;  %v3793_v29 = vmul.f32 %v2613_v37, %v7523_v4  ;;  %v2127_v11 = vpop.f32.mrf.mxu1  ;;  %v3794_v18 = vmul.f32 %v3102_v10, %v7525_v14 }
 0x519   : > { %v1640_v45 = vpop.f32.mrf.mxu0  ;;  %v5241_v3 = vrot.slane %v5240_v0, 2 }
 0x51a   : > { %v9019_v32 = vsel %vm5925_vm2, %v5235_v23, %v8976_v17  ;;  %v3799_v39 = vmul.f32 %v1640_v45, %v7430_v38  ;;  %v5247_v21 = vadd.f32 %v5246_v58, %v3793_v29  ;;  %v5256_v36 = vadd.f32 %v5255_v15, %v3794_v18 }
 0x51b   : > { %v5242_v12 = vadd.f32 %v5241_v3, %v5240_v0  ;;  %6789 = vmatmul.msk.bf16.gmra.mxu1 %vm990_vm0, %v7081_v46 }
 0x51c   : > { %v5263_v52 = vadd.f32 %v3799_v39, %v3795_v47  ;;  %v5248_v17 = vrot.slane %v5247_v21, 4  ;;  %6885 = vmatmul.msk.bf16.gmra.mxu2 %vm990_vm0, %v7081_v46  ;;  %v5257_v44 = vrot.slane %v5256_v36, 4  ;;  %6981 = vmatmul.msk.bf16.gmra.mxu3 %vm990_vm0, %v7081_v46  ;;  %v3796_v46 = vmul.f32 %v2127_v11, %v7462_v26 }
 0x51d   : > { %v5243_v13 = vrot.slane %v5242_v12, 1 }
 0x51e   : > { %v5249_v42 = vadd.f32 %v5248_v17, %v5247_v21  ;;  %v5258_v61 = vadd.f32 %v5257_v44, %v5256_v36 }
 0x51f   : > { %v5244_v55 = vadd.f32 %v5243_v13, %v5242_v12  ;;  %v2616_v2 = vpop.f32.mrf.mxu2  ;;  %v3105_v30 = vpop.f32.mrf.mxu3 }
 0x520   : > { %v5250_v19 = vrot.slane %v5249_v42, 2  ;;  %v2129_v33 = vpop.f32.mrf.mxu1  ;;  %v5259_v16 = vrot.slane %v5258_v61, 2  ;;  %v3797_v23 = vmul.f32 %v2616_v2, %v7485_v6  ;;  %v3798_v5 = vmul.f32 %v3105_v30, %v7491_v9 }
 0x521   : > { %v1643_v56 = vpop.f32.mrf.mxu0  ;;  %v9034_v27 = vsel %vm5925_vm2, %v5244_v55, %v8990_v35  ;;  %v3800_v62 = vmul.f32 %v2129_v33, %v7464_v54 }
 0x522   : > { %v3803_v60 = vmul.f32 %v1643_v56, %v7446_v53  ;;  %v5251_v20 = vadd.f32 %v5250_v19, %v5249_v42  ;;  %v5260_v31 = vadd.f32 %v5259_v16, %v5258_v61 }
 0x523   : > { %v5272_v25 = vadd.f32 %v3800_v62, %v3796_v46 }
 0x524   : > { %6694 = vmatmul.msk.bf16.gmra.mxu0 %vm990_vm0, %v7082_v63  ;;  %v5264_v41 = vadd.f32 %v5263_v52, %v3803_v60  ;;  %v5252_v40 = vrot.slane %v5251_v20, 1  ;;  %v5261_v57 = vrot.slane %v5260_v31, 1 }
 0x526   : > { %v5253_v51 = vadd.f32 %v5252_v40, %v5251_v20  ;;  %v5262_v15 = vadd.f32 %v5261_v57, %v5260_v31 }
 0x527   : > { %v2618_v34 = vpop.f32.mrf.mxu2  ;;  %v3107_v0 = vpop.f32.mrf.mxu3 }
 0x528   : > { %v9042_v43 = vsel %vm5925_vm2, %v5253_v51, %v8997_v49  ;;  %v3801_v45 = vmul.f32 %v2618_v34, %v7487_v7  ;;  %v2132_v37 = vpop.f32.mrf.mxu1  ;;  %v9049_v47 = vsel %vm5925_vm2, %v5262_v15, %v9003_v59  ;;  %v3802_v39 = vmul.f32 %v3107_v0, %v7493_v24  ;;  %v7083_v59 = vld [vmem:[%s9573_s1 + $0x280] sm:$0xff] }
 0x529   : > { %v1645_v58 = vpop.f32.mrf.mxu0  ;;  %v3804_v29 = vmul.f32 %v2132_v37, %v7489_v8 }
 0x52a   : > { %v3807_v35 = vmul.f32 %v1645_v58, %v7477_v1  ;;  %v5281_v11 = vadd.f32 %v3801_v45, %v3797_v23  ;;  %v5290_v49 = vadd.f32 %v3802_v39, %v3798_v5  ;;  %v7084_v45 = vld [vmem:[%s9573_s1 + $0x288] sm:$0xff] }
 0x52b   : > { %v5273_v3 = vadd.f32 %v5272_v25, %v3804_v29  ;;  %6790 = vmatmul.msk.bf16.gmra.mxu1 %vm990_vm0, %v7082_v63 }
 0x52c   : > { %v5265_v10 = vadd.f32 %v5264_v41, %v3807_v35  ;;  %6886 = vmatmul.msk.bf16.gmra.mxu2 %vm990_vm0, %v7082_v63  ;;  %6982 = vmatmul.msk.bf16.gmra.mxu3 %vm990_vm0, %v7082_v63 }
 0x52e   : > { %v5266_v18 = vrot.slane %v5265_v10, 4 }
 0x52f   : > { %v2621_v12 = vpop.f32.mrf.mxu2  ;;  %v3110_v13 = vpop.f32.mrf.mxu3 }
 0x530   : > { %v5267_v52 = vadd.f32 %v5266_v18, %v5265_v10  ;;  %v3805_v17 = vmul.f32 %v2621_v12, %v7505_v48  ;;  %v2134_v44 = vpop.f32.mrf.mxu1  ;;  %v3806_v42 = vmul.f32 %v3110_v13, %v7511_v22 }
 0x531   : > { %v1648_v21 = vpop.f32.mrf.mxu0  ;;  %v3808_v55 = vmul.f32 %v2134_v44, %v7513_v50 }
 0x532   : > { %v5268_v36 = vrot.slane %v5267_v52, 2  ;;  %v5282_v63 = vadd.f32 %v5281_v11, %v3805_v17  ;;  %v5291_v61 = vadd.f32 %v5290_v49, %v3806_v42  ;;  %v3811_v20 = vmul.f32 %v1648_v21, %v7428_v28 }
 0x533   : > { %v5274_v60 = vadd.f32 %v5273_v3, %v3808_v55 }
 0x534   : > { %v5269_v56 = vadd.f32 %v5268_v36, %v5267_v52  ;;  %6695 = vmatmul.msk.bf16.gmra.mxu0 %vm990_vm0, %v7083_v59 }
 0x535   : > { %v5275_v30 = vrot.slane %v5274_v60, 4 }
 0x536   : > { %v5270_v2 = vrot.slane %v5269_v56, 1 }
 0x537   : > { %v5276_v46 = vadd.f32 %v5275_v30, %v5274_v60  ;;  %v2623_v62 = vpop.f32.mrf.mxu2  ;;  %v3112_v25 = vpop.f32.mrf.mxu3 }
 0x538   : > { %v5271_v19 = vadd.f32 %v5270_v2, %v5269_v56  ;;  %v3809_v31 = vmul.f32 %v2623_v62, %v7523_v4  ;;  %v2137_v40 = vpop.f32.mrf.mxu1  ;;  %v3810_v51 = vmul.f32 %v3112_v25, %v7525_v14 }
 0x539   : > { %v1650_v33 = vpop.f32.mrf.mxu0  ;;  %v5277_v57 = vrot.slane %v5276_v46, 2 }
 0x53a   : > { %v9065_v16 = vsel %vm5927_vm3, %v5271_v19, %v9019_v32  ;;  %v3815_v41 = vmul.f32 %v1650_v33, %v7430_v38  ;;  %v5283_v15 = vadd.f32 %v5282_v63, %v3809_v31  ;;  %v5292_v35 = vadd.f32 %v5291_v61, %v3810_v51 }
 0x53b   : > { %v5278_v34 = vadd.f32 %v5277_v57, %v5276_v46  ;;  %6791 = vmatmul.msk.bf16.gmra.mxu1 %vm990_vm0, %v7083_v59 }
 0x53c   : > { %v5299_v58 = vadd.f32 %v3815_v41, %v3811_v20  ;;  %v5284_v32 = vrot.slane %v5283_v15, 4  ;;  %6887 = vmatmul.msk.bf16.gmra.mxu2 %vm990_vm0, %v7083_v59  ;;  %v5293_v5 = vrot.slane %v5292_v35, 4  ;;  %6983 = vmatmul.msk.bf16.gmra.mxu3 %vm990_vm0, %v7083_v59  ;;  %v3812_v59 = vmul.f32 %v2137_v40, %v7462_v26 }
 0x53d   : > { %v5279_v23 = vrot.slane %v5278_v34, 1 }
 0x53e   : > { %v5285_v0 = vadd.f32 %v5284_v32, %v5283_v15  ;;  %v5294_v29 = vadd.f32 %v5293_v5, %v5292_v35 }
 0x53f   : > { %v5280_v39 = vadd.f32 %v5279_v23, %v5278_v34  ;;  %v2626_v10 = vpop.f32.mrf.mxu2  ;;  %v3115_v3 = vpop.f32.mrf.mxu3 }
 0x540   : > { %v5286_v49 = vrot.slane %v5285_v0, 2  ;;  %v2139_v18 = vpop.f32.mrf.mxu1  ;;  %v5295_v21 = vrot.slane %v5294_v29, 2  ;;  %v3813_v19 = vmul.f32 %v2626_v10, %v7485_v6  ;;  %v3814_v30 = vmul.f32 %v3115_v3, %v7491_v9 }
 0x541   : > { %v1653_v37 = vpop.f32.mrf.mxu0  ;;  %v9080_v52 = vsel %vm5927_vm3, %v5280_v39, %v9034_v27  ;;  %v3816_v12 = vmul.f32 %v2139_v18, %v7464_v54 }
 0x542   : > { %v3819_v11 = vmul.f32 %v1653_v37, %v7446_v53  ;;  %v5287_v36 = vadd.f32 %v5286_v49, %v5285_v0  ;;  %v5296_v13 = vadd.f32 %v5295_v21, %v5294_v29 }
 0x543   : > { %v5308_v44 = vadd.f32 %v3816_v12, %v3812_v59 }
 0x544   : > { %6696 = vmatmul.msk.bf16.gmra.mxu0 %vm990_vm0, %v7084_v45  ;;  %v5300_v17 = vadd.f32 %v5299_v58, %v3819_v11  ;;  %v5288_v42 = vrot.slane %v5287_v36, 1  ;;  %v5297_v56 = vrot.slane %v5296_v13, 1 }
 0x546   : > { %v5289_v55 = vadd.f32 %v5288_v42, %v5287_v36  ;;  %v5298_v61 = vadd.f32 %v5297_v56, %v5296_v13 }
 0x547   : > { %v2628_v2 = vpop.f32.mrf.mxu2  ;;  %v3117_v46 = vpop.f32.mrf.mxu3 }
 0x548   : > { %v9088_v60 = vsel %vm5927_vm3, %v5289_v55, %v9042_v43  ;;  %v3817_v33 = vmul.f32 %v2628_v2, %v7487_v7  ;;  %v2142_v62 = vpop.f32.mrf.mxu1  ;;  %v9095_v20 = vsel %vm5927_vm3, %v5298_v61, %v9049_v47  ;;  %v3818_v41 = vmul.f32 %v3117_v46, %v7493_v24  ;;  %v7085_v47 = vld [vmem:[%s9573_s1 + $0x290] sm:$0xff] }
 0x549   : > { %v1655_v63 = vpop.f32.mrf.mxu0  ;;  %v3820_v31 = vmul.f32 %v2142_v62, %v7489_v8 }
 0x54a   : > { %v3823_v27 = vmul.f32 %v1655_v63, %v7477_v1  ;;  %v5317_v40 = vadd.f32 %v3817_v33, %v3813_v19  ;;  %v5326_v43 = vadd.f32 %v3818_v41, %v3814_v30  ;;  %v7086_v33 = vld [vmem:[%s9573_s1 + $0x298] sm:$0xff] }
 0x54b   : > { %v5309_v57 = vadd.f32 %v5308_v44, %v3820_v31  ;;  %6792 = vmatmul.msk.bf16.gmra.mxu1 %vm990_vm0, %v7084_v45 }
 0x54c   : > { %v5301_v25 = vadd.f32 %v5300_v17, %v3823_v27  ;;  %6888 = vmatmul.msk.bf16.gmra.mxu2 %vm990_vm0, %v7084_v45  ;;  %6984 = vmatmul.msk.bf16.gmra.mxu3 %vm990_vm0, %v7084_v45 }
 0x54e   : > { %v5302_v51 = vrot.slane %v5301_v25, 4 }
 0x54f   : > { %v2631_v34 = vpop.f32.mrf.mxu2  ;;  %v3120_v23 = vpop.f32.mrf.mxu3 }
 0x550   : > { %v5303_v58 = vadd.f32 %v5302_v51, %v5301_v25  ;;  %v3821_v32 = vmul.f32 %v2631_v34, %v7505_v48  ;;  %v2144_v5 = vpop.f32.mrf.mxu1  ;;  %v3822_v0 = vmul.f32 %v3120_v23, %v7511_v22 }
 0x551   : > { %v1658_v15 = vpop.f32.mrf.mxu0  ;;  %v3824_v39 = vmul.f32 %v2144_v5, %v7513_v50 }
 0x552   : > { %v5304_v35 = vrot.slane %v5303_v58, 2  ;;  %v5318_v45 = vadd.f32 %v5317_v40, %v3821_v32  ;;  %v5327_v29 = vadd.f32 %v5326_v43, %v3822_v0  ;;  %v3827_v36 = vmul.f32 %v1658_v15, %v7428_v28 }
 0x553   : > { %v5310_v11 = vadd.f32 %v5309_v57, %v3824_v39 }
 0x554   : > { %v5305_v37 = vadd.f32 %v5304_v35, %v5303_v58  ;;  %6697 = vmatmul.msk.bf16.gmra.mxu0 %vm990_vm0, %v7085_v47 }
 0x555   : > { %v5311_v3 = vrot.slane %v5310_v11, 4 }
 0x556   : > { %v5306_v10 = vrot.slane %v5305_v37, 1 }
 0x557   : > { %v5312_v59 = vadd.f32 %v5311_v3, %v5310_v11  ;;  %v2633_v12 = vpop.f32.mrf.mxu2  ;;  %v3122_v44 = vpop.f32.mrf.mxu3 }
 0x558   : > { %v5307_v49 = vadd.f32 %v5306_v10, %v5305_v37  ;;  %v3825_v13 = vmul.f32 %v2633_v12, %v7523_v4  ;;  %v2147_v42 = vpop.f32.mrf.mxu1  ;;  %v3826_v55 = vmul.f32 %v3122_v44, %v7525_v14 }
 0x559   : > { %v1660_v18 = vpop.f32.mrf.mxu0  ;;  %v5313_v56 = vrot.slane %v5312_v59, 2 }
 0x55a   : > { %v9111_v21 = vsel %vm5929_vm4, %v5307_v49, %v9065_v16  ;;  %v3831_v17 = vmul.f32 %v1660_v18, %v7430_v38  ;;  %v5319_v61 = vadd.f32 %v5318_v45, %v3825_v13  ;;  %v5328_v27 = vadd.f32 %v5327_v29, %v3826_v55 }
 0x55b   : > { %v5314_v2 = vadd.f32 %v5313_v56, %v5312_v59  ;;  %6793 = vmatmul.msk.bf16.gmra.mxu1 %vm990_vm0, %v7085_v47 }
 0x55c   : > { %v5335_v63 = vadd.f32 %v3831_v17, %v3827_v36  ;;  %v5320_v16 = vrot.slane %v5319_v61, 4  ;;  %6889 = vmatmul.msk.bf16.gmra.mxu2 %vm990_vm0, %v7085_v47  ;;  %v5329_v30 = vrot.slane %v5328_v27, 4  ;;  %6985 = vmatmul.msk.bf16.gmra.mxu3 %vm990_vm0, %v7085_v47  ;;  %v3828_v47 = vmul.f32 %v2147_v42, %v7462_v26 }
 0x55d   : > { %v5315_v19 = vrot.slane %v5314_v2, 1 }
 0x55e   : > { %v5321_v46 = vadd.f32 %v5320_v16, %v5319_v61  ;;  %v5330_v31 = vadd.f32 %v5329_v30, %v5328_v27 }
 0x55f   : > { %v5316_v41 = vadd.f32 %v5315_v19, %v5314_v2  ;;  %v2636_v25 = vpop.f32.mrf.mxu2  ;;  %v3125_v57 = vpop.f32.mrf.mxu3 }
 0x560   : > { %v5322_v43 = vrot.slane %v5321_v46, 2  ;;  %v2149_v51 = vpop.f32.mrf.mxu1  ;;  %v5331_v15 = vrot.slane %v5330_v31, 2  ;;  %v3829_v49 = vmul.f32 %v2636_v25, %v7485_v6  ;;  %v3830_v3 = vmul.f32 %v3125_v57, %v7491_v9 }
 0x561   : > { %v1663_v62 = vpop.f32.mrf.mxu0  ;;  %v9126_v58 = vsel %vm5929_vm4, %v5316_v41, %v9080_v52  ;;  %v3832_v34 = vmul.f32 %v2149_v51, %v7464_v54 }
 0x562   : > { %v3835_v40 = vmul.f32 %v1663_v62, %v7446_v53  ;;  %v5323_v35 = vadd.f32 %v5322_v43, %v5321_v46  ;;  %v5332_v23 = vadd.f32 %v5331_v15, %v5330_v31 }
 0x563   : > { %v5344_v5 = vadd.f32 %v3832_v34, %v3828_v47 }
 0x564   : > { %6698 = vmatmul.msk.bf16.gmra.mxu0 %vm990_vm0, %v7086_v33  ;;  %v5336_v32 = vadd.f32 %v5335_v63, %v3835_v40  ;;  %v5324_v0 = vrot.slane %v5323_v35, 1  ;;  %v5333_v37 = vrot.slane %v5332_v23, 1 }
 0x566   : > { %v5325_v39 = vadd.f32 %v5324_v0, %v5323_v35  ;;  %v5334_v29 = vadd.f32 %v5333_v37, %v5332_v23 }
 0x567   : > { %v2638_v10 = vpop.f32.mrf.mxu2  ;;  %v3127_v59 = vpop.f32.mrf.mxu3 }
 0x568   : > { %v9134_v11 = vsel %vm5929_vm4, %v5325_v39, %v9088_v60  ;;  %v3833_v18 = vmul.f32 %v2638_v10, %v7487_v7  ;;  %v2152_v12 = vpop.f32.mrf.mxu1  ;;  %v9141_v36 = vsel %vm5929_vm4, %v5334_v29, %v9095_v20  ;;  %v3834_v17 = vmul.f32 %v3127_v59, %v7493_v24  ;;  %v7087_v20 = vld [vmem:[%s9573_s1 + $0x2a0] sm:$0xff] }
 0x569   : > { %v1665_v45 = vpop.f32.mrf.mxu0  ;;  %v3836_v13 = vmul.f32 %v2152_v12, %v7489_v8 }
 0x56a   : > { %v3839_v52 = vmul.f32 %v1665_v45, %v7477_v1  ;;  %v5353_v42 = vadd.f32 %v3833_v18, %v3829_v49  ;;  %v5362_v60 = vadd.f32 %v3834_v17, %v3830_v3 }
 0x56b   : > { %v5345_v56 = vadd.f32 %v5344_v5, %v3836_v13  ;;  %6794 = vmatmul.msk.bf16.gmra.mxu1 %vm990_vm0, %v7086_v33 }
 0x56c   : > { %v5337_v44 = vadd.f32 %v5336_v32, %v3839_v52  ;;  %6890 = vmatmul.msk.bf16.gmra.mxu2 %vm990_vm0, %v7086_v33  ;;  %6986 = vmatmul.msk.bf16.gmra.mxu3 %vm990_vm0, %v7086_v33  ;;  %v7088_v52 = vld [vmem:[%s9573_s1 + $0x2a8] sm:$0xff] }
 0x56e   : > { %v5338_v55 = vrot.slane %v5337_v44, 4 }
 0x56f   : > { %v2641_v2 = vpop.f32.mrf.mxu2  ;;  %v3130_v19 = vpop.f32.mrf.mxu3 }
 0x570   : > { %v5339_v63 = vadd.f32 %v5338_v55, %v5337_v44  ;;  %v3837_v16 = vmul.f32 %v2641_v2, %v7505_v48  ;;  %v2154_v30 = vpop.f32.mrf.mxu1  ;;  %v3838_v46 = vmul.f32 %v3130_v19, %v7511_v22 }
 0x571   : > { %v9151_v61 = vpop.f32.mrf.mxu0  ;;  %v3840_v41 = vmul.f32 %v2154_v30, %v7513_v50 }
 0x572   : > { %v5340_v27 = vrot.slane %v5339_v63, 2  ;;  %v5354_v33 = vadd.f32 %v5353_v42, %v3837_v16  ;;  %v5363_v31 = vadd.f32 %v5362_v60, %v3838_v46 }
 0x573   : > { %v5346_v40 = vadd.f32 %v5345_v56, %v3840_v41  ;;  %v7089_v41 = vld [vmem:[%s9573_s1 + $0x2b0] sm:$0xff] }
 0x574   : > { %v5341_v62 = vadd.f32 %v5340_v27, %v5339_v63  ;;  %6699 = vmatmul.msk.bf16.gmra.mxu0 %vm990_vm0, %v7087_v20 }
 0x575   : > { %v5347_v57 = vrot.slane %v5346_v40, 4 }
 0x576   : > { %v5342_v25 = vrot.slane %v5341_v62, 1 }
 0x577   : > { %v5348_v47 = vadd.f32 %v5347_v57, %v5346_v40  ;;  %v2643_v34 = vpop.f32.mrf.mxu2  ;;  %v3132_v32 = vpop.f32.mrf.mxu3 }
 0x578   : > { %v5343_v43 = vadd.f32 %v5342_v25, %v5341_v62  ;;  %v3841_v35 = vmul.f32 %v2643_v34, %v7523_v4  ;;  %v2157_v23 = vpop.f32.mrf.mxu1  ;;  %v3842_v0 = vmul.f32 %v3132_v32, %v7525_v14 }
 0x579   : > { %v1670_v51 = vpop.f32.mrf.mxu0  ;;  %v5349_v5 = vrot.slane %v5348_v47, 2 }
 0x57a   : > { %v9159_v15 = vsel %vm5931_vm5, %v5343_v43, %v9111_v21  ;;  %v5355_v37 = vadd.f32 %v5354_v33, %v3841_v35  ;;  %v5364_v45 = vadd.f32 %v5363_v31, %v3842_v0  ;;  %v3847_v40 = vmul.f32 %v1670_v51, %v7430_v38 }
 0x57b   : > { %v5350_v39 = vadd.f32 %v5349_v5, %v5348_v47  ;;  %6795 = vmatmul.msk.bf16.gmra.mxu1 %vm990_vm0, %v7087_v20 }
 0x57c   : > { %v5356_v29 = vrot.slane %v5355_v37, 4  ;;  %6891 = vmatmul.msk.bf16.gmra.mxu2 %vm990_vm0, %v7087_v20  ;;  %v5365_v21 = vrot.slane %v5364_v45, 4  ;;  %6987 = vmatmul.msk.bf16.gmra.mxu3 %vm990_vm0, %v7087_v20 }
 0x57d   : > { %v5351_v10 = vrot.slane %v5350_v39, 1 }
 0x57e   : > { %v5357_v49 = vadd.f32 %v5356_v29, %v5355_v37  ;;  %v5366_v59 = vadd.f32 %v5365_v21, %v5364_v45  ;;  %v3844_v45 = vmul.f32 %v2157_v23, %v7462_v26 }
 0x57f   : > { %v5352_v18 = vadd.f32 %v5351_v10, %v5350_v39  ;;  %v2646_v12 = vpop.f32.mrf.mxu2  ;;  %v3135_v13 = vpop.f32.mrf.mxu3 }
 0x580   : > { %v5358_v17 = vrot.slane %v5357_v49, 2  ;;  %v2159_v44 = vpop.f32.mrf.mxu1  ;;  %v5367_v60 = vrot.slane %v5366_v59, 2 }
 0x581   : > { %v1673_v3 = vpop.f32.mrf.mxu0  ;;  %v9171_v42 = vsel %vm5931_vm5, %v5352_v18, %v9126_v58  ;;  %v3848_v51 = vmul.f32 %v2159_v44, %v7464_v54 }
 0x582   : > { %v5359_v56 = vadd.f32 %v5358_v17, %v5357_v49  ;;  %v5368_v55 = vadd.f32 %v5367_v60, %v5366_v59  ;;  %v3851_v43 = vmul.f32 %v1673_v3, %v7446_v53 }
 0x584   : > { %6700 = vmatmul.msk.bf16.gmra.mxu0 %vm990_vm0, %v7088_v52  ;;  %v5360_v63 = vrot.slane %v5359_v56, 1  ;;  %v5369_v20 = vrot.slane %v5368_v55, 1 }
 0x586   : > { %v5361_v2 = vadd.f32 %v5360_v63, %v5359_v56  ;;  %v5370_v16 = vadd.f32 %v5369_v20, %v5368_v55  ;;  %v3845_v56 = vmul.f32 %v2646_v12, %v7485_v6  ;;  %v3846_v20 = vmul.f32 %v3135_v13, %v7491_v9 }
 0x587   : > { %v2648_v19 = vpop.f32.mrf.mxu2  ;;  %v3137_v46 = vpop.f32.mrf.mxu3 }
 0x588   : > { %v9176_v30 = vsel %vm5931_vm5, %v5361_v2, %v9134_v11  ;;  %v2162_v62 = vpop.f32.mrf.mxu1  ;;  %v9180_v58 = vsel %vm5931_vm5, %v5370_v16, %v9141_v36  ;;  %v3843_v36 = vmul.f32 %v9151_v61, %v7428_v28  ;;  %v7090_v61 = vld [vmem:[%s9573_s1 + $0x2b8] sm:$0xff]  ;;  %v3849_v44 = vmul.f32 %v2648_v19, %v7487_v7 }
 0x589   : > { %v1675_v27 = vpop.f32.mrf.mxu0  ;;  %v3852_v29 = vmul.f32 %v2162_v62, %v7489_v8  ;;  %v3850_v23 = vmul.f32 %v3137_v46, %v7493_v24 }
 0x58a   : > { %v5371_v57 = vadd.f32 %v3847_v40, %v3843_v36  ;;  %v3855_v47 = vmul.f32 %v1675_v27, %v7477_v1 }
 0x58b   : > { %6796 = vmatmul.msk.bf16.gmra.mxu1 %vm990_vm0, %v7088_v52  ;;  %v5398_v19 = vadd.f32 %v3850_v23, %v3846_v20 }
 0x58c   : > { %6892 = vmatmul.msk.bf16.gmra.mxu2 %vm990_vm0, %v7088_v52  ;;  %6988 = vmatmul.msk.bf16.gmra.mxu3 %vm990_vm0, %v7088_v52  ;;  %v5372_v35 = vadd.f32 %v5371_v57, %v3851_v43  ;;  %v5380_v52 = vadd.f32 %v3848_v51, %v3844_v45 }
 0x58e   : > { %v5373_v37 = vadd.f32 %v5372_v35, %v3855_v47  ;;  %v5381_v60 = vadd.f32 %v5380_v52, %v3852_v29 }
 0x58f   : > { %v2651_v31 = vpop.f32.mrf.mxu2  ;;  %v3140_v11 = vpop.f32.mrf.mxu3 }
 0x590   : > { %v2164_v25 = vpop.f32.mrf.mxu1  ;;  %v5374_v39 = vrot.slane %v5373_v37, 4  ;;  %v3853_v2 = vmul.f32 %v2651_v31, %v7505_v48  ;;  %v3854_v27 = vmul.f32 %v3140_v11, %v7511_v22 }
 0x591   : > { %v1678_v33 = vpop.f32.mrf.mxu0  ;;  %v3856_v49 = vmul.f32 %v2164_v25, %v7513_v50  ;;  %v5389_v25 = vadd.f32 %v3849_v44, %v3845_v56 }
 0x592   : > { %v5375_v59 = vadd.f32 %v5374_v39, %v5373_v37  ;;  %v3859_v55 = vmul.f32 %v1678_v33, %v7428_v28  ;;  %v5399_v13 = vadd.f32 %v5398_v19, %v3854_v27 }
 0x593   : > { %v5382_v16 = vadd.f32 %v5381_v60, %v3856_v49  ;;  %v5390_v57 = vadd.f32 %v5389_v25, %v3853_v2  ;;  %v7091_v49 = vld [vmem:[%s9573_s1 + $0x2c0] sm:$0xff] }
 0x594   : > { %6701 = vmatmul.msk.bf16.gmra.mxu0 %vm990_vm0, %v7089_v41  ;;  %v5376_v62 = vrot.slane %v5375_v59, 2 }
 0x595   : > { %v5383_v47 = vrot.slane %v5382_v16, 4 }
 0x596   : > { %v5377_v11 = vadd.f32 %v5376_v62, %v5375_v59 }
 0x597   : > { %v2653_v32 = vpop.f32.mrf.mxu2  ;;  %v3142_v5 = vpop.f32.mrf.mxu3 }
 0x598   : > { %v2167_v0 = vpop.f32.mrf.mxu1  ;;  %v3857_v46 = vmul.f32 %v2653_v32, %v7523_v4  ;;  %v3858_v40 = vmul.f32 %v3142_v5, %v7525_v14  ;;  %v5384_v5 = vadd.f32 %v5383_v47, %v5382_v16  ;;  %v5378_v45 = vrot.slane %v5377_v11, 1 }
 0x599   : > { %v1680_v34 = vpop.f32.mrf.mxu0  ;;  %v3860_v29 = vmul.f32 %v2167_v0, %v7462_v26 }
 0x59a   : > { %v3863_v17 = vmul.f32 %v1680_v34, %v7430_v38  ;;  %v5391_v37 = vadd.f32 %v5390_v57, %v3857_v46  ;;  %v5400_v51 = vadd.f32 %v5399_v13, %v3858_v40  ;;  %v5385_v56 = vrot.slane %v5384_v5, 2 }
 0x59b   : > { %6797 = vmatmul.msk.bf16.gmra.mxu1 %vm990_vm0, %v7089_v41  ;;  %v5379_v20 = vadd.f32 %v5378_v45, %v5377_v11 }
 0x59c   : > { %6893 = vmatmul.msk.bf16.gmra.mxu2 %vm990_vm0, %v7089_v41  ;;  %6989 = vmatmul.msk.bf16.gmra.mxu3 %vm990_vm0, %v7089_v41  ;;  %v5407_v41 = vadd.f32 %v3863_v17, %v3859_v55  ;;  %v5392_v59 = vrot.slane %v5391_v37, 4  ;;  %v5386_v46 = vadd.f32 %v5385_v56, %v5384_v5 }
 0x59f   : > { %v9203_v21 = vpop.f32.mrf.mxu2  ;;  %v9206_v3 = vpop.f32.mrf.mxu3 }
 0x5a0   : > { %v2169_v18 = vpop.f32.mrf.mxu1  ;;  %v3861_v40 = vmul.f32 %v9203_v21, %v7485_v6 }
 0x5a1   : > { %v1683_v10 = vpop.f32.mrf.mxu0  ;;  %v3864_v39 = vmul.f32 %v2169_v18, %v7464_v54  ;;  %v5401_v18 = vrot.slane %v5400_v51, 4 }
 0x5a2   : > { %v3867_v63 = vmul.f32 %v1683_v10, %v7446_v53 }
 0x5a3   : > { %v5416_v44 = vadd.f32 %v3864_v39, %v3860_v29  ;;  %v5402_v16 = vadd.f32 %v5401_v18, %v5400_v51 }
 0x5a4   : > { %6702 = vmatmul.msk.bf16.gmra.mxu0 %vm990_vm0, %v7090_v61  ;;  %v5408_v33 = vadd.f32 %v5407_v41, %v3867_v63 }
 0x5a7   : > { %v2658_v36 = vpop.f32.mrf.mxu2  ;;  %v3147_v31 = vpop.f32.mrf.mxu3 }
 0x5a8   : > { %v2172_v34 = vpop.f32.mrf.mxu1  ;;  %v3865_v62 = vmul.f32 %v2658_v36, %v7487_v7  ;;  %v3866_v41 = vmul.f32 %v3147_v31, %v7493_v24  ;;  %v5403_v31 = vrot.slane %v5402_v16, 2 }
 0x5a9   : > { %v1685_v12 = vpop.f32.mrf.mxu0  ;;  %v3868_v10 = vmul.f32 %v2172_v34, %v7489_v8 }
 0x5aa   : > { %v3871_v43 = vmul.f32 %v1685_v12, %v7477_v1  ;;  %v3862_v12 = vmul.f32 %v9206_v3, %v7491_v9  ;;  %v5425_v34 = vadd.f32 %v3865_v62, %v3861_v40 }
 0x5ab   : > { %6798 = vmatmul.msk.bf16.gmra.mxu1 %vm990_vm0, %v7090_v61  ;;  %v5417_v0 = vadd.f32 %v5416_v44, %v3868_v10 }
 0x5ac   : > { %v5409_v35 = vadd.f32 %v5408_v33, %v3871_v43  ;;  %6894 = vmatmul.msk.bf16.gmra.mxu2 %vm990_vm0, %v7090_v61  ;;  %6990 = vmatmul.msk.bf16.gmra.mxu3 %vm990_vm0, %v7090_v61  ;;  %v5393_v61 = vadd.f32 %v5392_v59, %v5391_v37  ;;  %v6047_v43 = vsel %vm5933_vm6, %v5379_v20, %v9159_v15 }
 0x5ad   : > { %v5434_v11 = vadd.f32 %v3866_v41, %v3862_v12 }
 0x5ae   : > { %v5410_v32 = vrot.slane %v5409_v35, 4  ;;  %v5394_v47 = vrot.slane %v5393_v61, 2 }
 0x5af   : > { %v2661_v23 = vpop.f32.mrf.mxu2  ;;  %v3150_v55 = vpop.f32.mrf.mxu3 }
 0x5b0   : > { %v5411_v52 = vadd.f32 %v5410_v32, %v5409_v35  ;;  %v2174_v63 = vpop.f32.mrf.mxu1  ;;  %v3869_v33 = vmul.f32 %v2661_v23, %v7505_v48  ;;  %v3870_v57 = vmul.f32 %v3150_v55, %v7511_v22  ;;  %v5387_v32 = vrot.slane %v5386_v46, 1 }
 0x5b1   : > { %v1688_v17 = vpop.f32.mrf.mxu0  ;;  %v3872_v27 = vmul.f32 %v2174_v63, %v7513_v50  ;;  %v5395_v44 = vadd.f32 %v5394_v47, %v5393_v61 }
 0x5b2   : > { %v5412_v60 = vrot.slane %v5411_v52, 2  ;;  %v3875_v3 = vmul.f32 %v1688_v17, %v7428_v28  ;;  %v5426_v15 = vadd.f32 %v5425_v34, %v3869_v33  ;;  %v5435_v10 = vadd.f32 %v5434_v11, %v3870_v57 }
 0x5b3   : > { %v5418_v19 = vadd.f32 %v5417_v0, %v3872_v27  ;;  %v5388_v17 = vadd.f32 %v5387_v32, %v5386_v46  ;;  %v5396_v27 = vrot.slane %v5395_v44, 1 }
 0x5b4   : > { %v5413_v2 = vadd.f32 %v5412_v60, %v5411_v52  ;;  %6703 = vmatmul.msk.bf16.gmra.mxu0 %vm990_vm0, %v7091_v49  ;;  %v5404_v60 = vadd.f32 %v5403_v31, %v5402_v16 }
 0x5b5   : > { %v5419_v13 = vrot.slane %v5418_v19, 4  ;;  %v6054_v40 = vsel %vm5933_vm6, %v5388_v17, %v9171_v42  ;;  %v5397_v34 = vadd.f32 %v5396_v27, %v5395_v44 }
 0x5b6   : > { %v5414_v25 = vrot.slane %v5413_v2, 1  ;;  %v5405_v62 = vrot.slane %v5404_v60, 1 }
 0x5b7   : > { %v5420_v37 = vadd.f32 %v5419_v13, %v5418_v19  ;;  %v2663_v51 = vpop.f32.mrf.mxu2  ;;  %v3152_v45 = vpop.f32.mrf.mxu3 }
 0x5b8   : > { %v5415_v36 = vadd.f32 %v5414_v25, %v5413_v2  ;;  %v3873_v5 = vmul.f32 %v2663_v51, %v7523_v4  ;;  %v2177_v29 = vpop.f32.mrf.mxu1  ;;  %v3874_v59 = vmul.f32 %v3152_v45, %v7525_v14  ;;  %v7092_v2 = vld [vmem:[%s9573_s1 + $0x2c8] sm:$0xff]  ;;  %v5406_v11 = vadd.f32 %v5405_v62, %v5404_v60 }
 0x5b9   : > { %v1690_v35 = vpop.f32.mrf.mxu0  ;;  %v5421_v52 = vrot.slane %v5420_v37, 2 }
 0x5ba   : > { %v6048_v21 = vsel %vm5935_vm7, %v5415_v36, %v6047_v43  ;;  %v3879_v39 = vmul.f32 %v1690_v35, %v7430_v38  ;;  %v5427_v23 = vadd.f32 %v5426_v15, %v3873_v5  ;;  %v5436_v55 = vadd.f32 %v5435_v10, %v3874_v59 }
 0x5bb   : > { %6138 = vst [vmem:[%s7844_s21 + $0x80] sm:$0xff] %v6048_v21  ;;  %v5422_v56 = vadd.f32 %v5421_v52, %v5420_v37  ;;  %6799 = vmatmul.msk.bf16.gmra.mxu1 %vm990_vm0, %v7091_v49  ;;  %v3876_v36 = vmul.f32 %v2177_v29, %v7462_v26  ;;  %v6068_v32 = vsel %vm5933_vm6, %v5406_v11, %v9180_v58 }
 0x5bc   : > { %v5443_v18 = vadd.f32 %v3879_v39, %v3875_v3  ;;  %v5428_v63 = vrot.slane %v5427_v23, 4  ;;  %6895 = vmatmul.msk.bf16.gmra.mxu2 %vm990_vm0, %v7091_v49  ;;  %v5437_v0 = vrot.slane %v5436_v55, 4  ;;  %6991 = vmatmul.msk.bf16.gmra.mxu3 %vm990_vm0, %v7091_v49  ;;  %v6061_v39 = vsel %vm5933_vm6, %v5397_v34, %v9176_v30  ;;  %v7094_v34 = vld [vmem:[%s9573_s1 + $0x2d8] sm:$0xff] }
 0x5bd   : > { %v5423_v20 = vrot.slane %v5422_v56, 1 }
 0x5be   : > { %v5429_v61 = vadd.f32 %v5428_v63, %v5427_v23  ;;  %v5438_v25 = vadd.f32 %v5437_v0, %v5436_v55  ;;  %v7093_v63 = vld [vmem:[%s9573_s1 + $0x2d0] sm:$0xff] }
 0x5bf   : > { %v5424_v41 = vadd.f32 %v5423_v20, %v5422_v56  ;;  %v2666_v19 = vpop.f32.mrf.mxu2  ;;  %v3155_v33 = vpop.f32.mrf.mxu3 }
 0x5c0   : > { %v5430_v12 = vrot.slane %v5429_v61, 2  ;;  %v2179_v49 = vpop.f32.mrf.mxu1  ;;  %v5439_v57 = vrot.slane %v5438_v25, 2  ;;  %v3877_v10 = vmul.f32 %v2666_v19, %v7485_v6  ;;  %v3878_v52 = vmul.f32 %v3155_v33, %v7491_v9 }
 0x5c1   : > { %v1693_v16 = vpop.f32.mrf.mxu0  ;;  %v6055_v43 = vsel %vm5935_vm7, %v5424_v41, %v6054_v40  ;;  %v3880_v13 = vmul.f32 %v2179_v49, %v7464_v54 }
 0x5c2   : > { %v3883_v46 = vmul.f32 %v1693_v16, %v7446_v53  ;;  %6139 = vst [vmem:[%s7844_s21 + $0x88] sm:$0xff] %v6055_v43  ;;  %v5431_v47 = vadd.f32 %v5430_v12, %v5429_v61  ;;  %v5440_v35 = vadd.f32 %v5439_v57, %v5438_v25 }
 0x5c3   : > { %v5452_v21 = vadd.f32 %v3880_v13, %v3876_v36 }
 0x5c4   : > { %6704 = vmatmul.msk.bf16.gmra.mxu0 %vm990_vm0, %v7092_v2  ;;  %v5444_v31 = vadd.f32 %v5443_v18, %v3883_v46  ;;  %v5432_v42 = vrot.slane %v5431_v47, 1  ;;  %v5441_v37 = vrot.slane %v5440_v35, 1 }
 0x5c6   : > { %v5433_v51 = vadd.f32 %v5432_v42, %v5431_v47  ;;  %v5442_v15 = vadd.f32 %v5441_v37, %v5440_v35 }
 0x5c7   : > { %v2668_v5 = vpop.f32.mrf.mxu2  ;;  %v3157_v18 = vpop.f32.mrf.mxu3 }
 0x5c8   : > { %v6062_v29 = vsel %vm5935_vm7, %v5433_v51, %v6061_v39  ;;  %v3881_v59 = vmul.f32 %v2668_v5, %v7487_v7  ;;  %v2182_v44 = vpop.f32.mrf.mxu1  ;;  %v6069_v30 = vsel %vm5935_vm7, %v5442_v15, %v6068_v32  ;;  %v3882_v23 = vmul.f32 %v3157_v18, %v7493_v24 }
 0x5c9   : > { %v1695_v3 = vpop.f32.mrf.mxu0  ;;  %6140 = vst [vmem:[%s7844_s21 + $0x90] sm:$0xff] %v6062_v29  ;;  %v3884_v58 = vmul.f32 %v2182_v44, %v7489_v8 }
 0x5ca   : > { %v3887_v45 = vmul.f32 %v1695_v3, %v7477_v1  ;;  %6141 = vst [vmem:[%s7844_s21 + $0x98] sm:$0xff] %v6069_v30  ;;  %v5461_v56 = vadd.f32 %v3881_v59, %v3877_v10  ;;  %v5470_v55 = vadd.f32 %v3882_v23, %v3878_v52 }
 0x5cb   : > { %v5453_v17 = vadd.f32 %v5452_v21, %v3884_v58  ;;  %6800 = vmatmul.msk.bf16.gmra.mxu1 %vm990_vm0, %v7092_v2 }
 0x5cc   : > { %v5445_v60 = vadd.f32 %v5444_v31, %v3887_v45  ;;  %6896 = vmatmul.msk.bf16.gmra.mxu2 %vm990_vm0, %v7092_v2  ;;  %6992 = vmatmul.msk.bf16.gmra.mxu3 %vm990_vm0, %v7092_v2 }
 0x5ce   : > { %v5446_v42 = vrot.slane %v5445_v60, 4 }
 0x5cf   : > { %v2671_v0 = vpop.f32.mrf.mxu2  ;;  %v3160_v61 = vpop.f32.mrf.mxu3 }
 0x5d0   : > { %v3885_v27 = vmul.f32 %v2671_v0, %v7505_v48  ;;  %v2184_v16 = vpop.f32.mrf.mxu1  ;;  %v3886_v62 = vmul.f32 %v3160_v61, %v7511_v22  ;;  %v5447_v5 = vadd.f32 %v5446_v42, %v5445_v60 }
 0x5d1   : > { %v1698_v20 = vpop.f32.mrf.mxu0  ;;  %v3888_v41 = vmul.f32 %v2184_v16, %v7513_v50  ;;  %v7095_v16 = vld [vmem:[%s9573_s1 + $0x2e0] sm:$0xff] }
 0x5d2   : > { %v5462_v25 = vadd.f32 %v5461_v56, %v3885_v27  ;;  %v5471_v19 = vadd.f32 %v5470_v55, %v3886_v62  ;;  %v3891_v12 = vmul.f32 %v1698_v20, %v7428_v28  ;;  %v5448_v52 = vrot.slane %v5447_v5, 2 }
 0x5d3   : > { %v5454_v46 = vadd.f32 %v5453_v17, %v3888_v41 }
 0x5d4   : > { %6705 = vmatmul.msk.bf16.gmra.mxu0 %vm990_vm0, %v7093_v63  ;;  %v5449_v27 = vadd.f32 %v5448_v52, %v5447_v5 }
 0x5d5   : > { %v5455_v17 = vrot.slane %v5454_v46, 4 }
 0x5d7   : > { %v2673_v40 = vpop.f32.mrf.mxu2  ;;  %v3162_v43 = vpop.f32.mrf.mxu3  ;;  %v5456_v62 = vadd.f32 %v5455_v17, %v5454_v46 }
 0x5d8   : > { %v3889_v49 = vmul.f32 %v2673_v40, %v7523_v4  ;;  %v2187_v57 = vpop.f32.mrf.mxu1  ;;  %v3890_v36 = vmul.f32 %v3162_v43, %v7525_v14 }
 0x5d9   : > { %v1700_v2 = vpop.f32.mrf.mxu0  ;;  %v3892_v3 = vmul.f32 %v2187_v57, %v7462_v26 }
 0x5da   : > { %v3895_v33 = vmul.f32 %v1700_v2, %v7430_v38  ;;  %v9290_v47 = vadd.f32 %v5462_v25, %v3889_v49  ;;  %v9292_v31 = vadd.f32 %v5471_v19, %v3890_v36  ;;  %v5457_v36 = vrot.slane %v5456_v62, 2 }
 0x5db   : > { %6801 = vmatmul.msk.bf16.gmra.mxu1 %vm990_vm0, %v7093_v63 }
 0x5dc   : > { %v5479_v13 = vadd.f32 %v3895_v33, %v3891_v12  ;;  %6897 = vmatmul.msk.bf16.gmra.mxu2 %vm990_vm0, %v7093_v63  ;;  %6993 = vmatmul.msk.bf16.gmra.mxu3 %vm990_vm0, %v7093_v63  ;;  %v5450_v33 = vrot.slane %v5449_v27, 1  ;;  %v5473_v46 = vrot.slane %v9292_v31, 4 }
 0x5de   : > { %v5451_v42 = vadd.f32 %v5450_v33, %v5449_v27  ;;  %v7096_v27 = vld [vmem:[%s9573_s1 + $0x2e8] sm:$0xff] }
 0x5df   : > { %v2676_v35 = vpop.f32.mrf.mxu2  ;;  %v3165_v37 = vpop.f32.mrf.mxu3 }
 0x5e0   : > { %v2189_v51 = vpop.f32.mrf.mxu1  ;;  %v3893_v59 = vmul.f32 %v2676_v35, %v7485_v6  ;;  %v3894_v23 = vmul.f32 %v3165_v37, %v7491_v9 }
 0x5e1   : > { %v1703_v11 = vpop.f32.mrf.mxu0  ;;  %v3896_v39 = vmul.f32 %v2189_v51, %v7464_v54 }
 0x5e2   : > { %v3899_v21 = vmul.f32 %v1703_v11, %v7446_v53 }
 0x5e3   : > { %v5488_v15 = vadd.f32 %v3896_v39, %v3892_v3  ;;  %v5458_v3 = vadd.f32 %v5457_v36, %v5456_v62 }
 0x5e4   : > { %v5480_v32 = vadd.f32 %v5479_v13, %v3899_v21  ;;  %6706 = vmatmul.msk.bf16.gmra.mxu0 %vm990_vm0, %v7094_v34  ;;  %v5464_v13 = vrot.slane %v9290_v47, 4 }
 0x5e6   : > { %v5465_v39 = vadd.f32 %v5464_v13, %v9290_v47 }
 0x5e7   : > { %v2678_v29 = vpop.f32.mrf.mxu2  ;;  %v3167_v44 = vpop.f32.mrf.mxu3 }
 0x5e8   : > { %v3897_v18 = vmul.f32 %v2678_v29, %v7487_v7  ;;  %v2192_v30 = vpop.f32.mrf.mxu1  ;;  %v3898_v58 = vmul.f32 %v3167_v44, %v7493_v24 }
 0x5e9   : > { %v1705_v45 = vpop.f32.mrf.mxu0  ;;  %v3900_v56 = vmul.f32 %v2192_v30, %v7489_v8 }
 0x5ea   : > { %v3903_v10 = vmul.f32 %v1705_v45, %v7477_v1  ;;  %v5497_v60 = vadd.f32 %v3897_v18, %v3893_v59  ;;  %v5506_v63 = vadd.f32 %v3898_v58, %v3894_v23  ;;  %v5459_v58 = vrot.slane %v5458_v3, 1 }
 0x5eb   : > { %v5489_v20 = vadd.f32 %v5488_v15, %v3900_v56  ;;  %6802 = vmatmul.msk.bf16.gmra.mxu1 %vm990_vm0, %v7094_v34 }
 0x5ec   : > { %v5481_v55 = vadd.f32 %v5480_v32, %v3903_v10  ;;  %6898 = vmatmul.msk.bf16.gmra.mxu2 %vm990_vm0, %v7094_v34  ;;  %6994 = vmatmul.msk.bf16.gmra.mxu3 %vm990_vm0, %v7094_v34  ;;  %v5474_v32 = vadd.f32 %v5473_v46, %v9292_v31  ;;  %v5466_v31 = vrot.slane %v5465_v39, 2 }
 0x5ee   : > { %v5482_v0 = vrot.slane %v5481_v55, 4  ;;  %v5467_v62 = vadd.f32 %v5466_v31, %v5465_v39 }
 0x5ef   : > { %v2681_v25 = vpop.f32.mrf.mxu2  ;;  %v3170_v40 = vpop.f32.mrf.mxu3 }
 0x5f0   : > { %v5483_v61 = vadd.f32 %v5482_v0, %v5481_v55  ;;  %v3901_v2 = vmul.f32 %v2681_v25, %v7505_v48  ;;  %v2194_v12 = vpop.f32.mrf.mxu1  ;;  %v3902_v49 = vmul.f32 %v3170_v40, %v7511_v22  ;;  %v5475_v55 = vrot.slane %v5474_v32, 2 }
 0x5f1   : > { %v1708_v41 = vpop.f32.mrf.mxu0  ;;  %v3904_v57 = vmul.f32 %v2194_v12, %v7513_v50 }
 0x5f2   : > { %v5484_v19 = vrot.slane %v5483_v61, 2  ;;  %v5498_v34 = vadd.f32 %v5497_v60, %v3901_v2  ;;  %v5507_v11 = vadd.f32 %v5506_v63, %v3902_v49  ;;  %v3907_v10 = vmul.f32 %v1708_v41, %v7428_v28 }
 0x5f3   : > { %v5490_v21 = vadd.f32 %v5489_v20, %v3904_v57 }
 0x5f4   : > { %v5485_v43 = vadd.f32 %v5484_v19, %v5483_v61  ;;  %6707 = vmatmul.msk.bf16.gmra.mxu0 %vm990_vm0, %v7095_v16  ;;  %v5460_v61 = vadd.f32 %v5459_v58, %v5458_v3  ;;  %v5476_v19 = vadd.f32 %v5475_v55, %v5474_v32 }
 0x5f5   : > { %v5491_v51 = vrot.slane %v5490_v21, 4 }
 0x5f6   : > { %v5486_v35 = vrot.slane %v5485_v43, 1 }
 0x5f7   : > { %v5492_v45 = vadd.f32 %v5491_v51, %v5490_v21  ;;  %v2683_v29 = vpop.f32.mrf.mxu2  ;;  %v3172_v18 = vpop.f32.mrf.mxu3  ;;  %v5477_v21 = vrot.slane %v5476_v19, 1 }
 0x5f8   : > { %v5487_v37 = vadd.f32 %v5486_v35, %v5485_v43  ;;  %v3905_v59 = vmul.f32 %v2683_v29, %v7523_v4  ;;  %v2197_v44 = vpop.f32.mrf.mxu1  ;;  %v3906_v23 = vmul.f32 %v3172_v18, %v7525_v14 }
 0x5f9   : > { %v1710_v15 = vpop.f32.mrf.mxu0  ;;  %v5493_v30 = vrot.slane %v5492_v45, 2  ;;  %v3908_v13 = vmul.f32 %v2197_v44, %v7462_v26 }
 0x5fa   : > { %v9325_v5 = vsel %vm5923_vm1, %v5487_v37, %v5451_v42  ;;  %v3911_v52 = vmul.f32 %v1710_v15, %v7430_v38  ;;  %v5499_v56 = vadd.f32 %v5498_v34, %v3905_v59  ;;  %v5508_v60 = vadd.f32 %v5507_v11, %v3906_v23 }
 0x5fb   : > { %v5494_v17 = vadd.f32 %v5493_v30, %v5492_v45  ;;  %6803 = vmatmul.msk.bf16.gmra.mxu1 %vm990_vm0, %v7095_v16  ;;  %v5468_v34 = vrot.slane %v5467_v62, 1  ;;  %v5478_v45 = vadd.f32 %v5477_v21, %v5476_v19 }
 0x5fc   : > { %v5515_v47 = vadd.f32 %v3911_v52, %v3907_v10  ;;  %v5500_v63 = vrot.slane %v5499_v56, 4  ;;  %6899 = vmatmul.msk.bf16.gmra.mxu2 %vm990_vm0, %v7095_v16  ;;  %v5509_v0 = vrot.slane %v5508_v60, 4  ;;  %6995 = vmatmul.msk.bf16.gmra.mxu3 %vm990_vm0, %v7095_v16 }
 0x5fd   : > { %v5495_v20 = vrot.slane %v5494_v17, 1  ;;  %v5469_v39 = vadd.f32 %v5468_v34, %v5467_v62 }
 0x5fe   : > { %v5501_v41 = vadd.f32 %v5500_v63, %v5499_v56  ;;  %v5510_v40 = vadd.f32 %v5509_v0, %v5508_v60 }
 0x5ff   : > { %v5496_v2 = vadd.f32 %v5495_v20, %v5494_v17  ;;  %v2686_v12 = vpop.f32.mrf.mxu2  ;;  %v3175_v43 = vpop.f32.mrf.mxu3 }
 0x600   : > { %v5502_v49 = vrot.slane %v5501_v41, 2  ;;  %v2199_v57 = vpop.f32.mrf.mxu1  ;;  %v5511_v16 = vrot.slane %v5510_v40, 2  ;;  %v3909_v18 = vmul.f32 %v2686_v12, %v7485_v6  ;;  %v3910_v44 = vmul.f32 %v3175_v43, %v7491_v9 }
 0x601   : > { %v1713_v25 = vpop.f32.mrf.mxu0  ;;  %v9339_v36 = vsel %vm5923_vm1, %v5496_v2, %v5460_v61  ;;  %v3912_v46 = vmul.f32 %v2199_v57, %v7464_v54  ;;  %v7097_v61 = vld [vmem:[%s9573_s1 + $0x2f0] sm:$0xff] }
 0x602   : > { %v3915_v33 = vmul.f32 %v1713_v25, %v7446_v53  ;;  %v5503_v11 = vadd.f32 %v5502_v49, %v5501_v41  ;;  %v5512_v42 = vadd.f32 %v5511_v16, %v5510_v40 }
 0x603   : > { %v5524_v37 = vadd.f32 %v3912_v46, %v3908_v13 }
 0x604   : > { %6708 = vmatmul.msk.bf16.gmra.mxu0 %vm990_vm0, %v7096_v27  ;;  %v5516_v35 = vadd.f32 %v5515_v47, %v3915_v33  ;;  %v5504_v51 = vrot.slane %v5503_v11, 1  ;;  %v5513_v3 = vrot.slane %v5512_v42, 1 }
 0x606   : > { %v5505_v32 = vadd.f32 %v5504_v51, %v5503_v11  ;;  %v5514_v29 = vadd.f32 %v5513_v3, %v5512_v42 }
 0x607   : > { %v2688_v10 = vpop.f32.mrf.mxu2  ;;  %v3177_v23 = vpop.f32.mrf.mxu3 }
 0x608   : > { %v9346_v59 = vsel %vm5923_vm1, %v5505_v32, %v5469_v39  ;;  %v3913_v30 = vmul.f32 %v2688_v10, %v7487_v7  ;;  %v2202_v47 = vpop.f32.mrf.mxu1  ;;  %v9352_v58 = vsel %vm5923_vm1, %v5514_v29, %v5478_v45  ;;  %v3914_v31 = vmul.f32 %v3177_v23, %v7493_v24 }
 0x609   : > { %v1715_v15 = vpop.f32.mrf.mxu0  ;;  %v3916_v56 = vmul.f32 %v2202_v47, %v7489_v8 }
 0x60a   : > { %v3919_v52 = vmul.f32 %v1715_v15, %v7477_v1  ;;  %v5533_v17 = vadd.f32 %v3913_v30, %v3909_v18  ;;  %v5542_v60 = vadd.f32 %v3914_v31, %v3910_v44  ;;  %v7098_v30 = vld [vmem:[%s9573_s1 + $0x2f8] sm:$0xff] }
 0x60b   : > { %v5525_v63 = vadd.f32 %v5524_v37, %v3916_v56  ;;  %6804 = vmatmul.msk.bf16.gmra.mxu1 %vm990_vm0, %v7096_v27 }
 0x60c   : > { %v5517_v55 = vadd.f32 %v5516_v35, %v3919_v52  ;;  %6900 = vmatmul.msk.bf16.gmra.mxu2 %vm990_vm0, %v7096_v27  ;;  %6996 = vmatmul.msk.bf16.gmra.mxu3 %vm990_vm0, %v7096_v27 }
 0x60e   : > { %v5518_v20 = vrot.slane %v5517_v55, 4 }
 0x60f   : > { %v2691_v41 = vpop.f32.mrf.mxu2  ;;  %v3180_v2 = vpop.f32.mrf.mxu3 }
 0x610   : > { %v5519_v0 = vadd.f32 %v5518_v20, %v5517_v55  ;;  %v3917_v19 = vmul.f32 %v2691_v41, %v7505_v48  ;;  %v2204_v40 = vpop.f32.mrf.mxu1  ;;  %v3918_v12 = vmul.f32 %v3180_v2, %v7511_v22 }
 0x611   : > { %v1718_v62 = vpop.f32.mrf.mxu0  ;;  %v3920_v49 = vmul.f32 %v2204_v40, %v7513_v50 }
 0x612   : > { %v5520_v25 = vrot.slane %v5519_v0, 2  ;;  %v5534_v27 = vadd.f32 %v5533_v17, %v3917_v19  ;;  %v5543_v43 = vadd.f32 %v5542_v60, %v3918_v12  ;;  %v3923_v42 = vmul.f32 %v1718_v62, %v7428_v28 }
 0x613   : > { %v5526_v16 = vadd.f32 %v5525_v63, %v3920_v49 }
 0x614   : > { %v5521_v33 = vadd.f32 %v5520_v25, %v5519_v0  ;;  %6709 = vmatmul.msk.bf16.gmra.mxu0 %vm990_vm0, %v7097_v61 }
 0x615   : > { %v5527_v46 = vrot.slane %v5526_v16, 4 }
 0x616   : > { %v5522_v57 = vrot.slane %v5521_v33, 1 }
 0x617   : > { %v5528_v35 = vadd.f32 %v5527_v46, %v5526_v16  ;;  %v2693_v21 = vpop.f32.mrf.mxu2  ;;  %v3182_v3 = vpop.f32.mrf.mxu3 }
 0x618   : > { %v5523_v13 = vadd.f32 %v5522_v57, %v5521_v33  ;;  %v3921_v51 = vmul.f32 %v2693_v21, %v7523_v4  ;;  %v2207_v39 = vpop.f32.mrf.mxu1  ;;  %v3922_v15 = vmul.f32 %v3182_v3, %v7525_v14 }
 0x619   : > { %v1720_v34 = vpop.f32.mrf.mxu0  ;;  %v5529_v32 = vrot.slane %v5528_v35, 2 }
 0x61a   : > { %v9368_v11 = vsel %vm5925_vm2, %v5523_v13, %v9325_v5  ;;  %v3927_v37 = vmul.f32 %v1720_v34, %v7430_v38  ;;  %v5535_v29 = vadd.f32 %v5534_v27, %v3921_v51  ;;  %v5544_v52 = vadd.f32 %v5543_v43, %v3922_v15 }
 0x61b   : > { %v5530_v10 = vadd.f32 %v5529_v32, %v5528_v35  ;;  %6805 = vmatmul.msk.bf16.gmra.mxu1 %vm990_vm0, %v7097_v61 }
 0x61c   : > { %v5551_v45 = vadd.f32 %v3927_v37, %v3923_v42  ;;  %v5536_v5 = vrot.slane %v5535_v29, 4  ;;  %6901 = vmatmul.msk.bf16.gmra.mxu2 %vm990_vm0, %v7097_v61  ;;  %v5545_v44 = vrot.slane %v5544_v52, 4  ;;  %6997 = vmatmul.msk.bf16.gmra.mxu3 %vm990_vm0, %v7097_v61  ;;  %v3924_v61 = vmul.f32 %v2207_v39, %v7462_v26 }
 0x61d   : > { %v5531_v18 = vrot.slane %v5530_v10, 1 }
 0x61e   : > { %v5537_v23 = vadd.f32 %v5536_v5, %v5535_v29  ;;  %v5546_v56 = vadd.f32 %v5545_v44, %v5544_v52 }
 0x61f   : > { %v5532_v31 = vadd.f32 %v5531_v18, %v5530_v10  ;;  %v2696_v55 = vpop.f32.mrf.mxu2  ;;  %v3185_v63 = vpop.f32.mrf.mxu3 }
 0x620   : > { %v5538_v60 = vrot.slane %v5537_v23, 2  ;;  %v2209_v20 = vpop.f32.mrf.mxu1  ;;  %v5547_v62 = vrot.slane %v5546_v56, 2  ;;  %v3925_v13 = vmul.f32 %v2696_v55, %v7485_v6  ;;  %v3926_v46 = vmul.f32 %v3185_v63, %v7491_v9 }
 0x621   : > { %v1723_v47 = vpop.f32.mrf.mxu0  ;;  %v9383_v0 = vsel %vm5925_vm2, %v5532_v31, %v9339_v36  ;;  %v3928_v41 = vmul.f32 %v2209_v20, %v7464_v54 }
 0x622   : > { %v3931_v17 = vmul.f32 %v1723_v47, %v7446_v53  ;;  %v5539_v25 = vadd.f32 %v5538_v60, %v5537_v23  ;;  %v5548_v2 = vadd.f32 %v5547_v62, %v5546_v56 }
 0x623   : > { %v5560_v40 = vadd.f32 %v3928_v41, %v3924_v61 }
 0x624   : > { %6710 = vmatmul.msk.bf16.gmra.mxu0 %vm990_vm0, %v7098_v30  ;;  %v5552_v19 = vadd.f32 %v5551_v45, %v3931_v17  ;;  %v5540_v12 = vrot.slane %v5539_v25, 1  ;;  %v5549_v33 = vrot.slane %v5548_v2, 1 }
 0x626   : > { %v5541_v49 = vadd.f32 %v5540_v12, %v5539_v25  ;;  %v5550_v43 = vadd.f32 %v5549_v33, %v5548_v2 }
 0x627   : > { %v2698_v57 = vpop.f32.mrf.mxu2  ;;  %v3187_v35 = vpop.f32.mrf.mxu3 }
 0x628   : > { %v9391_v16 = vsel %vm5925_vm2, %v5541_v49, %v9346_v59  ;;  %v3929_v34 = vmul.f32 %v2698_v57, %v7487_v7  ;;  %v2212_v21 = vpop.f32.mrf.mxu1  ;;  %v9398_v42 = vsel %vm5925_vm2, %v5550_v43, %v9352_v58  ;;  %v3930_v37 = vmul.f32 %v3187_v35, %v7493_v24 }
 0x629   : > { %v1725_v27 = vpop.f32.mrf.mxu0  ;;  %v3932_v51 = vmul.f32 %v2212_v21, %v7489_v8 }
 0x62a   : > { %v3935_v36 = vmul.f32 %v1725_v27, %v7477_v1  ;;  %v5569_v39 = vadd.f32 %v3929_v34, %v3925_v13  ;;  %v5578_v59 = vadd.f32 %v3930_v37, %v3926_v46 }
 0x62b   : > { %v5561_v32 = vadd.f32 %v5560_v40, %v3932_v51  ;;  %6806 = vmatmul.msk.bf16.gmra.mxu1 %vm990_vm0, %v7098_v30 }
 0x62c   : > { %v5553_v3 = vadd.f32 %v5552_v19, %v3935_v36  ;;  %6902 = vmatmul.msk.bf16.gmra.mxu2 %vm990_vm0, %v7098_v30  ;;  %6998 = vmatmul.msk.bf16.gmra.mxu3 %vm990_vm0, %v7098_v30 }
 0x62e   : > { %v5554_v15 = vrot.slane %v5553_v3, 4 }
 0x62f   : > { %v2701_v10 = vpop.f32.mrf.mxu2  ;;  %v3190_v5 = vpop.f32.mrf.mxu3 }
 0x630   : > { %v5555_v45 = vadd.f32 %v5554_v15, %v5553_v3  ;;  %v3933_v52 = vmul.f32 %v2701_v10, %v7505_v48  ;;  %v2214_v18 = vpop.f32.mrf.mxu1  ;;  %v3934_v44 = vmul.f32 %v3190_v5, %v7511_v22 }
 0x631   : > { %v1728_v29 = vpop.f32.mrf.mxu0  ;;  %v3936_v47 = vmul.f32 %v2214_v18, %v7513_v50 }
 0x632   : > { %v5556_v58 = vrot.slane %v5555_v45, 2  ;;  %v5570_v31 = vadd.f32 %v5569_v39, %v3933_v52  ;;  %v5579_v56 = vadd.f32 %v5578_v59, %v3934_v44  ;;  %v3939_v41 = vmul.f32 %v1728_v29, %v7428_v28 }
 0x633   : > { %v5562_v17 = vadd.f32 %v5561_v32, %v3936_v47 }
 0x634   : > { %v5557_v23 = vadd.f32 %v5556_v58, %v5555_v45 }
 0x635   : > { %v5563_v63 = vrot.slane %v5562_v17, 4 }
 0x636   : > { %v5558_v55 = vrot.slane %v5557_v23, 1 }
 0x637   : > { %v5564_v62 = vadd.f32 %v5563_v63, %v5562_v17  ;;  %v2703_v61 = vpop.f32.mrf.mxu2  ;;  %v3192_v2 = vpop.f32.mrf.mxu3 }
 0x638   : > { %v5559_v60 = vadd.f32 %v5558_v55, %v5557_v23  ;;  %v3937_v19 = vmul.f32 %v2703_v61, %v7523_v4  ;;  %v2217_v40 = vpop.f32.mrf.mxu1  ;;  %v3938_v33 = vmul.f32 %v3192_v2, %v7525_v14 }
 0x639   : > { %v1730_v30 = vpop.f32.mrf.mxu0  ;;  %v5565_v12 = vrot.slane %v5564_v62, 2  ;;  %v3940_v45 = vmul.f32 %v2217_v40, %v7462_v26 }
 0x63a   : > { %v9410_v20 = vsel %vm5927_vm3, %v5559_v60, %v9368_v11  ;;  %v3943_v25 = vmul.f32 %v1730_v30, %v7430_v38  ;;  %v5571_v27 = vadd.f32 %v5570_v31, %v3937_v19  ;;  %v5580_v57 = vadd.f32 %v5579_v56, %v3938_v33 }
 0x63b   : > { %v5566_v43 = vadd.f32 %v5565_v12, %v5564_v62 }
 0x63c   : > { %v5587_v49 = vadd.f32 %v3943_v25, %v3939_v41  ;;  %v5572_v36 = vrot.slane %v5571_v27, 4  ;;  %v5581_v13 = vrot.slane %v5580_v57, 4 }
 0x63d   : > { %v5567_v11 = vrot.slane %v5566_v43, 1 }
 0x63e   : > { %v5573_v46 = vadd.f32 %v5572_v36, %v5571_v27  ;;  %v5582_v21 = vadd.f32 %v5581_v13, %v5580_v57 }
 0x63f   : > { %v5568_v35 = vadd.f32 %v5567_v11, %v5566_v43  ;;  %v2706_v37 = vpop.f32.mrf.mxu2  ;;  %v3195_v39 = vpop.f32.mrf.mxu3 }
 0x640   : > { %v5574_v3 = vrot.slane %v5573_v46, 2  ;;  %v2219_v59 = vpop.f32.mrf.mxu1  ;;  %v5583_v15 = vrot.slane %v5582_v21, 2  ;;  %v3941_v17 = vmul.f32 %v2706_v37, %v7485_v6  ;;  %v3942_v60 = vmul.f32 %v3195_v39, %v7491_v9 }
 0x641   : > { %v1733_v34 = vpop.f32.mrf.mxu0  ;;  %v9419_v32 = vsel %vm5927_vm3, %v5568_v35, %v9383_v0  ;;  %v3944_v29 = vmul.f32 %v2219_v59, %v7464_v54 }
 0x642   : > { %v3947_v51 = vmul.f32 %v1733_v34, %v7446_v53  ;;  %v5575_v10 = vadd.f32 %v5574_v3, %v5573_v46  ;;  %v5584_v52 = vadd.f32 %v5583_v15, %v5582_v21 }
 0x643   : > { %v5596_v5 = vadd.f32 %v3944_v29, %v3940_v45 }
 0x644   : > { %v5588_v58 = vadd.f32 %v5587_v49, %v3947_v51  ;;  %v5576_v18 = vrot.slane %v5575_v10, 1  ;;  %v5585_v44 = vrot.slane %v5584_v52, 1 }
 0x646   : > { %v5577_v23 = vadd.f32 %v5576_v18, %v5575_v10  ;;  %v5586_v31 = vadd.f32 %v5585_v44, %v5584_v52 }
 0x647   : > { %v2708_v56 = vpop.f32.mrf.mxu2  ;;  %v3197_v30 = vpop.f32.mrf.mxu3 }
 0x648   : > { %v9426_v0 = vsel %vm5927_vm3, %v5577_v23, %v9391_v16  ;;  %v3945_v63 = vmul.f32 %v2708_v56, %v7487_v7  ;;  %v2222_v62 = vpop.f32.mrf.mxu1  ;;  %v9433_v61 = vsel %vm5927_vm3, %v5586_v31, %v9398_v42  ;;  %v3946_v41 = vmul.f32 %v3197_v30, %v7493_v24 }
 0x649   : > { %v1735_v47 = vpop.f32.mrf.mxu0  ;;  %v3948_v25 = vmul.f32 %v2222_v62, %v7489_v8 }
 0x64a   : > { %v3951_v55 = vmul.f32 %v1735_v47, %v7477_v1  ;;  %v5605_v2 = vadd.f32 %v3945_v63, %v3941_v17  ;;  %v5614_v16 = vadd.f32 %v3946_v41, %v3942_v60 }
 0x64b   : > { %v5597_v40 = vadd.f32 %v5596_v5, %v3948_v25 }
 0x64c   : > { %v5589_v19 = vadd.f32 %v5588_v58, %v3951_v55 }
 0x64e   : > { %v5590_v12 = vrot.slane %v5589_v19, 4 }
 0x64f   : > { %v2711_v27 = vpop.f32.mrf.mxu2  ;;  %v3200_v36 = vpop.f32.mrf.mxu3 }
 0x650   : > { %v5591_v33 = vadd.f32 %v5590_v12, %v5589_v19  ;;  %v3949_v57 = vmul.f32 %v2711_v27, %v7505_v48  ;;  %v2224_v11 = vpop.f32.mrf.mxu1  ;;  %v3950_v42 = vmul.f32 %v3200_v36, %v7511_v22 }
 0x651   : > { %v1738_v49 = vpop.f32.mrf.mxu0  ;;  %v3952_v46 = vmul.f32 %v2224_v11, %v7513_v50 }
 0x652   : > { %v5592_v43 = vrot.slane %v5591_v33, 2  ;;  %v5606_v34 = vadd.f32 %v5605_v2, %v3949_v57  ;;  %v5615_v35 = vadd.f32 %v5614_v16, %v3950_v42  ;;  %v3955_v29 = vmul.f32 %v1738_v49, %v7428_v28 }
 0x653   : > { %v5598_v37 = vadd.f32 %v5597_v40, %v3952_v46 }
 0x654   : > { %v5593_v13 = vadd.f32 %v5592_v43, %v5591_v33 }
 0x655   : > { %v5599_v3 = vrot.slane %v5598_v37, 4 }
 0x656   : > { %v5594_v21 = vrot.slane %v5593_v13, 1 }
 0x657   : > { %v5600_v15 = vadd.f32 %v5599_v3, %v5598_v37  ;;  %v2713_v45 = vpop.f32.mrf.mxu2  ;;  %v3202_v52 = vpop.f32.mrf.mxu3 }
 0x658   : > { %v5595_v51 = vadd.f32 %v5594_v21, %v5593_v13  ;;  %v3953_v58 = vmul.f32 %v2713_v45, %v7523_v4  ;;  %v2227_v5 = vpop.f32.mrf.mxu1  ;;  %v3954_v44 = vmul.f32 %v3202_v52, %v7525_v14 }
 0x659   : > { %v1740_v39 = vpop.f32.mrf.mxu0  ;;  %v5601_v18 = vrot.slane %v5600_v15, 2  ;;  %v3956_v33 = vmul.f32 %v2227_v5, %v7462_v26 }
 0x65a   : > { %v9442_v59 = vsel %vm5929_vm4, %v5595_v51, %v9410_v20  ;;  %v3959_v10 = vmul.f32 %v1740_v39, %v7430_v38  ;;  %v5607_v47 = vadd.f32 %v5606_v34, %v3953_v58  ;;  %v5616_v56 = vadd.f32 %v5615_v35, %v3954_v44 }
 0x65b   : > { %v5602_v31 = vadd.f32 %v5601_v18, %v5600_v15 }
 0x65c   : > { %v5623_v23 = vadd.f32 %v3959_v10, %v3955_v29  ;;  %v5608_v55 = vrot.slane %v5607_v47, 4  ;;  %v5617_v17 = vrot.slane %v5616_v56, 4 }
 0x65d   : > { %v5603_v20 = vrot.slane %v5602_v31, 1 }
 0x65e   : > { %v5609_v60 = vadd.f32 %v5608_v55, %v5607_v47  ;;  %v5618_v62 = vadd.f32 %v5617_v17, %v5616_v56 }
 0x65f   : > { %v5604_v30 = vadd.f32 %v5603_v20, %v5602_v31  ;;  %v2716_v41 = vpop.f32.mrf.mxu2  ;;  %v3205_v2 = vpop.f32.mrf.mxu3 }
 0x660   : > { %v5610_v19 = vrot.slane %v5609_v60, 2  ;;  %v2229_v16 = vpop.f32.mrf.mxu1  ;;  %v5619_v12 = vrot.slane %v5618_v62, 2  ;;  %v3957_v37 = vmul.f32 %v2716_v41, %v7485_v6  ;;  %v3958_v51 = vmul.f32 %v3205_v2, %v7491_v9 }
 0x661   : > { %v1743_v63 = vpop.f32.mrf.mxu0  ;;  %v9451_v40 = vsel %vm5929_vm4, %v5604_v30, %v9419_v32  ;;  %v3960_v49 = vmul.f32 %v2229_v16, %v7464_v54 }
 0x662   : > { %v3963_v25 = vmul.f32 %v1743_v63, %v7446_v53  ;;  %v5611_v27 = vadd.f32 %v5610_v19, %v5609_v60  ;;  %v5620_v57 = vadd.f32 %v5619_v12, %v5618_v62 }
 0x663   : > { %v5632_v36 = vadd.f32 %v3960_v49, %v3956_v33 }
 0x664   : > { %v5624_v43 = vadd.f32 %v5623_v23, %v3963_v25  ;;  %v5612_v11 = vrot.slane %v5611_v27, 1  ;;  %v5621_v42 = vrot.slane %v5620_v57, 1 }
 0x666   : > { %v5613_v13 = vadd.f32 %v5612_v11, %v5611_v27  ;;  %v5622_v34 = vadd.f32 %v5621_v42, %v5620_v57 }
 0x667   : > { %v2718_v35 = vpop.f32.mrf.mxu2  ;;  %v3207_v39 = vpop.f32.mrf.mxu3 }
 0x668   : > { %v9458_v32 = vsel %vm5929_vm4, %v5613_v13, %v9426_v0  ;;  %v3961_v3 = vmul.f32 %v2718_v35, %v7487_v7  ;;  %v2232_v15 = vpop.f32.mrf.mxu1  ;;  %v6094_v45 = vsel %vm5929_vm4, %v5622_v34, %v9433_v61  ;;  %v3962_v29 = vmul.f32 %v3207_v39, %v7493_v24 }
 0x669   : > { %v1745_v46 = vpop.f32.mrf.mxu0  ;;  %v3964_v10 = vmul.f32 %v2232_v15, %v7489_v8 }
 0x66a   : > { %v3967_v21 = vmul.f32 %v1745_v46, %v7477_v1  ;;  %v5641_v52 = vadd.f32 %v3961_v3, %v3957_v37  ;;  %v5650_v5 = vadd.f32 %v3962_v29, %v3958_v51 }
 0x66b   : > { %v5633_v0 = vadd.f32 %v5632_v36, %v3964_v10 }
 0x66c   : > { %v5625_v58 = vadd.f32 %v5624_v43, %v3967_v21 }
 0x66e   : > { %v5626_v18 = vrot.slane %v5625_v58, 4 }
 0x66f   : > { %v2721_v47 = vpop.f32.mrf.mxu2  ;;  %v3210_v55 = vpop.f32.mrf.mxu3 }
 0x670   : > { %v5627_v44 = vadd.f32 %v5626_v18, %v5625_v58  ;;  %v3965_v56 = vmul.f32 %v2721_v47, %v7505_v48  ;;  %v2234_v20 = vpop.f32.mrf.mxu1  ;;  %v3966_v17 = vmul.f32 %v3210_v55, %v7511_v22 }
 0x671   : > { %v1748_v23 = vpop.f32.mrf.mxu0  ;;  %v3968_v60 = vmul.f32 %v2234_v20, %v7513_v50 }
 0x672   : > { %v5628_v31 = vrot.slane %v5627_v44, 2  ;;  %v5642_v63 = vadd.f32 %v5641_v52, %v3965_v56  ;;  %v5651_v30 = vadd.f32 %v5650_v5, %v3966_v17 }
 0x673   : > { %v5634_v41 = vadd.f32 %v5633_v0, %v3968_v60 }
 0x674   : > { %v5629_v61 = vadd.f32 %v5628_v31, %v5627_v44 }
 0x675   : > { %v5635_v19 = vrot.slane %v5634_v41, 4 }
 0x676   : > { %v5630_v62 = vrot.slane %v5629_v61, 1 }
 0x677   : > { %v5636_v12 = vadd.f32 %v5635_v19, %v5634_v41  ;;  %v2723_v33 = vpop.f32.mrf.mxu2  ;;  %v3212_v27 = vpop.f32.mrf.mxu3  ;;  %v3971_v41 = vmul.f32 %v1748_v23, %v7428_v28 }
 0x678   : > { %v5631_v25 = vadd.f32 %v5630_v62, %v5629_v61  ;;  %v3969_v49 = vmul.f32 %v2723_v33, %v7523_v4  ;;  %v2237_v43 = vpop.f32.mrf.mxu1  ;;  %v3970_v36 = vmul.f32 %v3212_v27, %v7525_v14 }
 0x679   : > { %v1750_v2 = vpop.f32.mrf.mxu0  ;;  %v5637_v57 = vrot.slane %v5636_v12, 2 }
 0x67a   : > { %v9472_v16 = vsel %vm5931_vm5, %v5631_v25, %v9442_v59  ;;  %v5643_v11 = vadd.f32 %v5642_v63, %v3969_v49  ;;  %v5652_v13 = vadd.f32 %v5651_v30, %v3970_v36  ;;  %v3975_v62 = vmul.f32 %v1750_v2, %v7430_v38 }
 0x67b   : > { %v5638_v42 = vadd.f32 %v5637_v57, %v5636_v12 }
 0x67c   : > { %v5644_v46 = vrot.slane %v5643_v11, 4  ;;  %v5653_v35 = vrot.slane %v5652_v13, 4  ;;  %v5659_v19 = vadd.f32 %v3975_v62, %v3971_v41 }
 0x67d   : > { %v5639_v34 = vrot.slane %v5638_v42, 1 }
 0x67e   : > { %v5645_v21 = vadd.f32 %v5644_v46, %v5643_v11  ;;  %v5654_v59 = vadd.f32 %v5653_v35, %v5652_v13  ;;  %v3972_v11 = vmul.f32 %v2237_v43, %v7462_v26 }
 0x67f   : > { %v5640_v51 = vadd.f32 %v5639_v34, %v5638_v42  ;;  %v2726_v3 = vpop.f32.mrf.mxu2  ;;  %v3215_v15 = vpop.f32.mrf.mxu3 }
 0x680   : > { %v5646_v39 = vrot.slane %v5645_v21, 2  ;;  %v2239_v29 = vpop.f32.mrf.mxu1  ;;  %v5655_v58 = vrot.slane %v5654_v59, 2 }
 0x681   : > { %v1753_v37 = vpop.f32.mrf.mxu0  ;;  %v9478_v10 = vsel %vm5931_vm5, %v5640_v51, %v9451_v40  ;;  %v3976_v36 = vmul.f32 %v2239_v29, %v7464_v54 }
 0x682   : > { %v5647_v52 = vadd.f32 %v5646_v39, %v5645_v21  ;;  %v5656_v5 = vadd.f32 %v5655_v58, %v5654_v59  ;;  %v3979_v25 = vmul.f32 %v1753_v37, %v7446_v53 }
 0x683   : > { %v5668_v46 = vadd.f32 %v3976_v36, %v3972_v11 }
 0x684   : > { %v5648_v0 = vrot.slane %v5647_v52, 1  ;;  %v5657_v18 = vrot.slane %v5656_v5, 1  ;;  %v5660_v49 = vadd.f32 %v5659_v19, %v3979_v25 }
 0x686   : > { %v5649_v44 = vadd.f32 %v5648_v0, %v5647_v52  ;;  %v5658_v31 = vadd.f32 %v5657_v18, %v5656_v5  ;;  %v3973_v5 = vmul.f32 %v2726_v3, %v7485_v6 }
 0x687   : > { %v2728_v56 = vpop.f32.mrf.mxu2  ;;  %v3217_v20 = vpop.f32.mrf.mxu3 }
 0x688   : > { %v9482_v55 = vsel %vm5931_vm5, %v5649_v44, %v9458_v32  ;;  %v2242_v17 = vpop.f32.mrf.mxu1  ;;  %v9485_v61 = vsel %vm5931_vm5, %v5658_v31, %v6094_v45  ;;  %v3977_v39 = vmul.f32 %v2728_v56, %v7487_v7  ;;  %v3978_v58 = vmul.f32 %v3217_v20, %v7493_v24 }
 0x689   : > { %v1755_v47 = vpop.f32.mrf.mxu0  ;;  %v3980_v42 = vmul.f32 %v2242_v17, %v7489_v8  ;;  %v3974_v44 = vmul.f32 %v3215_v15, %v7491_v9 }
 0x68a   : > { %v3983_v12 = vmul.f32 %v1755_v47, %v7477_v1  ;;  %v5677_v17 = vadd.f32 %v3977_v39, %v3973_v5 }
 0x68b   : > { %v5669_v51 = vadd.f32 %v5668_v46, %v3980_v42  ;;  %v5686_v20 = vadd.f32 %v3978_v58, %v3974_v44 }
 0x68c   : > { %v5661_v45 = vadd.f32 %v5660_v49, %v3983_v12 }
 0x68e   : > { %v5662_v2 = vrot.slane %v5661_v45, 4 }
 0x68f   : > { %v2731_v60 = vpop.f32.mrf.mxu2  ;;  %v3220_v63 = vpop.f32.mrf.mxu3 }
 0x690   : > { %v2244_v30 = vpop.f32.mrf.mxu1  ;;  %v5663_v59 = vadd.f32 %v5662_v2, %v5661_v45  ;;  %v3981_v0 = vmul.f32 %v2731_v60, %v7505_v48 }
 0x691   : > { %v1758_v40 = vpop.f32.mrf.mxu0  ;;  %v3984_v34 = vmul.f32 %v2244_v30, %v7513_v50 }
 0x692   : > { %v3987_v29 = vmul.f32 %v1758_v40, %v7428_v28  ;;  %v5664_v47 = vrot.slane %v5663_v59, 2  ;;  %v5678_v41 = vadd.f32 %v5677_v17, %v3981_v0 }
 0x693   : > { %v5670_v52 = vadd.f32 %v5669_v51, %v3984_v34 }
 0x694   : > { %v5665_v19 = vadd.f32 %v5664_v47, %v5663_v59 }
 0x695   : > { %v5671_v30 = vrot.slane %v5670_v52, 4 }
 0x696   : > { %v5666_v11 = vrot.slane %v5665_v19, 1 }
 0x697   : > { %v2733_v33 = vpop.f32.mrf.mxu2  ;;  %v3222_v27 = vpop.f32.mrf.mxu3  ;;  %v5672_v49 = vadd.f32 %v5671_v30, %v5670_v52 }
 0x698   : > { %v2247_v57 = vpop.f32.mrf.mxu1  ;;  %v3985_v56 = vmul.f32 %v2733_v33, %v7523_v4  ;;  %v3986_v3 = vmul.f32 %v3222_v27, %v7525_v14 }
 0x699   : > { %v1760_v32 = vpop.f32.mrf.mxu0  ;;  %v3988_v45 = vmul.f32 %v2247_v57, %v7462_v26  ;;  %v5673_v46 = vrot.slane %v5672_v49, 2 }
 0x69a   : > { %v3991_v37 = vmul.f32 %v1760_v32, %v7430_v38  ;;  %v3982_v38 = vmul.f32 %v3220_v63, %v7511_v22  ;;  %v5679_v63 = vadd.f32 %v5678_v41, %v3985_v56 }
 0x69b   : > { %v5674_v58 = vadd.f32 %v5673_v46, %v5672_v49 }
 0x69c   : > { %v5695_v18 = vadd.f32 %v3991_v37, %v3987_v29  ;;  %v5687_v15 = vadd.f32 %v5686_v20, %v3982_v38  ;;  %v5680_v42 = vrot.slane %v5679_v63, 4 }
 0x69e   : > { %v5688_v33 = vadd.f32 %v5687_v15, %v3986_v3  ;;  %v5681_v26 = vadd.f32 %v5680_v42, %v5679_v63 }
 0x69f   : > { %v2736_v23 = vpop.f32.mrf.mxu2  ;;  %v3225_v35 = vpop.f32.mrf.mxu3 }
 0x6a0   : > { %v2249_v21 = vpop.f32.mrf.mxu1  ;;  %v5689_v34 = vrot.slane %v5688_v33, 4  ;;  %v3989_v5 = vmul.f32 %v2736_v23, %v7485_v6  ;;  %v5675_v6 = vrot.slane %v5674_v58, 1 }
 0x6a1   : > { %v1763_v13 = vpop.f32.mrf.mxu0  ;;  %v3992_v12 = vmul.f32 %v2249_v21, %v7464_v54  ;;  %v5667_v21 = vadd.f32 %v5666_v11, %v5665_v19 }
 0x6a2   : > { %v3995_v43 = vmul.f32 %v1763_v13, %v7446_v53  ;;  %v5690_v52 = vadd.f32 %v5689_v34, %v5688_v33 }
 0x6a3   : > { %v5704_v27 = vadd.f32 %v3992_v12, %v3988_v45 }
 0x6a4   : > { %v5696_v40 = vadd.f32 %v5695_v18, %v3995_v43  ;;  %v3990_v18 = vmul.f32 %v3225_v35, %v7491_v9  ;;  %v5691_v23 = vrot.slane %v5690_v52, 2 }
 0x6a7   : > { %v2738_v28 = vpop.f32.mrf.mxu2  ;;  %v3227_v62 = vpop.f32.mrf.mxu3 }
 0x6a8   : > { %v2252_v60 = vpop.f32.mrf.mxu1  ;;  %v3993_v29 = vmul.f32 %v2738_v28, %v7487_v7  ;;  %v6075_v7 = vsel %vm5933_vm6, %v5667_v21, %v9472_v16 }
 0x6a9   : > { %v1765_v31 = vpop.f32.mrf.mxu0 }
 0x6aa   : > { %v3999_v53 = vmul.f32 %v1765_v31, %v7477_v1  ;;  %v3996_v1 = vmul.f32 %v2252_v60, %v7489_v8  ;;  %v3994_v8 = vmul.f32 %v3227_v62, %v7493_v24  ;;  %v5713_v47 = vadd.f32 %v3993_v29, %v3989_v5 }
 0x6ab   : > { %v5682_v24 = vrot.slane %v5681_v26, 2  ;;  %v5676_v62 = vadd.f32 %v5675_v6, %v5674_v58  ;;  %v5692_v60 = vadd.f32 %v5691_v23, %v5690_v52 }
 0x6ac   : > { %v5697_v25 = vadd.f32 %v5696_v40, %v3999_v53  ;;  %v5705_v59 = vadd.f32 %v5704_v27, %v3996_v1  ;;  %v5722_v31 = vadd.f32 %v3994_v8, %v3990_v18 }
 0x6ad   : > { %v5683_v20 = vadd.f32 %v5682_v24, %v5681_v26 }
 0x6ae   : > { %v5698_v32 = vrot.slane %v5697_v25, 4 }
 0x6af   : > { %v2741_v2 = vpop.f32.mrf.mxu2  ;;  %v3230_v37 = vpop.f32.mrf.mxu3  ;;  %v5684_v63 = vrot.slane %v5683_v20, 1 }
 0x6b0   : > { %v5699_v36 = vadd.f32 %v5698_v32, %v5697_v25  ;;  %v2254_v51 = vpop.f32.mrf.mxu1  ;;  %v3997_v0 = vmul.f32 %v2741_v2, %v7505_v48  ;;  %v3998_v44 = vmul.f32 %v3230_v37, %v7511_v22  ;;  %v6082_v32 = vsel %vm5933_vm6, %v5676_v62, %v9478_v10 }
 0x6b1   : > { %v4000_v54 = vmul.f32 %v2254_v51, %v7513_v50 }
 0x6b2   : > { %v5700_v13 = vrot.slane %v5699_v36, 2  ;;  %v5714_v40 = vadd.f32 %v5713_v47, %v3997_v0  ;;  %v5723_v22 = vadd.f32 %v5722_v31, %v3998_v44 }
 0x6b3   : > { %v5706_v43 = vadd.f32 %v5705_v59, %v4000_v54 }
 0x6b4   : > { %v5701_v39 = vadd.f32 %v5700_v13, %v5699_v36  ;;  %v5685_v36 = vadd.f32 %v5684_v63, %v5683_v20 }
 0x6b5   : > { %v5707_v38 = vrot.slane %v5706_v43, 4 }
 0x6b6   : > { %v5702_v57 = vrot.slane %v5701_v39, 1  ;;  %v6089_v13 = vsel %vm5933_vm6, %v5685_v36, %v9482_v55 }
 0x6b7   : > { %v5708_v56 = vadd.f32 %v5707_v38, %v5706_v43  ;;  %v2743_v28 = vpop.f32.mrf.mxu2  ;;  %v3232_v48 = vpop.f32.mrf.mxu3 }
 0x6b8   : > { %v5703_v50 = vadd.f32 %v5702_v57, %v5701_v39  ;;  %v4001_v9 = vmul.f32 %v2743_v28, %v7523_v4  ;;  %v4002_v53 = vmul.f32 %v3232_v48, %v7525_v14  ;;  %v5693_v14 = vrot.slane %v5692_v60, 1 }
 0x6b9   : > { %v5709_v35 = vrot.slane %v5708_v56, 2 }
 0x6ba   : > { %v6076_v17 = vsel %vm5935_vm7, %v5703_v50, %v6075_v7  ;;  %v5715_v16 = vadd.f32 %v5714_v40, %v4001_v9  ;;  %v5724_v3 = vadd.f32 %v5723_v22, %v4002_v53  ;;  %v5694_v42 = vadd.f32 %v5693_v14, %v5692_v60 }
 0x6bb   : > { %6142 = vst [vmem:[%s7844_s21 + $0xa0] sm:$0xff] %v6076_v17  ;;  %v5710_v30 = vadd.f32 %v5709_v35, %v5708_v56 }
 0x6bc   : > { %v5716_v41 = vrot.slane %v5715_v16, 4  ;;  %v5725_v15 = vrot.slane %v5724_v3, 4  ;;  %v6096_v34 = vsel %vm5933_vm6, %v5694_v42, %v9485_v61 }
 0x6bd   : > { %v5711_v25 = vrot.slane %v5710_v30, 1 }
 0x6be   : > { %v5717_v19 = vadd.f32 %v5716_v41, %v5715_v16  ;;  %v5726_v12 = vadd.f32 %v5725_v15, %v5724_v3 }
 0x6bf   : > { %v5712_v4 = vadd.f32 %v5711_v25, %v5710_v30 }
 0x6c0   : > { %v5718_v49 = vrot.slane %v5717_v19, 2  ;;  %v5727_v45 = vrot.slane %v5726_v12, 2 }
 0x6c1   : > { %v6083_v33 = vsel %vm5935_vm7, %v5712_v4, %v6082_v32 }
 0x6c2   : > { %6143 = vst [vmem:[%s7844_s21 + $0xa8] sm:$0xff] %v6083_v33  ;;  %v5719_v1 = vadd.f32 %v5718_v49, %v5717_v19  ;;  %v5728_v11 = vadd.f32 %v5727_v45, %v5726_v12 }
 0x6c4   : > { %v5720_v27 = vrot.slane %v5719_v1, 1  ;;  %v5729_v10 = vrot.slane %v5728_v11, 1 }
 0x6c6   : > { %v5721_v2 = vadd.f32 %v5720_v27, %v5719_v1  ;;  %v5730_v46 = vadd.f32 %v5729_v10, %v5728_v11 }
 0x6c8   : > { %v6090_v37 = vsel %vm5935_vm7, %v5721_v2, %v6089_v13  ;;  %v6097_v51 = vsel %vm5935_vm7, %v5730_v46, %v6096_v34 }
 0x6c9   : > { %6144 = vst [vmem:[%s7844_s21 + $0xb0] sm:$0xff] %v6090_v37 }
 0x6ca   : > { %6145 = vst [vmem:[%s7844_s21 + $0xb8] sm:$0xff] %v6097_v51 }
 0x6cb   : > { %7170 = shalt.err (!%p7167_p3)
}
 0x6cc   : > { %s7207_s16 = smov 512   ;;  %s7208_s21 = smov 2048  }
 0x6cd   : > { %s7209_s24 = smov 32  }
 0x6ce   : > { %7101 = dma.vmem_to_hbm [thread:$0]  (%p7263_p5), %s9532_s13, 3072, %s6162_s4, %s6147_s5, %s7207_s16, %s7208_s21, %s7209_s24  }
 0x6cf PF: > { %p7107_p4 = scmp.ge.s32.totalorder %s7205_s12, 2  ;;  %s6176_s25 = sand.u32 1, %s7193_s9  }
 0x6d0   : > { %s6177_s26 = scalar_lea.sflag [#allocation3], %s6176_s25 }
 0x6d1   : > { %p7104_p7 = pnand %p7107_p4, %p7267_p6 }
 0x6d3   : > { %p7105_p8 = pneg %p7104_p7 }
 0x6d5   : > { %7188 = dma.done.wait (%p7105_p8), %s6177_s26, 3072  }
 0x6d6   : > { %7190 = vsyncadd (%p7105_p8), %s6177_s26, 4294964224  ;;  %p12_p9 = scmp.ge.s32.totalorder %s7250_s15, 6   ;;  %s9577_s9 = smov %s7197_s10 }
 0x6d7   : > { %s9578_s10 = smov %s7201_s11  ;;  %s9579_s11 = smov %s7261_s18 }
 0x6d8   : > { %s9580_s12 = smov %s7250_s15  ;;  %14 = sbr.rel (!%p12_p9) target bundleno = 3 (0x3), region = 64 }
 0x6dd   :  { %6183 = vsyncpa [#allocation3], 1 }
 0x6de   :  { %6185 = vsyncpa [#allocation3 + $0x1], 1 }

</bundles_post_ra>
